<compile_context>
chip_gen: v6e
topology: v6e:2x2x1
jax: 0.10.0
libtpu: 0.0.40
codegen_flags: <defaults>
</compile_context>

<pallas_src>
import jax
import jax.numpy as jnp
from jax.experimental import pallas as pl
from jax.experimental.pallas import tpu as pltpu


# ---------------------------------------------------------------------------
# Generic InvokeFunction wrapper (exact semantics of the PyTorch module).
# ---------------------------------------------------------------------------
class InvokeFunction:
    def __init__(self, function, *a, **kw):
        self.a = a
        self.kw = kw
        self.function = function

    def __call__(self, *a, **kw):
        # forward(*a, **kw) -> function(*a + self.a, **{**kw, **self.kw})
        return self.function(*a + self.a, **{**kw, **self.kw})


# ---------------------------------------------------------------------------
# Chip profile (budget / core-count / fast-path cutoff), with safe fallbacks.
# ---------------------------------------------------------------------------
def _chip_profile():
    kind = ""
    try:
        kind = jax.devices()[0].device_kind.lower()
    except Exception:
        pass
    if "v7" in kind:
        # 64 MiB physical VMEM per TC -> keep tile budget well under it;
        # 2 TensorCores share the 'parallel' grid axes.
        return {"vmem_budget": 40 << 20, "n_tc": 2, "flop_cutoff": 32 << 20}
    if "v5 lite" in kind or "v5e" in kind:
        return {"vmem_budget": 96 << 20, "n_tc": 1, "flop_cutoff": 8 << 20}
    # v6e / unknown: 128 MiB physical is typical; stay conservative anyway.
    return {"vmem_budget": 96 << 20, "n_tc": 1, "flop_cutoff": 16 << 20}


_PROFILE = _chip_profile()


# ---------------------------------------------------------------------------
# Tile planning helpers.
# ---------------------------------------------------------------------------
def _round_up(a, b):
    return ((a + b - 1) // b) * b


# Lane-dense candidates (multiples of 128) up to 1024.
_TILE_CANDS = (1024, 896, 768, 640, 512, 384, 256, 128)


def _pick_lane_tile(dim):
    """Pick a last-dim tile minimizing round-up padding, preferring
    MXU-friendly multiples of 256, then the largest tile (fewest grid steps)."""
    best_key, best_t = None, 128
    for t in _TILE_CANDS:
        key = (_round_up(max(dim, 1), t), 0 if t % 256 == 0 else 1, -t)
        if best_key is None or key < best_key:
            best_key, best_t = key, t
    return best_t


def _pick_row_tile(m, sub):
    """Pick the M (sublane) tile: full extent if it fits, else minimize padding."""
    mp = _round_up(max(m, 1), sub)
    if mp <= 512:
        return mp
    best_key, best_t = None, 256
    for t in (512, 256, 128):
        key = (_round_up(m, t), -t)
        if best_key is None or key < best_key:
            best_key, best_t = key, t
    return best_t


def plan_linear(in_features, out_features, *, compute_dtype=jnp.bfloat16):
    """Static (per-module) tiling plan over the K/N axes of the weight."""
    K, N = int(in_features), int(out_features)
    tk = _pick_lane_tile(K)
    tn = _pick_lane_tile(N)
    return {
        "K": K,
        "N": N,
        "tk": tk,
        "tn": tn,
        "Kp": _round_up(K, tk),
        "Np": _round_up(N, tn),
        "compute_dtype": jnp.dtype(compute_dtype),
    }


def prepare_linear_params(weight, bias, plan):
    """Hoisted, once-per-module glue: transpose, cast to the MXU compute dtype
    and zero-pad the static weight/bias to the planned tile grid, so the
    per-call hot path never re-pads / re-copies them."""
    K, N, Kp, Np = plan["K"], plan["N"], plan["Kp"], plan["Np"]
    cd = plan["compute_dtype"]
    w_t = jnp.transpose(weight).astype(cd)                    # (K, N)
    if (Kp, Np) != (K, N):
        w_t = jnp.pad(w_t, ((0, Kp - K), (0, Np - N)))
    b_row = bias.reshape(1, N).astype(jnp.float32)            # (1, N)
    if Np != N:
        b_row = jnp.pad(b_row, ((0, 0), (0, Np - N)))
    return w_t, b_row


# ---------------------------------------------------------------------------
# Pallas kernels.
# ---------------------------------------------------------------------------
def _linear_kernel_acc_out(x_ref, wt_ref, b_ref, o_ref):
    """fp32 output block doubles as the K-axis accumulator (output BlockSpec
    ignores k, so the block stays resident in VMEM across the reduction)."""
    k = pl.program_id(2)

    @pl.when(k == 0)
    def _():
        o_ref[...] = jnp.broadcast_to(b_ref[...], o_ref.shape)

    o_ref[...] += jnp.dot(
        x_ref[...], wt_ref[...], preferred_element_type=jnp.float32
    )


def _linear_kernel_scratch(x_ref, wt_ref, b_ref, o_ref, acc_ref):
    """Non-fp32 outputs: accumulate into an fp32 VMEM scratch, write back once."""
    k = pl.program_id(2)

    @pl.when(k == 0)
    def _():
        acc_ref[...] = jnp.zeros_like(acc_ref)

    acc_ref[...] += jnp.dot(
        x_ref[...], wt_ref[...], preferred_element_type=jnp.float32
    )

    @pl.when(k == pl.num_programs(2) - 1)
    def _():
        o_ref[...] = (acc_ref[...] + b_ref[...]).astype(o_ref.dtype)


# ---------------------------------------------------------------------------
# Hot-path wrapper: y = x @ weight.T + bias  (== F.linear(x, weight, bias)).
# ---------------------------------------------------------------------------
def pallas_linear(x, w_pad, b_pad, *, plan, force_kernel=False):
    """x: (M, K); w_pad: (Kp, Np) pre-transposed/cast/padded weight;
    b_pad: (1, Np) fp32 bias row; plan from plan_linear."""
    M, K = x.shape
    assert K == plan["K"], "in_features mismatch"
    N, Kp, Np = plan["N"], plan["Kp"], plan["Np"]
    tk, tn = plan["tk"], plan["tn"]
    cd = plan["compute_dtype"]
    out_dtype = x.dtype

    xc = x.astype(cd)

    # Tiny-shape fast path: below a few tens of MFLOPs, pallas_call / DMA
    # setup overhead dominates; XLA's fused dot is faster.  Uses the same
    # padded weight + compute dtype so numerics match the kernel path.
    if not force_kernel and (2 * M * N * K) < _PROFILE["flop_cutoff"]:
        xp = xc if Kp == K else jnp.pad(xc, ((0, 0), (0, Kp - K)))
        y = jnp.dot(xp, w_pad, preferred_element_type=jnp.float32) + b_pad
        return y[:, :N].astype(out_dtype)

    # Per-call M tiling. bf16 packs two rows per sublane -> 16-row alignment.
    sub = 16 if jnp.dtype(cd).itemsize < 4 else 8
    tm = _pick_row_tile(M, sub)
    Mp = _round_up(M, tm)

    # v7x megacore: guarantee >= 2 parallel blocks so both TensorCores work.
    if _PROFILE["n_tc"] >= 2 and (Mp // tm) * (Np // tn) == 1:
        if tn % 256 == 0:
            tn //= 2
        elif tm % (2 * sub) == 0 and (tm // 2) % 8 == 0:
            tm //= 2

    # Only x needs per-call padding (weight/bias padded once at bind time).
    if Mp != M or Kp != K:
        xp = jnp.pad(xc, ((0, Mp - M), (0, Kp - K)))
    else:
        xp = xc

    grid = (Mp // tm, Np // tn, Kp // tk)

    in_bytes = jnp.dtype(cd).itemsize
    out_bytes = jnp.dtype(out_dtype).itemsize
    use_scratch = jnp.dtype(out_dtype) != jnp.dtype(jnp.float32)

    # Double-buffered footprint estimate -> explicit VMEM limit (covers the
    # 16 MiB v5e scoped default; capped below v7x's 64 MiB physical VMEM).
    footprint = (
        2 * tm * tk * in_bytes
        + 2 * tk * tn * in_bytes
        + 2 * tn * 4
        + 2 * tm * tn * out_bytes
        + (tm * tn * 4 if use_scratch else 0)
    )
    vmem_limit = int(min(_PROFILE["vmem_budget"], max(32 << 20, 2 * footprint)))

    kernel = _linear_kernel_scratch if use_scratch else _linear_kernel_acc_out
    scratch = [pltpu.VMEM((tm, tn), jnp.float32)] if use_scratch else []

    out = pl.pallas_call(
        kernel,
        out_shape=jax.ShapeDtypeStruct((Mp, Np), out_dtype),
        grid_spec=pltpu.PrefetchScalarGridSpec(
            num_scalar_prefetch=0,
            grid=grid,
            in_specs=[
                pl.BlockSpec((tm, tk), lambda i, j, k: (i, k)),
                pl.BlockSpec((tk, tn), lambda i, j, k: (k, j)),
                pl.BlockSpec((1, tn), lambda i, j, k: (0, j)),
            ],
            out_specs=pl.BlockSpec((tm, tn), lambda i, j, k: (i, j)),
            scratch_shapes=scratch,
        ),
        compiler_params=pltpu.CompilerParams(
            # M/N parallel -> shards across the 2 TCs on v7x; K is a reduction.
            dimension_semantics=("parallel", "parallel", "arbitrary"),
            vmem_limit_bytes=vmem_limit,
        ),
    )(xp, w_pad, b_pad)

    if Mp != M or Np != N:
        out = out[:M, :N]
    return out


if __name__ == "__main__":
    key = jax.random.PRNGKey(0)
    kx, kw_, kb, kx2, kw2, kb2, kx3, kw3, kb3 = jax.random.split(key, 9)

    # ------------------------------------------------------------------
    # Test 1: main tiled-kernel path via the InvokeFunction module.
    # M=256, K=1536, N=384 -> multi-step K reduction (tk=768, 2 steps).
    # Default bf16 MXU compute with fp32 accumulation + fp32 output, so the
    # output block acts as the accumulator (no scratch).
    # ------------------------------------------------------------------
    M, K, N = 256, 1536, 384
    x = jax.random.normal(kx, (M, K), dtype=jnp.float32)
    weight = jax.random.normal(kw_, (N, K), dtype=jnp.float32) * 0.05
    bias = jax.random.normal(kb, (N,), dtype=jnp.float32) * 0.1
    ref = x @ weight.T + bias

    # Hoisted glue: plan + transpose/cast/pad ONCE, then bind exactly like
    # InvokeFunction(F.linear, weight, bias) binds its args.
    plan_bf16 = plan_linear(K, N)                      # bf16 compute (default)
    w_pad, b_pad = prepare_linear_params(weight, bias, plan_bf16)
    module = InvokeFunction(pallas_linear, w_pad, b_pad, plan=plan_bf16)

    y = jax.block_until_ready(module(x))
    assert y.shape == (M, N) and y.dtype == jnp.float32
    assert jnp.allclose(y, ref, atol=5e-2, rtol=5e-2), "bf16-compute mismatch"

    # fp32-compute variant (opt out of the bf16 default), tight tolerance.
    plan_f32 = plan_linear(K, N, compute_dtype=jnp.float32)
    w32, b32 = prepare_linear_params(weight, bias, plan_f32)
    module32 = InvokeFunction(pallas_linear, w32, b32, plan=plan_f32)
    y32 = jax.block_until_ready(module32(x))
    assert jnp.allclose(y32, ref, atol=1e-3, rtol=1e-3), "fp32-compute mismatch"

    # ------------------------------------------------------------------
    # Test 2: small ragged shapes, forced through the kernel to validate the
    # padding / sliced-edge handling (batch=10, in=48, out=200), fp32 compute.
    # ------------------------------------------------------------------
    M2, K2, N2 = 10, 48, 200
    x2 = jax.random.normal(kx2, (M2, K2), dtype=jnp.float32)
    weight2 = jax.random.normal(kw2, (N2, K2), dtype=jnp.float32) * 0.1
    bias2 = jax.random.normal(kb2, (N2,), dtype=jnp.float32) * 0.1
    plan2 = plan_linear(K2, N2, compute_dtype=jnp.float32)
    w2p, b2p = prepare_linear_params(weight2, bias2, plan2)
    module2 = InvokeFunction(
        pallas_linear, w2p, b2p, plan=plan2, force_kernel=True
    )
    y2 = jax.block_until_ready(module2(x2))
    ref2 = x2 @ weight2.T + bias2
    assert y2.shape == (M2, N2)
    assert jnp.allclose(y2, ref2, atol=1e-3, rtol=1e-3), "ragged kernel mismatch"

    # ------------------------------------------------------------------
    # Test 3: bf16 input -> bf16 output exercises the fp32-scratch kernel.
    # ------------------------------------------------------------------
    M3, K3, N3 = 64, 256, 256
    x3 = jax.random.normal(kx3, (M3, K3), dtype=jnp.float32).astype(jnp.bfloat16)
    weight3 = jax.random.normal(kw3, (N3, K3), dtype=jnp.float32) * 0.1
    bias3 = jax.random.normal(kb3, (N3,), dtype=jnp.float32) * 0.1
    plan3 = plan_linear(K3, N3)                        # bf16 compute (default)
    w3p, b3p = prepare_linear_params(weight3, bias3, plan3)
    module3 = InvokeFunction(
        pallas_linear, w3p, b3p, plan=plan3, force_kernel=True
    )
    y3 = jax.block_until_ready(module3(x3))
    assert y3.shape == (M3, N3) and y3.dtype == jnp.bfloat16
    ref3 = (
        x3.astype(jnp.float32)
        @ weight3.astype(jnp.bfloat16).astype(jnp.float32).T
        + bias3
    )
    assert jnp.allclose(
        y3.astype(jnp.float32), ref3, atol=3e-2, rtol=3e-2
    ), "bf16-output kernel mismatch"

    print("KERNEL_OK")
</pallas_src>

<mosaic_0001>
module attributes {stable_mosaic.version = 11 : i64} {
  func.func @_linear_kernel_acc_out(%arg0: i32, %arg1: i32, %arg2: i32, %arg3: memref<256x768xbf16, #tpu.memory_space<vmem>>, %arg4: memref<768x384xbf16, #tpu.memory_space<vmem>>, %arg5: memref<1x384xf32, #tpu.memory_space<vmem>>, %arg6: memref<256x384xf32, #tpu.memory_space<vmem>>) attributes {dimension_semantics = [#tpu.dimension_semantics<parallel>, #tpu.dimension_semantics<parallel>, #tpu.dimension_semantics<arbitrary>], iteration_bounds = array<i64: 1, 1, 2>, scalar_prefetch = 0 : i64, scratch_operands = 0 : i64, tpu.core_type = #tpu.core_type<tc>, window_params = [{transform_indices = @transform_0, window_bounds = array<i64: 256, 768>}, {transform_indices = @transform_1, window_bounds = array<i64: 768, 384>}, {transform_indices = @transform_2, window_bounds = array<i64: 1, 384>}, {transform_indices = @transform_3, window_bounds = array<i64: 256, 384>}]} {
    %c0_i32 = arith.constant 0 : i32
    %0 = arith.cmpi eq, %arg2, %c0_i32 : i32
    %1 = arith.extui %0 : i1 to i32
    %c0_i32_0 = arith.constant 0 : i32
    %2 = arith.cmpi ne, %1, %c0_i32_0 : i32
    scf.if %2 {
      %c0_8 = arith.constant 0 : index
      %c0_9 = arith.constant 0 : index
      %9 = vector.load %arg5[%c0_8, %c0_9] : memref<1x384xf32, #tpu.memory_space<vmem>>, vector<1x384xf32>
      %10 = vector.shape_cast %9 : vector<1x384xf32> to vector<1x384xf32>
      %11 = vector.broadcast %10 : vector<1x384xf32> to vector<256x384xf32>
      %c0_10 = arith.constant 0 : index
      %c0_11 = arith.constant 0 : index
      %12 = vector.load %arg6[%c0_10, %c0_11] : memref<256x384xf32, #tpu.memory_space<vmem>>, vector<256x384xf32>
      tpu.vector_store %arg6[%c0_10, %c0_11], %11 {strides = array<i32>} : memref<256x384xf32, #tpu.memory_space<vmem>>, vector<256x384xf32>,
    } else {
    }
    %c0 = arith.constant 0 : index
    %c0_1 = arith.constant 0 : index
    %3 = vector.load %arg6[%c0, %c0_1] : memref<256x384xf32, #tpu.memory_space<vmem>>, vector<256x384xf32>
    %c0_2 = arith.constant 0 : index
    %c0_3 = arith.constant 0 : index
    %4 = vector.load %arg3[%c0_2, %c0_3] : memref<256x768xbf16, #tpu.memory_space<vmem>>, vector<256x768xbf16>
    %c0_4 = arith.constant 0 : index
    %c0_5 = arith.constant 0 : index
    %5 = vector.load %arg4[%c0_4, %c0_5] : memref<768x384xbf16, #tpu.memory_space<vmem>>, vector<768x384xbf16>
    %cst = arith.constant dense<0.000000e+00> : vector<256x384xf32>
    %6 = tpu.matmul %4, %5, %cst {dimension_numbers = #tpu.dot_dimension_numbers<[1], [0], [0], [1], [0, 0, 1, 1], [], []>} : vector<256x768xbf16>, vector<768x384xbf16>, vector<256x384xf32> -> vector<256x384xf32>
    %7 = arith.addf %3, %6 : vector<256x384xf32>
    %c0_6 = arith.constant 0 : index
    %c0_7 = arith.constant 0 : index
    %8 = vector.load %arg6[%c0_6, %c0_7] : memref<256x384xf32, #tpu.memory_space<vmem>>, vector<256x384xf32>
    tpu.vector_store %arg6[%c0_6, %c0_7], %7 {strides = array<i32>} : memref<256x384xf32, #tpu.memory_space<vmem>>, vector<256x384xf32>,
    return
  }
  func.func @transform_0(%arg0: i32, %arg1: i32, %arg2: i32) -> (i32, i32) {
    %c0_i32 = arith.constant 0 : i32
    return %arg0, %arg2 : i32, i32
  }
  func.func @transform_1(%arg0: i32, %arg1: i32, %arg2: i32) -> (i32, i32) {
    %c0_i32 = arith.constant 0 : i32
    return %arg2, %arg1 : i32, i32
  }
  func.func @transform_2(%arg0: i32, %arg1: i32, %arg2: i32) -> (i32, i32) {
    %c0_i32 = arith.constant 0 : i32
    %c0_i32_0 = arith.constant 0 : i32
    return %c0_i32, %arg1 : i32, i32
  }
  func.func @transform_3(%arg0: i32, %arg1: i32, %arg2: i32) -> (i32, i32) {
    %c0_i32 = arith.constant 0 : i32
    return %arg0, %arg1 : i32, i32
  }
}

</mosaic_0001>

<bundles_post_ra>
// kernel: tpu_custom_call.1
= control target key start
LH: loop header
LB: loop body
LE: loop exit
PB: predicated region body
PF: predicated region fallthrough
CT: control target
= control target key end

     0   :  { %s5701_s0 = inlined_call_operand.hbm [shape: bf16[256,1536], index: 0, kind: input, shape index: {}]   ;;  %s5702_s1 = inlined_call_operand.hbm [shape: bf16[1536,384], index: 1, kind: input, shape index: {}]   ;;  %s5703_s2 = inlined_call_operand.hbm [shape: f32[1,384], index: 2, kind: input, shape index: {}]   ;;  %s5704_s3 = inlined_call_operand.hbm [shape: f32[256,384], index: 3, kind: output, shape index: {}]  }
   0x1   :  { %5710 = sst [smem:[#allocation44_spill]] %s5701_s0 }
   0x2   :  { %5711 = sst [smem:[#allocation45_spill]] %s5703_s2 }
   0x3   :  { %8 = vsyncpa [#allocation3], 0 }
   0x4   :  { %10 = vsyncpa [#allocation3 + $0x1], 0 }
   0x5   :  { %11 = vsyncpa [#allocation6], 0 }
   0x6   :  { %13 = vsyncpa [#allocation6 + $0x1], 0 }
   0x7   :  { %14 = vsyncpa [#allocation4], 0  ;;  %s4656_s12 = smov 0   ;;  %s4658_s13 = smov 0  }
   0x8   :  { %s4660_s14 = smov 0   ;;  %s4662_s15 = smov 0  }
   0x9   :  { %s4664_s16 = smov 0   ;;  %s4666_s17 = smov 0  }
   0xa LB: > { %s4685_s18 = sadd.s32 4294967295, %s4623_s17   ;;  %s32_s19 = sadd.s32 1, %s4619_s16  ;;  %s4623_s17 = sphi %s4666_s17, %s20_s17   ;;  %s4619_s16 = sphi %s4664_s16, %s5787_s16   ;;  %s4615_s15 = sphi %s4662_s15, %s5786_s15   ;;  %s4611_s14 = sphi %s4660_s14, %s5785_s14   ;;  %s4607_s13 = sphi %s4658_s13, %s5784_s13   ;;  %s4603_s12 = sphi %s4656_s12, %s5783_s12  }
   0xb   : > { %p33_p0 = scmp.ge.s32.totalorder %s32_s19, 2  ;;  %s48_s20 = sadd.s32 1, %s4611_s14 }
   0xc   : > { %p55_p1 = scmp.ne.s32.totalorder %s4611_s14, %s4607_s13  ;;  %p56_p2 = scmp.eq.s32.totalorder %s4623_s17, 0 }
   0xd   : > { %s5789_s19 = smov (%p33_p0, %s32_s19), 0  ;;  %p61_p4 = scmp.ne.s32.totalorder %s4607_s13, %s4603_s12 }
   0xe   : > { %5712 = sst [smem:[#allocation13_spill]] %s5789_s19  ;;  %p4694_p3 = por %p56_p2, %p55_p1 }
   0xf   : > { %s44_s22 = ssub.s32 %s4619_s16, %s5789_s19  ;;  %p5705_p5 = scmp.eq.s32.totalorder %s4685_s18, 0 }
  0x10   : > { %p46_p6 = scmp.eq.s32.totalorder %s44_s22, 0  ;;  %p3407_p7 = scmp.ge.s32.totalorder %s4623_s17, 1 }
  0x11   : > { %p4705_p8 = por %p5705_p5, %p61_p4  ;;  %p154_p9 = scmp.lt.s32.totalorder %s4623_s17, 3 }
  0x12   : > { %s4711_s24 = scalar_select %p46_p6, %s4611_s14, %s48_s20  }
  0x13   : > { %p4713_p10 = pnand %p3407_p7, %p154_p9  ;;  %s4625_s26 = smov [#allocation7]  }
  0x14   : > { %s170_s27 = sshll.u32 %s4625_s26, 4  ;;  %p4025_p12 = scmp.lt.s32.totalorder %s4623_s17, 2  ;;  %s171_s27 = int_to_ptr.vmem [resolvable:$true] %s170_s27 }
  0x15   : > { %p4013_p11 = pneg %p4713_p10  ;;  %s4733_s30 = sand.u32 1, %s4611_s14  }
  0x16   : > { %p4728_p0 = pnand %p4025_p12, %p4694_p3  ;;  %s4466_s4 = scalar_lea.vmem %s171_s27, 48 }
  0x17   : > { %p4722_p13 = pnand %p4013_p11, %p5705_p5  ;;  %p4467_p2 = scmp.ne.s32.totalorder %s171_s27, %s4466_s4 }
  0x18   : > { %s4473_s5 = scalar_lea.vmem %s171_s27, 64  ;;  %p4474_p7 = scmp.lt.s32.totalorder %s171_s27, %s171_s27 }
  0x19   : > { %p4457_p1 = pneg %p4722_p13  ;;  %p4475_p9 = scmp.lt.s32.totalorder %s4473_s5, %s4466_s4 }
  0x1b   : > { %p4469_p4 = pnand %p4467_p2, %p4457_p1  ;;  %p4476_p11 = por %p4475_p9, %p4474_p7 }
  0x1d   : > { %p4470_p6 = pneg %p4469_p4 }
  0x1f   : > { %p4477_p5 = pnand %p4476_p11, %p4470_p6 }
  0x21   : > { %4480 = shalt.err (!%p4477_p5)
}
  0x22   : > { %s5718_s2 = sld [smem:[#allocation45_spill]]  ;;  %s3996_s8 = smul.u32 768, %s4733_s30 }
  0x23   : > { %s3659_s9 = smul.u32 384, %s4619_s16  ;;  %s5719_s0 = sld [smem:[#allocation44_spill]] }
  0x24   : > { %s185_s20 = scalar_lea.vmem [#allocation2], %s3996_s8  ;;  %s182_s22 = scalar_lea.sflag [#allocation3], %s4733_s30 }
  0x25   : > { %s195_s21 = sshll.u32 %s185_s20, 4  ;;  %p4483_p3 = pneg %p4728_p0  ;;  %s196_s21 = int_to_ptr.vmem [resolvable:$true] %s195_s21 }
  0x26   : > { %s4494_s26 = scalar_lea.vmem %s196_s21, 12288  ;;  %s4626_s28 = smov [#allocation2]  }
  0x27   : > { %p4495_p5 = scmp.ne.s32.totalorder %s196_s21, %s4494_s26 }
  0x28   : > { %4016 = dma.hbm_to_vmem [thread:$0]  (!%p4722_p13), %s5718_s2, 48, %s171_s27, [#allocation6]  }
  0x29   : > { %s194_s12 = scalar_lea.hbm %s5719_s0, %s3659_s9  ;;  %p4497_p12 = pnand %p4495_p5, %p4483_p3 }
  0x2a   : > { %s4499_s27 = sshll.u32 %s4626_s28, 4  ;;  %s4500_s27 = int_to_ptr.vmem [resolvable:$false] %s4499_s27 }
  0x2b   : > { %p4498_p1 = pneg %p4497_p12  ;;  %s4501_s4 = scalar_lea.vmem %s4500_s27, 24576 }
  0x2c   : > { %p4502_p13 = scmp.lt.s32.totalorder %s196_s21, %s4500_s27  ;;  %p4503_p2 = scmp.lt.s32.totalorder %s4501_s4, %s4494_s26 }
  0x2e   : > { %p4504_p4 = por %p4503_p2, %p4502_p13 }
  0x30   : > { %p4505_p6 = pnand %p4504_p4, %p4498_p1 }
  0x32   : > { %4508 = shalt.err (!%p4505_p6)
}
  0x33   : > { %s4627_s5 = smov 768   ;;  %s4628_s6 = smov 384  }
  0x34   : > { %s4629_s7 = smov 24   ;;  %s205_s8 = sand.u32 1, %s4623_s17  }
  0x35   : > { %4020 = dma.hbm_to_vmem [thread:$0]  (!%p4728_p0), %s194_s12, 12288, %s196_s21, %s182_s22, %s4627_s5, %s4628_s6, %s4629_s7  }
  0x36   : > { %s3997_s9 = smul.u32 1152, %s4733_s30  ;;  %s206_s4 = scalar_lea.sflag [#allocation6], %s205_s8 }
  0x37   : > { %s4026_s10 = smul.u32 18432, %s4619_s16  ;;  %s4630_s2 = smov [#allocation5]  }
  0x38   : > { %s209_s28 = scalar_lea.vmem [#allocation5], %s3997_s9  ;;  %s4527_s19 = sshll.u32 %s4630_s2, 4  ;;  %s4528_s19 = int_to_ptr.vmem [resolvable:$false] %s4527_s19 }
  0x39   : > { %s218_s26 = scalar_lea.hbm %s5702_s1, %s4026_s10  ;;  %s219_s27 = sshll.u32 %s209_s28, 4  ;;  %s220_s27 = int_to_ptr.vmem [resolvable:$true] %s219_s27 }
  0x3a   : > { %s4522_s0 = scalar_lea.vmem %s220_s27, 18432  ;;  %s4529_s12 = scalar_lea.vmem %s4528_s19, 36864 }
  0x3b   : > { %p4523_p7 = scmp.ne.s32.totalorder %s220_s27, %s4522_s0  ;;  %p4530_p5 = scmp.lt.s32.totalorder %s220_s27, %s4528_s19 }
  0x3c   : > { %p4531_p12 = scmp.lt.s32.totalorder %s4529_s12, %s4522_s0 }
  0x3d   : > { %p4525_p9 = pnand %p4523_p7, %p4483_p3 }
  0x3e   : > { %p4532_p1 = por %p4531_p12, %p4530_p5 }
  0x3f   : > { %p4526_p11 = pneg %p4525_p9 }
  0x41   : > { %p4533_p13 = pnand %p4532_p1, %p4526_p11 }
  0x43   : > { %4536 = shalt.err (!%p4533_p13)
}
  0x44   : > { %s4631_s30 = smov 192   ;;  %s4632_s21 = smov 12  }
  0x45   : > { %4023 = dma.hbm_to_vmem [thread:$0]  (!%p4728_p0), %s218_s26, 18432, %s220_s27, %s206_s4, %s4631_s30, %s4631_s30, %s4632_s21  }
  0x46   : > { %231 = sbr.rel (%p4713_p10) target bundleno = 804 (0x324), region = 32 }
  0x4b   : > { %s233_s22 = sand.u32 1, %s4607_s13  }
  0x4c   : > { %s3999_s5 = smul.u32 768, %s233_s22  ;;  %s234_s2 = scalar_lea.sflag [#allocation3], %s233_s22 }
  0x4e   : > { %s4769_s6 = scalar_lea.vmem [#allocation2], %s3999_s5 }
  0x4f   : > { %4586 = dma.done.wait (%p4705_p8), %s234_s2, 12288  }
  0x50   : > { %4588 = vsyncadd (%p4705_p8), %s234_s2, 4294955008  ;;  %s242_s0 = sand.u32 1, %s4685_s18   ;;  %s4000_s19 = smul.u32 1152, %s233_s22 }
  0x51   : > { %s243_s29 = scalar_lea.sflag [#allocation6], %s242_s0 }
  0x52   : > { %s4776_s7 = scalar_lea.vmem [#allocation5], %s4000_s19 }
  0x53   : > { %4590 = dma.done.wait (%p4705_p8), %s243_s29, 18432  }
  0x54   : > { %4592 = vsyncadd (%p4705_p8), %s243_s29, 4294948864  ;;  %p5720_p10 = scmp.eq.s32.totalorder %s4685_s18, 0 }
  0x56   : > { %4594 = dma.done.wait (%p5720_p10), [#allocation6], 48   ;;  %p5721_p0 = pmov %p5720_p10 }
  0x57   : > { %p3414_p3 = scmp.ne.s32.totalorder %s4615_s15, 0 }
  0x58   : > { %4596 = vsyncadd (%p5721_p0), [#allocation6], 4294967248 }
  0x59   : > { %284 = sbr.rel (%p3414_p3) target bundleno = 150 (0x96), region = 48 }
  0x5e   : > { %v287_v0 = vlaneseq  ;;  %v285_v2 = vld [vmem:[#allocation7] sm:$0x7] }
  0x60   : > { %v288_v1 = vshrl.u32 %v287_v0, 7 }
  0x62   : > { %v289_v3 = vsub.s32 0, %v288_v1  ;;  %v293_v4 = vsub.s32 1, %v288_v1  ;;  %v297_v5 = vsub.s32 2, %v288_v1 }
  0x64   : > { %v290_v6 = vrot.slane %v285_v2, %v289_v3  ;;  %v4787_v7 = vrot.slane %v285_v2, %v293_v4  ;;  %v4789_v8 = vrot.slane %v285_v2, %v297_v5 }
  0x66   : > { %302 = vst [vmem:[#allocation8] sm:$0xff] %v290_v6  ;;  %305 = vst [vmem:[#allocation8 + $0x18] sm:$0xff] %v290_v6 }
  0x67   : > { %308 = vst [vmem:[#allocation8 + $0x30] sm:$0xff] %v290_v6  ;;  %311 = vst [vmem:[#allocation8 + $0x48] sm:$0xff] %v290_v6 }
  0x68   : > { %314 = vst [vmem:[#allocation8 + $0x60] sm:$0xff] %v290_v6  ;;  %317 = vst [vmem:[#allocation8 + $0x78] sm:$0xff] %v290_v6 }
  0x69   : > { %320 = vst [vmem:[#allocation8 + $0x90] sm:$0xff] %v290_v6  ;;  %323 = vst [vmem:[#allocation8 + $0xa8] sm:$0xff] %v290_v6 }
  0x6a   : > { %326 = vst [vmem:[#allocation8 + $0xc0] sm:$0xff] %v290_v6  ;;  %329 = vst [vmem:[#allocation8 + $0xd8] sm:$0xff] %v290_v6 }
  0x6b   : > { %332 = vst [vmem:[#allocation8 + $0xf0] sm:$0xff] %v290_v6  ;;  %335 = vst [vmem:[#allocation8 + $0x108] sm:$0xff] %v290_v6 }
  0x6c   : > { %338 = vst [vmem:[#allocation8 + $0x120] sm:$0xff] %v290_v6  ;;  %341 = vst [vmem:[#allocation8 + $0x138] sm:$0xff] %v290_v6 }
  0x6d   : > { %344 = vst [vmem:[#allocation8 + $0x150] sm:$0xff] %v290_v6  ;;  %347 = vst [vmem:[#allocation8 + $0x168] sm:$0xff] %v290_v6 }
  0x6e   : > { %350 = vst [vmem:[#allocation8 + $0x180] sm:$0xff] %v290_v6  ;;  %353 = vst [vmem:[#allocation8 + $0x198] sm:$0xff] %v290_v6 }
  0x6f   : > { %356 = vst [vmem:[#allocation8 + $0x1b0] sm:$0xff] %v290_v6  ;;  %359 = vst [vmem:[#allocation8 + $0x1c8] sm:$0xff] %v290_v6 }
  0x70   : > { %362 = vst [vmem:[#allocation8 + $0x1e0] sm:$0xff] %v290_v6  ;;  %365 = vst [vmem:[#allocation8 + $0x1f8] sm:$0xff] %v290_v6 }
  0x71   : > { %368 = vst [vmem:[#allocation8 + $0x210] sm:$0xff] %v290_v6  ;;  %371 = vst [vmem:[#allocation8 + $0x228] sm:$0xff] %v290_v6 }
  0x72   : > { %374 = vst [vmem:[#allocation8 + $0x240] sm:$0xff] %v290_v6  ;;  %377 = vst [vmem:[#allocation8 + $0x258] sm:$0xff] %v290_v6 }
  0x73   : > { %380 = vst [vmem:[#allocation8 + $0x270] sm:$0xff] %v290_v6  ;;  %383 = vst [vmem:[#allocation8 + $0x288] sm:$0xff] %v290_v6 }
  0x74   : > { %386 = vst [vmem:[#allocation8 + $0x2a0] sm:$0xff] %v290_v6  ;;  %389 = vst [vmem:[#allocation8 + $0x2b8] sm:$0xff] %v290_v6 }
  0x75   : > { %392 = vst [vmem:[#allocation8 + $0x2d0] sm:$0xff] %v290_v6  ;;  %395 = vst [vmem:[#allocation8 + $0x2e8] sm:$0xff] %v290_v6 }
  0x76   : > { %303 = vst [vmem:[#allocation8 + $0x8] sm:$0xff] %v4787_v7  ;;  %306 = vst [vmem:[#allocation8 + $0x20] sm:$0xff] %v4787_v7 }
  0x77   : > { %309 = vst [vmem:[#allocation8 + $0x38] sm:$0xff] %v4787_v7  ;;  %312 = vst [vmem:[#allocation8 + $0x50] sm:$0xff] %v4787_v7 }
  0x78   : > { %315 = vst [vmem:[#allocation8 + $0x68] sm:$0xff] %v4787_v7  ;;  %318 = vst [vmem:[#allocation8 + $0x80] sm:$0xff] %v4787_v7 }
  0x79   : > { %321 = vst [vmem:[#allocation8 + $0x98] sm:$0xff] %v4787_v7  ;;  %324 = vst [vmem:[#allocation8 + $0xb0] sm:$0xff] %v4787_v7 }
  0x7a   : > { %327 = vst [vmem:[#allocation8 + $0xc8] sm:$0xff] %v4787_v7  ;;  %330 = vst [vmem:[#allocation8 + $0xe0] sm:$0xff] %v4787_v7 }
  0x7b   : > { %333 = vst [vmem:[#allocation8 + $0xf8] sm:$0xff] %v4787_v7  ;;  %336 = vst [vmem:[#allocation8 + $0x110] sm:$0xff] %v4787_v7 }
  0x7c   : > { %339 = vst [vmem:[#allocation8 + $0x128] sm:$0xff] %v4787_v7  ;;  %342 = vst [vmem:[#allocation8 + $0x140] sm:$0xff] %v4787_v7 }
  0x7d   : > { %345 = vst [vmem:[#allocation8 + $0x158] sm:$0xff] %v4787_v7  ;;  %348 = vst [vmem:[#allocation8 + $0x170] sm:$0xff] %v4787_v7 }
  0x7e   : > { %351 = vst [vmem:[#allocation8 + $0x188] sm:$0xff] %v4787_v7  ;;  %354 = vst [vmem:[#allocation8 + $0x1a0] sm:$0xff] %v4787_v7 }
  0x7f   : > { %357 = vst [vmem:[#allocation8 + $0x1b8] sm:$0xff] %v4787_v7  ;;  %360 = vst [vmem:[#allocation8 + $0x1d0] sm:$0xff] %v4787_v7 }
  0x80   : > { %363 = vst [vmem:[#allocation8 + $0x1e8] sm:$0xff] %v4787_v7  ;;  %366 = vst [vmem:[#allocation8 + $0x200] sm:$0xff] %v4787_v7 }
  0x81   : > { %369 = vst [vmem:[#allocation8 + $0x218] sm:$0xff] %v4787_v7  ;;  %372 = vst [vmem:[#allocation8 + $0x230] sm:$0xff] %v4787_v7 }
  0x82   : > { %375 = vst [vmem:[#allocation8 + $0x248] sm:$0xff] %v4787_v7  ;;  %378 = vst [vmem:[#allocation8 + $0x260] sm:$0xff] %v4787_v7 }
  0x83   : > { %381 = vst [vmem:[#allocation8 + $0x278] sm:$0xff] %v4787_v7  ;;  %384 = vst [vmem:[#allocation8 + $0x290] sm:$0xff] %v4787_v7 }
  0x84   : > { %387 = vst [vmem:[#allocation8 + $0x2a8] sm:$0xff] %v4787_v7  ;;  %390 = vst [vmem:[#allocation8 + $0x2c0] sm:$0xff] %v4787_v7 }
  0x85   : > { %393 = vst [vmem:[#allocation8 + $0x2d8] sm:$0xff] %v4787_v7  ;;  %396 = vst [vmem:[#allocation8 + $0x2f0] sm:$0xff] %v4787_v7 }
  0x86   : > { %304 = vst [vmem:[#allocation8 + $0x10] sm:$0xff] %v4789_v8  ;;  %307 = vst [vmem:[#allocation8 + $0x28] sm:$0xff] %v4789_v8 }
  0x87   : > { %310 = vst [vmem:[#allocation8 + $0x40] sm:$0xff] %v4789_v8  ;;  %313 = vst [vmem:[#allocation8 + $0x58] sm:$0xff] %v4789_v8 }
  0x88   : > { %316 = vst [vmem:[#allocation8 + $0x70] sm:$0xff] %v4789_v8  ;;  %319 = vst [vmem:[#allocation8 + $0x88] sm:$0xff] %v4789_v8 }
  0x89   : > { %322 = vst [vmem:[#allocation8 + $0xa0] sm:$0xff] %v4789_v8  ;;  %325 = vst [vmem:[#allocation8 + $0xb8] sm:$0xff] %v4789_v8 }
  0x8a   : > { %328 = vst [vmem:[#allocation8 + $0xd0] sm:$0xff] %v4789_v8  ;;  %331 = vst [vmem:[#allocation8 + $0xe8] sm:$0xff] %v4789_v8 }
  0x8b   : > { %334 = vst [vmem:[#allocation8 + $0x100] sm:$0xff] %v4789_v8  ;;  %337 = vst [vmem:[#allocation8 + $0x118] sm:$0xff] %v4789_v8 }
  0x8c   : > { %340 = vst [vmem:[#allocation8 + $0x130] sm:$0xff] %v4789_v8  ;;  %343 = vst [vmem:[#allocation8 + $0x148] sm:$0xff] %v4789_v8 }
  0x8d   : > { %346 = vst [vmem:[#allocation8 + $0x160] sm:$0xff] %v4789_v8  ;;  %349 = vst [vmem:[#allocation8 + $0x178] sm:$0xff] %v4789_v8 }
  0x8e   : > { %352 = vst [vmem:[#allocation8 + $0x190] sm:$0xff] %v4789_v8  ;;  %355 = vst [vmem:[#allocation8 + $0x1a8] sm:$0xff] %v4789_v8 }
  0x8f   : > { %358 = vst [vmem:[#allocation8 + $0x1c0] sm:$0xff] %v4789_v8  ;;  %361 = vst [vmem:[#allocation8 + $0x1d8] sm:$0xff] %v4789_v8 }
  0x90   : > { %364 = vst [vmem:[#allocation8 + $0x1f0] sm:$0xff] %v4789_v8  ;;  %367 = vst [vmem:[#allocation8 + $0x208] sm:$0xff] %v4789_v8 }
  0x91   : > { %370 = vst [vmem:[#allocation8 + $0x220] sm:$0xff] %v4789_v8  ;;  %373 = vst [vmem:[#allocation8 + $0x238] sm:$0xff] %v4789_v8 }
  0x92   : > { %376 = vst [vmem:[#allocation8 + $0x250] sm:$0xff] %v4789_v8  ;;  %379 = vst [vmem:[#allocation8 + $0x268] sm:$0xff] %v4789_v8 }
  0x93   : > { %382 = vst [vmem:[#allocation8 + $0x280] sm:$0xff] %v4789_v8  ;;  %385 = vst [vmem:[#allocation8 + $0x298] sm:$0xff] %v4789_v8 }
  0x94   : > { %388 = vst [vmem:[#allocation8 + $0x2b0] sm:$0xff] %v4789_v8  ;;  %391 = vst [vmem:[#allocation8 + $0x2c8] sm:$0xff] %v4789_v8 }
  0x95   : > { %394 = vst [vmem:[#allocation8 + $0x2e0] sm:$0xff] %v4789_v8  ;;  %397 = vst [vmem:[#allocation8 + $0x2f8] sm:$0xff] %v4789_v8 }
  0x96 PF: > { %v4087_v9 = vld [vmem:[%s4776_s7 + $0xac] ss:$12 sps:$4 sm:$0xff]   ;;  %v4091_v11 = vld [vmem:[%s4776_s7 + $0xa8] ss:$12 sps:$4 sm:$0xff]   ;;  %v4097_v15 = vld [vmem:[%s4776_s7 + $0x90] ss:$12 sps:$4 sm:$0xff]  }
  0x97   : > { %v4089_v10 = vld [vmem:[%s4776_s7 + $0x22c] ss:$12 sps:$4 sm:$0xff]   ;;  %2030 = vmatprep.subr.bf16.mxu0 %v4087_v9  ;;  %v4092_v12 = vld [vmem:[%s4776_s7 + $0x228] ss:$12 sps:$4 sm:$0xff]   ;;  %v4098_v16 = vld [vmem:[%s4776_s7 + $0x210] ss:$12 sps:$4 sm:$0xff]  }
  0x98   : > { %2223 = vmatprep.subr.bf16.mxu1 %v4089_v10  ;;  %v4093_v13 = vld [vmem:[%s4776_s7 + $0x94] ss:$12 sps:$4 sm:$0xff]   ;;  %2031 = vmatpush1.bf16.msra.mxu0 %v4091_v11  ;;  %v4099_v17 = vld [vmem:[%s4776_s7 + $0x7c] ss:$12 sps:$4 sm:$0xff]   ;;  %v4103_v19 = vld [vmem:[%s4776_s7 + $0x78] ss:$12 sps:$4 sm:$0xff]  }
  0x99   : > { %2224 = vmatpush1.bf16.msra.mxu1 %v4092_v12  ;;  %v4095_v14 = vld [vmem:[%s4776_s7 + $0x214] ss:$12 sps:$4 sm:$0xff]   ;;  %2032 = vmatprep.subr.bf16.mxu0 %v4093_v13  ;;  %v4101_v18 = vld [vmem:[%s4776_s7 + $0x1fc] ss:$12 sps:$4 sm:$0xff]   ;;  %v4104_v20 = vld [vmem:[%s4776_s7 + $0x1f8] ss:$12 sps:$4 sm:$0xff]  }
  0x9a   : > { %2225 = vmatprep.subr.bf16.mxu1 %v4095_v14  ;;  %v4105_v21 = vld [vmem:[%s4776_s7 + $0x64] ss:$12 sps:$4 sm:$0xff]   ;;  %v4109_v23 = vld [vmem:[%s4776_s7 + $0x60] ss:$12 sps:$4 sm:$0xff]   ;;  %v4115_v27 = vld [vmem:[%s4776_s7 + $0x48] ss:$12 sps:$4 sm:$0xff]  }
  0x9b   : > { %v4107_v22 = vld [vmem:[%s4776_s7 + $0x1e4] ss:$12 sps:$4 sm:$0xff]   ;;  %v4110_v24 = vld [vmem:[%s4776_s7 + $0x1e0] ss:$12 sps:$4 sm:$0xff]   ;;  %v4116_v28 = vld [vmem:[%s4776_s7 + $0x1c8] ss:$12 sps:$4 sm:$0xff]  }
  0x9c   : > { %2033 = vmatpush1.bf16.msra.mxu0 %v4097_v15  ;;  %v4111_v25 = vld [vmem:[%s4776_s7 + $0x4c] ss:$12 sps:$4 sm:$0xff]   ;;  %v4117_v29 = vld [vmem:[%s4776_s7 + $0x34] ss:$12 sps:$4 sm:$0xff]   ;;  %v4121_v31 = vld [vmem:[%s4776_s7 + $0x30] ss:$12 sps:$4 sm:$0xff]  }
  0x9d   : > { %2226 = vmatpush1.bf16.msra.mxu1 %v4098_v16  ;;  %2034 = vmatprep.subr.bf16.mxu0 %v4099_v17  ;;  %v4113_v26 = vld [vmem:[%s4776_s7 + $0x1cc] ss:$12 sps:$4 sm:$0xff]   ;;  %v4119_v30 = vld [vmem:[%s4776_s7 + $0x1b4] ss:$12 sps:$4 sm:$0xff]   ;;  %v4122_v32 = vld [vmem:[%s4776_s7 + $0x1b0] ss:$12 sps:$4 sm:$0xff]  }
  0x9e   : > { %2227 = vmatprep.subr.bf16.mxu1 %v4101_v18  ;;  %v4123_v33 = vld [vmem:[%s4776_s7 + $0x1c] ss:$12 sps:$4 sm:$0xff]   ;;  %v4127_v35 = vld [vmem:[%s4776_s7 + $0x18] ss:$12 sps:$4 sm:$0xff]   ;;  %v4133_v39 = vld [vmem:[%s4776_s7] ss:$12 sps:$4 sm:$0xff]  }
  0x9f   : > { %v4125_v34 = vld [vmem:[%s4776_s7 + $0x19c] ss:$12 sps:$4 sm:$0xff]   ;;  %v4128_v36 = vld [vmem:[%s4776_s7 + $0x198] ss:$12 sps:$4 sm:$0xff]   ;;  %v4134_v40 = vld [vmem:[%s4776_s7 + $0x180] ss:$12 sps:$4 sm:$0xff]  }
  0xa0   : > { %2035 = vmatpush1.bf16.msra.mxu0 %v4103_v19  ;;  %v4129_v37 = vld [vmem:[%s4776_s7 + $0x4] ss:$12 sps:$4 sm:$0xff]   ;;  %v4135_v41 = vld [vmem:[%s4776_s7 + $0x16c] ss:$12 sps:$4 sm:$0xff]   ;;  %v4139_v43 = vld [vmem:[%s4776_s7 + $0x168] ss:$12 sps:$4 sm:$0xff]  }
  0xa1   : > { %2228 = vmatpush1.bf16.msra.mxu1 %v4104_v20  ;;  %2036 = vmatprep.subr.bf16.mxu0 %v4105_v21  ;;  %v4131_v38 = vld [vmem:[%s4776_s7 + $0x184] ss:$12 sps:$4 sm:$0xff]   ;;  %v4137_v42 = vld [vmem:[%s4776_s7 + $0x2ec] ss:$12 sps:$4 sm:$0xff]   ;;  %v4140_v44 = vld [vmem:[%s4776_s7 + $0x2e8] ss:$12 sps:$4 sm:$0xff]  }
  0xa2   : > { %2229 = vmatprep.subr.bf16.mxu1 %v4107_v22  ;;  %v4141_v45 = vld [vmem:[%s4776_s7 + $0x154] ss:$12 sps:$4 sm:$0xff]   ;;  %v4145_v47 = vld [vmem:[%s4776_s7 + $0x150] ss:$12 sps:$4 sm:$0xff]   ;;  %v4151_v51 = vld [vmem:[%s4776_s7 + $0x138] ss:$12 sps:$4 sm:$0xff]  }
  0xa3   : > { %v4143_v46 = vld [vmem:[%s4776_s7 + $0x2d4] ss:$12 sps:$4 sm:$0xff]   ;;  %v4146_v48 = vld [vmem:[%s4776_s7 + $0x2d0] ss:$12 sps:$4 sm:$0xff]   ;;  %v4152_v52 = vld [vmem:[%s4776_s7 + $0x2b8] ss:$12 sps:$4 sm:$0xff]  }
  0xa4   : > { %2037 = vmatpush1.bf16.msra.mxu0 %v4109_v23  ;;  %v4147_v49 = vld [vmem:[%s4776_s7 + $0x13c] ss:$12 sps:$4 sm:$0xff]   ;;  %v4153_v53 = vld [vmem:[%s4776_s7 + $0x124] ss:$12 sps:$4 sm:$0xff]   ;;  %v4157_v55 = vld [vmem:[%s4776_s7 + $0x120] ss:$12 sps:$4 sm:$0xff]  }
  0xa5   : > { %2230 = vmatpush1.bf16.msra.mxu1 %v4110_v24  ;;  %2038 = vmatprep.subr.bf16.mxu0 %v4111_v25  ;;  %v4149_v50 = vld [vmem:[%s4776_s7 + $0x2bc] ss:$12 sps:$4 sm:$0xff]   ;;  %v4155_v54 = vld [vmem:[%s4776_s7 + $0x2a4] ss:$12 sps:$4 sm:$0xff]   ;;  %v4158_v56 = vld [vmem:[%s4776_s7 + $0x2a0] ss:$12 sps:$4 sm:$0xff]  }
  0xa6   : > { %2231 = vmatprep.subr.bf16.mxu1 %v4113_v26  ;;  %v4159_v57 = vld [vmem:[%s4776_s7 + $0x10c] ss:$12 sps:$4 sm:$0xff]   ;;  %v4905_v58 = vld [vmem:[%s4769_s6 + $0x4] ss:$24 sps:$4 sm:$0xff]   ;;  %v4163_v61 = vld [vmem:[%s4776_s7 + $0x108] ss:$12 sps:$4 sm:$0xff]  }
  0xa7   : > { %v4161_v59 = vld [vmem:[%s4776_s7 + $0x28c] ss:$12 sps:$4 sm:$0xff]   ;;  %2062 = vmatprep.mubr.bf16.mxu0 %v4905_v58  ;;  %v4164_v62 = vld [vmem:[%s4776_s7 + $0x288] ss:$12 sps:$4 sm:$0xff]   ;;  %v4169_v1 = vld [vmem:[%s4776_s7 + $0xf0] ss:$12 sps:$4 sm:$0xff]  }
  0xa8   : > { %2039 = vmatpush1.bf16.msra.mxu0 %v4115_v27  ;;  %v4188_v60 = vld [vmem:[%s4769_s6 + $0xc] ss:$24 sps:$4 sm:$0xff]   ;;  %v4165_v63 = vld [vmem:[%s4776_s7 + $0xf4] ss:$12 sps:$4 sm:$0xff]   ;;  %v4170_v2 = vld [vmem:[%s4776_s7 + $0x270] ss:$12 sps:$4 sm:$0xff]  }
  0xa9   : > { %2232 = vmatpush1.bf16.msra.mxu1 %v4116_v28  ;;  %2040 = vmatprep.subr.bf16.mxu0 %v4117_v29  ;;  %v4167_v0 = vld [vmem:[%s4776_s7 + $0x274] ss:$12 sps:$4 sm:$0xff]   ;;  %v4171_v3 = vld [vmem:[%s4776_s7 + $0xdc] ss:$12 sps:$4 sm:$0xff]   ;;  %v4175_v5 = vld [vmem:[%s4776_s7 + $0xd8] ss:$12 sps:$4 sm:$0xff]  }
  0xaa   : > { %2233 = vmatprep.subr.bf16.mxu1 %v4119_v30  ;;  %2255 = vmatprep.mubr.bf16.mxu1 %v4188_v60  ;;  %v4173_v4 = vld [vmem:[%s4776_s7 + $0x25c] ss:$12 sps:$4 sm:$0xff]   ;;  %v4176_v6 = vld [vmem:[%s4776_s7 + $0x258] ss:$12 sps:$4 sm:$0xff]   ;;  %v4181_v9 = vld [vmem:[%s4776_s7 + $0xc0] ss:$12 sps:$4 sm:$0xff]  }
  0xab   : > { %v4177_v7 = vld [vmem:[%s4776_s7 + $0xc4] ss:$12 sps:$4 sm:$0xff]   ;;  %v4182_v10 = vld [vmem:[%s4776_s7 + $0x240] ss:$12 sps:$4 sm:$0xff]   ;;  %v4189_v15 = vld [vmem:[%s4776_s7 + $0x3a8] ss:$12 sps:$4 sm:$0xff]  }
  0xac   : > { %2041 = vmatpush1.bf16.msra.mxu0 %v4121_v31  ;;  %v4179_v8 = vld [vmem:[%s4776_s7 + $0x244] ss:$12 sps:$4 sm:$0xff]   ;;  %v4191_v11 = vld [vmem:[%s4776_s7 + $0x3ac] ss:$12 sps:$4 sm:$0xff]   ;;  %v4186_v14 = vld [vmem:[%s4769_s6 + $0x8] ss:$24 sps:$4 sm:$0xff]  }
  0xad   : > { %2234 = vmatpush1.bf16.msra.mxu1 %v4122_v32  ;;  %2042 = vmatprep.subr.bf16.mxu0 %v4123_v33  ;;  %v4192_v12 = vld [vmem:[%s4776_s7 + $0x170] ss:$12 sps:$4 sm:$0xff]   ;;  %v4927_v13 = vld [vmem:[%s4769_s6] ss:$24 sps:$4 sm:$0xff]   ;;  %v4933_v17 = vld [vmem:[%s4769_s6 + $0x34] ss:$24 sps:$4 sm:$0xff]  }
  0xae   : > { %2235 = vmatprep.subr.bf16.mxu1 %v4125_v34  ;;  %v4193_v16 = vld [vmem:[%s4776_s7 + $0xb0] ss:$12 sps:$4 sm:$0xff]   ;;  %v4202_v20 = vld [vmem:[%s4776_s7 + $0x394] ss:$12 sps:$4 sm:$0xff]   ;;  %v4212_v21 = vld [vmem:[%s4776_s7 + $0x158] ss:$12 sps:$4 sm:$0xff]  }
  0xaf   : > { %v4196_v18 = vld [vmem:[%s4769_s6 + $0x3c] ss:$24 sps:$4 sm:$0xff]   ;;  %v4213_v23 = vld [vmem:[%s4776_s7 + $0x98] ss:$12 sps:$4 sm:$0xff]   ;;  %v4232_v24 = vld [vmem:[%s4776_s7 + $0x140] ss:$12 sps:$4 sm:$0xff]  }
  0xb0   : > { %2043 = vmatpush1.bf16.msra.mxu0 %v4127_v35  ;;  %v4200_v19 = vld [vmem:[%s4776_s7 + $0x390] ss:$12 sps:$4 sm:$0xff]   ;;  %v4205_v28 = vld [vmem:[%s4769_s6 + $0x6c] ss:$24 sps:$4 sm:$0xff]   ;;  %v4960_v34 = vld [vmem:[%s4769_s6 + $0x60] ss:$24 sps:$4 sm:$0xff]  }
  0xb1   : > { %2236 = vmatpush1.bf16.msra.mxu1 %v4128_v36  ;;  %2044 = vmatprep.subr.bf16.mxu0 %v4129_v37  ;;  %v4211_v22 = vld [vmem:[%s4776_s7 + $0x37c] ss:$12 sps:$4 sm:$0xff]   ;;  %v4199_v26 = vld [vmem:[%s4769_s6 + $0x38] ss:$24 sps:$4 sm:$0xff]   ;;  %v4233_v30 = vld [vmem:[%s4776_s7 + $0x80] ss:$12 sps:$4 sm:$0xff]  }
  0xb2   : > { %2237 = vmatprep.subr.bf16.mxu1 %v4131_v38  ;;  %v4945_v25 = vld [vmem:[%s4769_s6 + $0x30] ss:$24 sps:$4 sm:$0xff]   ;;  %v4949_v27 = vld [vmem:[%s4769_s6 + $0x64] ss:$24 sps:$4 sm:$0xff]   ;;  %v4220_v32 = vld [vmem:[%s4776_s7 + $0x360] ss:$12 sps:$4 sm:$0xff]  }
  0xb3   : > { %v4209_v29 = vld [vmem:[%s4776_s7 + $0x378] ss:$12 sps:$4 sm:$0xff]   ;;  %v4252_v35 = vld [vmem:[%s4776_s7 + $0x128] ss:$12 sps:$4 sm:$0xff]   ;;  %s4633_s15 = smov [#allocation8]   ;;  %p4028_p8 = scmp.eq.s32.totalorder %s4685_s18, 1 }
  0xb4   : > { %2045 = vmatpush1.bf16.msra.mxu0 %v4133_v39  ;;  %v4222_v31 = vld [vmem:[%s4776_s7 + $0x364] ss:$12 sps:$4 sm:$0xff]   ;;  %v4231_v33 = vld [vmem:[%s4776_s7 + $0x34c] ss:$12 sps:$4 sm:$0xff]   ;;  %v4253_v36 = vld [vmem:[%s4776_s7 + $0x68] ss:$12 sps:$4 sm:$0xff]  }
  0xb5   : > { %2238 = vmatpush1.bf16.msra.mxu1 %v4134_v40  ;;  %2046 = vmatprep.subr.bf16.mxu0 %v4135_v41  ;;  %v4208_v37 = vld [vmem:[%s4769_s6 + $0x68] ss:$24 sps:$4 sm:$0xff]   ;;  %v4966_v38 = vld [vmem:[%s4769_s6 + $0x94] ss:$24 sps:$4 sm:$0xff]   ;;  %s3296_s23 = sshll.u32 %s4633_s15, 4  ;;  %s3297_s23 = int_to_ptr.vmem [resolvable:$true] %s3296_s23 }
  0xb6   : > { %2239 = vmatprep.subr.bf16.mxu1 %v4137_v42  ;;  %v4216_v39 = vld [vmem:[%s4769_s6 + $0x9c] ss:$24 sps:$4 sm:$0xff]   ;;  %v4974_v42 = vld [vmem:[%s4769_s6 + $0x90] ss:$24 sps:$4 sm:$0xff]   ;;  %s4537_s25 = scalar_lea.vmem %s3297_s23, 12288  ;;  %p4544_p7 = scmp.lt.s32.totalorder %s3297_s23, %s3297_s23 }
  0xb7   : > { %v4229_v40 = vld [vmem:[%s4776_s7 + $0x348] ss:$12 sps:$4 sm:$0xff]   ;;  %p4538_p2 = scmp.ne.s32.totalorder %s3297_s23, %s4537_s25  ;;  %p4545_p9 = scmp.lt.s32.totalorder %s4537_s25, %s4537_s25 }
  0xb8   : > { %2047 = vmatpush2.bf16.msra.mxu0 %v4139_v43  ;;  %v4242_v41 = vld [vmem:[%s4776_s7 + $0x334] ss:$12 sps:$4 sm:$0xff]   ;;  %v4219_v43 = vld [vmem:[%s4769_s6 + $0x98] ss:$24 sps:$4 sm:$0xff]  }
  0xb9   : > { %2240 = vmatpush2.bf16.msra.mxu1 %v4140_v44  ;;  %2048 = vmatprep.subr.bf16.mxu0 %v4141_v45  ;;  %v4240_v44 = vld [vmem:[%s4776_s7 + $0x330] ss:$12 sps:$4 sm:$0xff]   ;;  %v4282_v60 = vld [vmem:[%s4776_s7 + $0x454] ss:$12 sps:$4 sm:$0xff]   ;;  %p4539_p4 = pnand %p4538_p2, %p4028_p8  ;;  %p4546_p11 = por %p4545_p9, %p4544_p7 }
  0xba   : > { %2241 = vmatprep.subr.bf16.mxu1 %v4143_v46  ;;  %v4979_v45 = vld [vmem:[%s4769_s6 + $0xc4] ss:$24 sps:$4 sm:$0xff]  }
  0xbb   : > { %v4225_v46 = vld [vmem:[%s4769_s6 + $0xcc] ss:$24 sps:$4 sm:$0xff]   ;;  %p4540_p6 = pneg %p4539_p4 }
  0xbc   : > { %2049 = vmatpush2.bf16.msra.mxu0 %v4145_v47  ;;  %v4251_v47 = vld [vmem:[%s4776_s7 + $0x31c] ss:$12 sps:$4 sm:$0xff]  }
  0xbd   : > { %2242 = vmatpush2.bf16.msra.mxu1 %v4146_v48  ;;  %2050 = vmatprep.subr.bf16.mxu0 %v4147_v49  ;;  %v4272_v48 = vld [vmem:[%s4776_s7 + $0x110] ss:$12 sps:$4 sm:$0xff]   ;;  %p4547_p5 = pnand %p4546_p11, %p4540_p6 }
  0xbe   : > { %2243 = vmatprep.subr.bf16.mxu1 %v4149_v50  ;;  %v4273_v49 = vld [vmem:[%s4776_s7 + $0x50] ss:$12 sps:$4 sm:$0xff]   ;;  %v4249_v50 = vld [vmem:[%s4776_s7 + $0x318] ss:$12 sps:$4 sm:$0xff]  }
  0xc0   : > { %2051 = vmatpush2.bf16.msra.mxu0 %v4151_v51  ;;  %v4262_v51 = vld [vmem:[%s4776_s7 + $0x304] ss:$12 sps:$4 sm:$0xff]  }
  0xc1   : > { %2244 = vmatpush2.bf16.msra.mxu1 %v4152_v52  ;;  %2052 = vmatprep.subr.bf16.mxu0 %v4153_v53  ;;  %v4990_v52 = vld [vmem:[%s4769_s6 + $0xc0] ss:$24 sps:$4 sm:$0xff]  }
  0xc2   : > { %2245 = vmatprep.subr.bf16.mxu1 %v4155_v54  ;;  %v4228_v53 = vld [vmem:[%s4769_s6 + $0xc8] ss:$24 sps:$4 sm:$0xff]  }
  0xc3   : > { %v4260_v54 = vld [vmem:[%s4776_s7 + $0x300] ss:$12 sps:$4 sm:$0xff]  }
  0xc4   : > { %2053 = vmatpush2.bf16.msra.mxu0 %v4157_v55  ;;  %v4995_v55 = vld [vmem:[%s4769_s6 + $0xf4] ss:$24 sps:$4 sm:$0xff]  }
  0xc5   : > { %2246 = vmatpush2.bf16.msra.mxu1 %v4158_v56  ;;  %2054 = vmatprep.subr.bf16.mxu0 %v4159_v57  ;;  %v4271_v56 = vld [vmem:[%s4776_s7 + $0x46c] ss:$12 sps:$4 sm:$0xff]   ;;  %v4236_v57 = vld [vmem:[%s4769_s6 + $0xfc] ss:$24 sps:$4 sm:$0xff]  }
  0xc6   : > { %2247 = vmatprep.subr.bf16.mxu1 %v4161_v59  ;;  %v4269_v59 = vld [vmem:[%s4776_s7 + $0x468] ss:$12 sps:$4 sm:$0xff]  }
  0xc8   : > { %2055 = vmatpush2.bf16.msra.mxu0 %v4163_v61  ;;  %v4292_v61 = vld [vmem:[%s4776_s7 + $0xf8] ss:$12 sps:$4 sm:$0xff]  }
  0xc9   : > { %2248 = vmatpush2.bf16.msra.mxu1 %v4164_v62  ;;  %2056 = vmatprep.subr.bf16.mxu0 %v4165_v63  ;;  %v4293_v62 = vld [vmem:[%s4776_s7 + $0x38] ss:$12 sps:$4 sm:$0xff]   ;;  %v4280_v63 = vld [vmem:[%s4776_s7 + $0x450] ss:$12 sps:$4 sm:$0xff]  }
  0xca   : > { %2249 = vmatprep.subr.bf16.mxu1 %v4167_v0  ;;  %v5007_v0 = vld [vmem:[%s4769_s6 + $0xf0] ss:$24 sps:$4 sm:$0xff]  }
  0xcc   : > { %2057 = vmatpush2.bf16.msra.mxu0 %v4169_v1  ;;  %v4291_v1 = vld [vmem:[%s4776_s7 + $0x43c] ss:$12 sps:$4 sm:$0xff]  }
  0xcd   : > { %2250 = vmatpush2.bf16.msra.mxu1 %v4170_v2  ;;  %2058 = vmatprep.subr.bf16.mxu0 %v4171_v3  ;;  %v4239_v2 = vld [vmem:[%s4769_s6 + $0xf8] ss:$24 sps:$4 sm:$0xff]   ;;  %v5012_v3 = vld [vmem:[%s4769_s6 + $0x124] ss:$24 sps:$4 sm:$0xff]  }
  0xce   : > { %2251 = vmatprep.subr.bf16.mxu1 %v4173_v4  ;;  %v4245_v4 = vld [vmem:[%s4769_s6 + $0x12c] ss:$24 sps:$4 sm:$0xff]  }
  0xd0   : > { %2059 = vmatpush2.bf16.msra.mxu0 %v4175_v5  ;;  %v4289_v5 = vld [vmem:[%s4776_s7 + $0x438] ss:$12 sps:$4 sm:$0xff]  }
  0xd1   : > { %2252 = vmatpush2.bf16.msra.mxu1 %v4176_v6  ;;  %2060 = vmatprep.subr.bf16.mxu0 %v4177_v7  ;;  %v4302_v6 = vld [vmem:[%s4776_s7 + $0x424] ss:$12 sps:$4 sm:$0xff]   ;;  %v4312_v7 = vld [vmem:[%s4776_s7 + $0xe0] ss:$12 sps:$4 sm:$0xff]  }
  0xd2   : > { %2253 = vmatprep.subr.bf16.mxu1 %v4179_v8  ;;  %v4313_v8 = vld [vmem:[%s4776_s7 + $0x20] ss:$12 sps:$4 sm:$0xff]  }
  0xd4   : > { %2061 = vmatpush2.bf16.msra.mxu0 %v4181_v9  ;;  %v4300_v9 = vld [vmem:[%s4776_s7 + $0x420] ss:$12 sps:$4 sm:$0xff]  }
  0xd5   : > { %2254 = vmatpush2.bf16.msra.mxu1 %v4182_v10  ;;  %2416 = vmatprep.subr.bf16.mxu0 %v4191_v11  ;;  %v5023_v10 = vld [vmem:[%s4769_s6 + $0x120] ss:$24 sps:$4 sm:$0xff]  }
  0xd6   : > { %3660 = vmatprep.subr.bf16.mxu1 %v4192_v12  ;;  %v4311_v11 = vld [vmem:[%s4776_s7 + $0x40c] ss:$12 sps:$4 sm:$0xff]   ;;  %v4248_v12 = vld [vmem:[%s4769_s6 + $0x128] ss:$24 sps:$4 sm:$0xff]  }
  0xd7   : > { %2063 = vmatmul.mubr.bf16.vlgmr.msra.gmra.mxu0 %v4927_v13 }
  0xd8   : > { %2256 = vmatmul.mubr.bf16.vlgmr.msra.gmra.mxu1 %v4186_v14  ;;  %2417 = vmatpush1.bf16.msra.mxu0 %v4189_v15  ;;  %v5028_v14 = vld [vmem:[%s4769_s6 + $0x154] ss:$24 sps:$4 sm:$0xff]  }
  0xd9   : > { %3661 = vmatpush3.bf16.msra.mxu1 %v4193_v16  ;;  %2072 = vmatprep.mubr.bf16.mxu0 %v4933_v17  ;;  %v4256_v15 = vld [vmem:[%s4769_s6 + $0x15c] ss:$24 sps:$4 sm:$0xff]  }
  0xda   : > { %2265 = vmatprep.mubr.bf16.mxu1 %v4196_v18  ;;  %2418 = vmatprep.subr.bf16.mxu0 %v4202_v20  ;;  %v4309_v16 = vld [vmem:[%s4776_s7 + $0x408] ss:$12 sps:$4 sm:$0xff]  }
  0xdb   : > { %3662 = vmatprep.subr.bf16.mxu1 %v4212_v21  ;;  %v4322_v18 = vld [vmem:[%s4776_s7 + $0x3f4] ss:$12 sps:$4 sm:$0xff]   ;;  %v4331_v20 = vld [vmem:[%s4776_s7 + $0x3dc] ss:$12 sps:$4 sm:$0xff]  }
  0xdc   : > { %2419 = vmatpush1.bf16.msra.mxu0 %v4200_v19  ;;  %v4320_v19 = vld [vmem:[%s4776_s7 + $0x3f0] ss:$12 sps:$4 sm:$0xff]  }
  0xdd   : > { %3663 = vmatpush3.bf16.msra.mxu1 %v4213_v23  ;;  %2420 = vmatprep.subr.bf16.mxu0 %v4211_v22  ;;  %v5038_v21 = vld [vmem:[%s4769_s6 + $0x150] ss:$24 sps:$4 sm:$0xff]  }
  0xde   : > { %3664 = vmatprep.subr.bf16.mxu1 %v4232_v24  ;;  %v4332_v22 = vld [vmem:[%s4776_s7 + $0xc8] ss:$12 sps:$4 sm:$0xff]   ;;  %v4259_v24 = vld [vmem:[%s4769_s6 + $0x158] ss:$24 sps:$4 sm:$0xff]  }
  0xdf   : > { %2073 = vmatmul.mubr.bf16.gmra.mxu0 %v4945_v25  ;;  %v4333_v23 = vld [vmem:[%s4776_s7 + $0x8] ss:$12 sps:$4 sm:$0xff]  }
  0xe0   : > { %2266 = vmatmul.mubr.bf16.gmra.mxu1 %v4199_v26  ;;  %2082 = vmatprep.mubr.bf16.mxu0 %v4949_v27  ;;  %v5044_v26 = vld [vmem:[%s4769_s6 + $0x184] ss:$24 sps:$4 sm:$0xff]  }
  0xe1   : > { %2275 = vmatprep.mubr.bf16.mxu1 %v4205_v28  ;;  %2421 = vmatpush1.bf16.msra.mxu0 %v4209_v29  ;;  %v4265_v28 = vld [vmem:[%s4769_s6 + $0x18c] ss:$24 sps:$4 sm:$0xff]  }
  0xe2   : > { %3665 = vmatpush3.bf16.msra.mxu1 %v4233_v30  ;;  %2422 = vmatprep.subr.bf16.mxu0 %v4222_v31  ;;  %v4329_v29 = vld [vmem:[%s4776_s7 + $0x3d8] ss:$12 sps:$4 sm:$0xff]   ;;  %v4340_v31 = vld [vmem:[%s4776_s7 + $0x3c0] ss:$12 sps:$4 sm:$0xff]  }
  0xe3   : > { %3666 = vmatprep.subr.bf16.mxu1 %v4252_v35  ;;  %v4342_v30 = vld [vmem:[%s4776_s7 + $0x3c4] ss:$12 sps:$4 sm:$0xff]  }
  0xe4   : > { %v4346_v35 = vld [vmem:[%s4776_s7 + $0x2f0] ss:$12 sps:$4 sm:$0xff]  }
  0xe5   : > { %2423 = vmatpush1.bf16.msra.mxu0 %v4220_v32  ;;  %v5053_v32 = vld [vmem:[%s4769_s6 + $0x180] ss:$24 sps:$4 sm:$0xff]  }
  0xe6   : > { %3667 = vmatpush3.bf16.msra.mxu1 %v4253_v36  ;;  %2424 = vmatprep.subr.bf16.mxu0 %v4231_v33  ;;  %v4268_v33 = vld [vmem:[%s4769_s6 + $0x188] ss:$24 sps:$4 sm:$0xff]   ;;  %v4348_v36 = vld [vmem:[%s4776_s7 + $0x470] ss:$12 sps:$4 sm:$0xff]  }
  0xe7   : > { %2083 = vmatmul.mubr.bf16.gmra.mxu0 %v4960_v34  ;;  %3668 = vmatprep.subr.bf16.mxu1 %v4272_v48  ;;  %v5079_v48 = vld [vmem:[%s4769_s6 + $0x214] ss:$24 sps:$4 sm:$0xff]  }
  0xe8   : > { %2276 = vmatmul.mubr.bf16.gmra.mxu1 %v4208_v37  ;;  %2092 = vmatprep.mubr.bf16.mxu0 %v4966_v38  ;;  %v5059_v37 = vld [vmem:[%s4769_s6 + $0x1b4] ss:$24 sps:$4 sm:$0xff]  }
  0xe9   : > { %2285 = vmatprep.mubr.bf16.mxu1 %v4216_v39  ;;  %2425 = vmatpush1.bf16.msra.mxu0 %v4229_v40  ;;  %v4276_v39 = vld [vmem:[%s4769_s6 + $0x1bc] ss:$24 sps:$4 sm:$0xff]   ;;  %v5065_v40 = vld [vmem:[%s4769_s6 + $0x1b0] ss:$24 sps:$4 sm:$0xff]  }
  0xea   : > { %2426 = vmatprep.subr.bf16.mxu0 %v4242_v41  ;;  %3669 = vmatpush3.bf16.msra.mxu1 %v4273_v49  ;;  %v4279_v41 = vld [vmem:[%s4769_s6 + $0x1b8] ss:$24 sps:$4 sm:$0xff]   ;;  %v4296_v49 = vld [vmem:[%s4769_s6 + $0x21c] ss:$24 sps:$4 sm:$0xff]  }
  0xeb   : > { %3670 = vmatprep.subr.bf16.mxu1 %v4292_v61  ;;  %v5105_v61 = vld [vmem:[%s4769_s6 + $0x270] ss:$24 sps:$4 sm:$0xff]  }
  0xed   : > { %2427 = vmatpush1.bf16.msra.mxu0 %v4240_v44  ;;  %v4285_v44 = vld [vmem:[%s4769_s6 + $0x1ec] ss:$24 sps:$4 sm:$0xff]  }
  0xee   : > { %2428 = vmatprep.subr.bf16.mxu0 %v4251_v47  ;;  %3671 = vmatpush3.bf16.msra.mxu1 %v4293_v62  ;;  %v4288_v47 = vld [vmem:[%s4769_s6 + $0x1e8] ss:$24 sps:$4 sm:$0xff]   ;;  %v4319_v62 = vld [vmem:[%s4769_s6 + $0x278] ss:$24 sps:$4 sm:$0xff]  }
  0xef   : > { %2093 = vmatmul.mubr.bf16.gmra.mxu0 %v4974_v42  ;;  %3672 = vmatprep.subr.bf16.mxu1 %v4312_v7  ;;  %v5125_v7 = vld [vmem:[%s4769_s6 + $0x2d0] ss:$24 sps:$4 sm:$0xff]  }
  0xf0   : > { %2286 = vmatmul.mubr.bf16.gmra.mxu1 %v4219_v43  ;;  %2102 = vmatprep.mubr.bf16.mxu0 %v4979_v45  ;;  %v5069_v43 = vld [vmem:[%s4769_s6 + $0x1e4] ss:$24 sps:$4 sm:$0xff]  }
  0xf1   : > { %2295 = vmatprep.mubr.bf16.mxu1 %v4225_v46  ;;  %2429 = vmatpush1.bf16.msra.mxu0 %v4249_v50  ;;  %v5075_v46 = vld [vmem:[%s4769_s6 + $0x1e0] ss:$24 sps:$4 sm:$0xff]   ;;  %v5085_v50 = vld [vmem:[%s4769_s6 + $0x210] ss:$24 sps:$4 sm:$0xff]  }
  0xf2   : > { %2430 = vmatprep.subr.bf16.mxu0 %v4262_v51  ;;  %3673 = vmatpush3.bf16.msra.mxu1 %v4313_v8  ;;  %v4299_v51 = vld [vmem:[%s4769_s6 + $0x218] ss:$24 sps:$4 sm:$0xff]  }
  0xf3   : > { %3674 = vmatprep.subr.bf16.mxu1 %v4332_v22  ;;  %v4339_v8 = vld [vmem:[%s4769_s6 + $0x2d8] ss:$24 sps:$4 sm:$0xff]   ;;  %v4366_v22 = vld [vmem:[%s4776_s7 + $0x2c0] ss:$12 sps:$4 sm:$0xff]  }
  0xf5   : > { %2431 = vmatpush1.bf16.msra.mxu0 %v4260_v54  ;;  %v4305_v54 = vld [vmem:[%s4769_s6 + $0x24c] ss:$24 sps:$4 sm:$0xff]  }
  0xf6   : > { %2432 = vmatprep.subr.bf16.mxu0 %v4271_v56  ;;  %3675 = vmatpush3.bf16.msra.mxu1 %v4333_v23  ;;  %v5095_v56 = vld [vmem:[%s4769_s6 + $0x240] ss:$24 sps:$4 sm:$0xff]  }
  0xf7   : > { %2103 = vmatmul.mubr.bf16.gmra.mxu0 %v4990_v52  ;;  %3884 = vmatprep.subr.bf16.mxu1 %v4348_v36  ;;  %v4368_v23 = vld [vmem:[%s4776_s7 + $0x440] ss:$12 sps:$4 sm:$0xff]   ;;  %v4388_v36 = vld [vmem:[%s4776_s7 + $0x410] ss:$12 sps:$4 sm:$0xff]  }
  0xf8   : > { %2296 = vmatmul.mubr.bf16.gmra.mxu1 %v4228_v53  ;;  %2112 = vmatprep.mubr.bf16.mxu0 %v4995_v55  ;;  %v5089_v53 = vld [vmem:[%s4769_s6 + $0x244] ss:$24 sps:$4 sm:$0xff]  }
  0xf9   : > { %2305 = vmatprep.mubr.bf16.mxu1 %v4236_v57  ;;  %2433 = vmatpush2.bf16.msra.mxu0 %v4269_v59  ;;  %v4308_v57 = vld [vmem:[%s4769_s6 + $0x248] ss:$24 sps:$4 sm:$0xff]   ;;  %v5099_v59 = vld [vmem:[%s4769_s6 + $0x274] ss:$24 sps:$4 sm:$0xff]  }
  0xfa   : > { %2434 = vmatprep.subr.bf16.mxu0 %v4282_v60  ;;  %v4316_v60 = vld [vmem:[%s4769_s6 + $0x27c] ss:$24 sps:$4 sm:$0xff]  }
  0xfd   : > { %2435 = vmatpush2.bf16.msra.mxu0 %v4280_v63  ;;  %v5109_v63 = vld [vmem:[%s4769_s6 + $0x2a4] ss:$24 sps:$4 sm:$0xff]  }
  0xfe   : > { %2436 = vmatprep.subr.bf16.mxu0 %v4291_v1  ;;  %v4325_v1 = vld [vmem:[%s4769_s6 + $0x2ac] ss:$24 sps:$4 sm:$0xff]  }
  0xff   : > { %2113 = vmatmul.mubr.bf16.gmra.mxu0 %v5007_v0 }
 0x100   : > { %2306 = vmatmul.mubr.bf16.gmra.mxu1 %v4239_v2  ;;  %2122 = vmatprep.mubr.bf16.mxu0 %v5012_v3  ;;  %v5115_v2 = vld [vmem:[%s4769_s6 + $0x2a0] ss:$24 sps:$4 sm:$0xff]  }
 0x101   : > { %2315 = vmatprep.mubr.bf16.mxu1 %v4245_v4  ;;  %2437 = vmatpush2.bf16.msra.mxu0 %v4289_v5  ;;  %v4328_v4 = vld [vmem:[%s4769_s6 + $0x2a8] ss:$24 sps:$4 sm:$0xff]   ;;  %v5119_v5 = vld [vmem:[%s4769_s6 + $0x2d4] ss:$24 sps:$4 sm:$0xff]  }
 0x102   : > { %2438 = vmatprep.subr.bf16.mxu0 %v4302_v6  ;;  %v4336_v6 = vld [vmem:[%s4769_s6 + $0x2dc] ss:$24 sps:$4 sm:$0xff]  }
 0x105   : > { %2439 = vmatpush2.bf16.msra.mxu0 %v4300_v9  ;;  %v5129_v9 = vld [vmem:[%s4769_s6 + $0x14] ss:$24 sps:$4 sm:$0xff]  }
 0x106   : > { %2440 = vmatprep.subr.bf16.mxu0 %v4311_v11  ;;  %v5135_v11 = vld [vmem:[%s4769_s6 + $0x10] ss:$24 sps:$4 sm:$0xff]  }
 0x107   : > { %2123 = vmatmul.mubr.bf16.gmra.mxu0 %v5023_v10 }
 0x108   : > { %2316 = vmatmul.mubr.bf16.gmra.mxu1 %v4248_v12  ;;  %2132 = vmatprep.mubr.bf16.mxu0 %v5028_v14  ;;  %v4347_v12 = vld [vmem:[%s4776_s7 + $0x230] ss:$12 sps:$4 sm:$0xff]  }
 0x109   : > { %2325 = vmatprep.mubr.bf16.mxu1 %v4256_v15  ;;  %2441 = vmatpush2.bf16.msra.mxu0 %v4309_v16  ;;  %v4349_v15 = vld [vmem:[%s4776_s7 + $0x3b0] ss:$12 sps:$4 sm:$0xff]  }
 0x10a   : > { %2442 = vmatprep.subr.bf16.mxu0 %v4322_v18  ;;  %v5140_v16 = vld [vmem:[%s4769_s6 + $0x44] ss:$24 sps:$4 sm:$0xff]  }
 0x10b   : > { %v4356_v18 = vld [vmem:[%s4776_s7 + $0x2d8] ss:$12 sps:$4 sm:$0xff]  }
 0x10d   : > { %2443 = vmatpush2.bf16.msra.mxu0 %v4320_v19  ;;  %v4358_v19 = vld [vmem:[%s4776_s7 + $0x458] ss:$12 sps:$4 sm:$0xff]  }
 0x10e   : > { %2444 = vmatprep.subr.bf16.mxu0 %v4331_v20  ;;  %v4359_v20 = vld [vmem:[%s4776_s7 + $0x398] ss:$12 sps:$4 sm:$0xff]  }
 0x10f   : > { %2133 = vmatmul.mubr.bf16.gmra.mxu0 %v5038_v21 }
 0x110   : > { %2326 = vmatmul.mubr.bf16.gmra.mxu1 %v4259_v24  ;;  %2142 = vmatprep.mubr.bf16.mxu0 %v5044_v26  ;;  %v5153_v24 = vld [vmem:[%s4769_s6 + $0x40] ss:$24 sps:$4 sm:$0xff]  }
 0x111   : > { %2335 = vmatprep.mubr.bf16.mxu1 %v4265_v28  ;;  %2445 = vmatpush2.bf16.msra.mxu0 %v4329_v29  ;;  %v4367_v28 = vld [vmem:[%s4776_s7 + $0x200] ss:$12 sps:$4 sm:$0xff]  }
 0x112   : > { %2446 = vmatprep.subr.bf16.mxu0 %v4342_v30  ;;  %v4369_v29 = vld [vmem:[%s4776_s7 + $0x380] ss:$12 sps:$4 sm:$0xff]   ;;  %v4378_v30 = vld [vmem:[%s4776_s7 + $0x428] ss:$12 sps:$4 sm:$0xff]  }
 0x115   : > { %2447 = vmatpush2.bf16.msra.mxu0 %v4340_v31  ;;  %v4377_v31 = vld [vmem:[%s4776_s7 + $0x1e8] ss:$12 sps:$4 sm:$0xff]  }
 0x116   : > { %3772 = vmatprep.subr.bf16.mxu0 %v4346_v35  ;;  %v4386_v35 = vld [vmem:[%s4776_s7 + $0x290] ss:$12 sps:$4 sm:$0xff]  }
 0x117   : > { %2143 = vmatmul.mubr.bf16.gmra.mxu0 %v5053_v32 }
 0x118   : > { %2336 = vmatmul.mubr.bf16.gmra.mxu1 %v4268_v33  ;;  %2152 = vmatprep.mubr.bf16.mxu0 %v5059_v37  ;;  %v4379_v33 = vld [vmem:[%s4776_s7 + $0x368] ss:$12 sps:$4 sm:$0xff]  }
 0x119   : > { %2345 = vmatprep.mubr.bf16.mxu1 %v4276_v39  ;;  %v5171_v39 = vld [vmem:[%s4769_s6 + $0x70] ss:$24 sps:$4 sm:$0xff]  }
 0x11f   : > { %2153 = vmatmul.mubr.bf16.gmra.mxu0 %v5065_v40 }
 0x120   : > { %2346 = vmatmul.mubr.bf16.gmra.mxu1 %v4279_v41  ;;  %2162 = vmatprep.mubr.bf16.mxu0 %v5069_v43  ;;  %v5174_v41 = vld [vmem:[%s4769_s6 + $0xa4] ss:$24 sps:$4 sm:$0xff]  }
 0x121   : > { %2355 = vmatprep.mubr.bf16.mxu1 %v4285_v44  ;;  %v4396_v44 = vld [vmem:[%s4776_s7 + $0x278] ss:$12 sps:$4 sm:$0xff]  }
 0x127   : > { %2163 = vmatmul.mubr.bf16.gmra.mxu0 %v5075_v46 }
 0x128   : > { %2356 = vmatmul.mubr.bf16.gmra.mxu1 %v4288_v47  ;;  %2172 = vmatprep.mubr.bf16.mxu0 %v5079_v48  ;;  %v4398_v47 = vld [vmem:[%s4776_s7 + $0x3f8] ss:$12 sps:$4 sm:$0xff]  }
 0x129   : > { %2365 = vmatprep.mubr.bf16.mxu1 %v4296_v49  ;;  %v4397_v49 = vld [vmem:[%s4776_s7 + $0x1b8] ss:$12 sps:$4 sm:$0xff]  }
 0x12f   : > { %2173 = vmatmul.mubr.bf16.gmra.mxu0 %v5085_v50 }
 0x130   : > { %2366 = vmatmul.mubr.bf16.gmra.mxu1 %v4299_v51  ;;  %2182 = vmatprep.mubr.bf16.mxu0 %v5089_v53  ;;  %v4399_v51 = vld [vmem:[%s4776_s7 + $0x338] ss:$12 sps:$4 sm:$0xff]  }
 0x131   : > { %2375 = vmatprep.mubr.bf16.mxu1 %v4305_v54  ;;  %v4406_v54 = vld [vmem:[%s4776_s7 + $0x260] ss:$12 sps:$4 sm:$0xff]  }
 0x137   : > { %2183 = vmatmul.mubr.bf16.gmra.mxu0 %v5095_v56 }
 0x138   : > { %2376 = vmatmul.mubr.bf16.gmra.mxu1 %v4308_v57  ;;  %2192 = vmatprep.mubr.bf16.mxu0 %v5099_v59  ;;  %v4408_v57 = vld [vmem:[%s4776_s7 + $0x3e0] ss:$12 sps:$4 sm:$0xff]  }
 0x139   : > { %2385 = vmatprep.mubr.bf16.mxu1 %v4316_v60  ;;  %v5189_v60 = vld [vmem:[%s4769_s6 + $0xa0] ss:$24 sps:$4 sm:$0xff]  }
 0x13f   : > { %2193 = vmatmul.mubr.bf16.gmra.mxu0 %v5105_v61 }
 0x140   : > { %2386 = vmatmul.mubr.bf16.gmra.mxu1 %v4319_v62  ;;  %2202 = vmatprep.mubr.bf16.mxu0 %v5109_v63  ;;  %v5192_v62 = vld [vmem:[%s4769_s6 + $0xd4] ss:$24 sps:$4 sm:$0xff]  }
 0x141   : > { %2395 = vmatprep.mubr.bf16.mxu1 %v4325_v1  ;;  %v4416_v1 = vld [vmem:[%s4776_s7 + $0x248] ss:$12 sps:$4 sm:$0xff]  }
 0x147   : > { %2203 = vmatmul.mubr.bf16.gmra.mxu0 %v5115_v2 }
 0x148   : > { %2396 = vmatmul.mubr.bf16.gmra.mxu1 %v4328_v4  ;;  %2212 = vmatprep.mubr.bf16.mxu0 %v5119_v5  ;;  %v4418_v4 = vld [vmem:[%s4776_s7 + $0x3c8] ss:$12 sps:$4 sm:$0xff]  }
 0x149   : > { %2405 = vmatprep.mubr.bf16.mxu1 %v4336_v6  ;;  %v4417_v6 = vld [vmem:[%s4776_s7 + $0x188] ss:$12 sps:$4 sm:$0xff]  }
 0x14f   : > { %2213 = vmatmul.mubr.bf16.gmra.mxu0 %v5125_v7 }
 0x150   : > { %2406 = vmatmul.mubr.bf16.gmra.mxu1 %v4339_v8  ;;  %2448 = vmatprep.mubr.bf16.mxu0 %v5129_v9  ;;  %v4419_v8 = vld [vmem:[%s4776_s7 + $0x308] ss:$12 sps:$4 sm:$0xff]  }
 0x151   : > { %2641 = vmatprep.mubr.bf16.mxu1 %v4905_v58  ;;  %v4357_v58 = vld [vmem:[%s4776_s7 + $0x218] ss:$12 sps:$4 sm:$0xff]  }
 0x157   : > { %2449 = vmatmul.mubr.bf16.vlgmr.msra.gmra.mxu0 %v5135_v11 }
 0x158   : > { %2642 = vmatmul.mubr.bf16.vlgmr.msra.gmra.mxu1 %v4927_v13  ;;  %3773 = vmatpush3.bf16.msra.mxu0 %v4347_v12  ;;  %v5156_v13 = vld [vmem:[%s4769_s6 + $0x74] ss:$24 sps:$4 sm:$0xff]   ;;  %v5205_v12 = vld [vmem:[%s4769_s6 + $0xd0] ss:$24 sps:$4 sm:$0xff]  }
 0x159   : > { %3885 = vmatpush3.bf16.msra.mxu1 %v4349_v15  ;;  %2458 = vmatprep.mubr.bf16.mxu0 %v5140_v16  ;;  %v5208_v15 = vld [vmem:[%s4769_s6 + $0x104] ss:$24 sps:$4 sm:$0xff]  }
 0x15a   : > { %2649 = vmatprep.mubr.bf16.mxu1 %v4933_v17  ;;  %3774 = vmatprep.subr.bf16.mxu0 %v4356_v18  ;;  %v4376_v17 = vld [vmem:[%s4776_s7 + $0x2a8] ss:$12 sps:$4 sm:$0xff]   ;;  %v5228_v18 = vld [vmem:[%s4769_s6 + $0x164] ss:$24 sps:$4 sm:$0xff]  }
 0x15b   : > { %3886 = vmatprep.subr.bf16.mxu1 %v4358_v19 }
 0x15c   : > { %3775 = vmatpush3.bf16.msra.mxu0 %v4357_v58 }
 0x15d   : > { %3887 = vmatpush3.bf16.msra.mxu1 %v4359_v20  ;;  %3776 = vmatprep.subr.bf16.mxu0 %v4366_v22 }
 0x15e   : > { %3888 = vmatprep.subr.bf16.mxu1 %v4368_v23 }
 0x15f   : > { %2459 = vmatmul.mubr.bf16.gmra.mxu0 %v5153_v24 }
 0x160   : > { %2650 = vmatmul.mubr.bf16.gmra.mxu1 %v4945_v25  ;;  %2468 = vmatprep.mubr.bf16.mxu0 %v5156_v13  ;;  %v4387_v25 = vld [vmem:[%s4776_s7 + $0x1d0] ss:$12 sps:$4 sm:$0xff]  }
 0x161   : > { %2657 = vmatprep.mubr.bf16.mxu1 %v4949_v27  ;;  %3777 = vmatpush3.bf16.msra.mxu0 %v4367_v28  ;;  %v4389_v27 = vld [vmem:[%s4776_s7 + $0x350] ss:$12 sps:$4 sm:$0xff]   ;;  %v5259_v28 = vld [vmem:[%s4769_s6 + $0x1c0] ss:$24 sps:$4 sm:$0xff]  }
 0x162   : > { %3889 = vmatpush3.bf16.msra.mxu1 %v4369_v29  ;;  %3778 = vmatprep.subr.bf16.mxu0 %v4376_v17  ;;  %v5264_v17 = vld [vmem:[%s4769_s6 + $0x1f4] ss:$24 sps:$4 sm:$0xff]  }
 0x163   : > { %3890 = vmatprep.subr.bf16.mxu1 %v4378_v30 }
 0x165   : > { %3779 = vmatpush3.bf16.msra.mxu0 %v4377_v31 }
 0x166   : > { %3891 = vmatpush3.bf16.msra.mxu1 %v4379_v33  ;;  %3780 = vmatprep.subr.bf16.mxu0 %v4386_v35 }
 0x167   : > { %3892 = vmatprep.subr.bf16.mxu1 %v4388_v36  ;;  %2469 = vmatmul.mubr.bf16.gmra.mxu0 %v5171_v39 }
 0x168   : > { %2658 = vmatmul.mubr.bf16.gmra.mxu1 %v4960_v34  ;;  %2478 = vmatprep.mubr.bf16.mxu0 %v5174_v41  ;;  %v4407_v34 = vld [vmem:[%s4776_s7 + $0x1a0] ss:$12 sps:$4 sm:$0xff]  }
 0x169   : > { %2665 = vmatprep.mubr.bf16.mxu1 %v4966_v38  ;;  %3781 = vmatpush3.bf16.msra.mxu0 %v4387_v25  ;;  %v4409_v38 = vld [vmem:[%s4776_s7 + $0x320] ss:$12 sps:$4 sm:$0xff]  }
 0x16a   : > { %3893 = vmatpush3.bf16.msra.mxu1 %v4389_v27  ;;  %3782 = vmatprep.subr.bf16.mxu0 %v4396_v44 }
 0x16b   : > { %3894 = vmatprep.subr.bf16.mxu1 %v4398_v47 }
 0x16d   : > { %3783 = vmatpush3.bf16.msra.mxu0 %v4397_v49  ;;  %v5277_v49 = vld [vmem:[%s4769_s6 + $0x1f0] ss:$24 sps:$4 sm:$0xff]  }
 0x16e   : > { %3895 = vmatpush3.bf16.msra.mxu1 %v4399_v51  ;;  %3784 = vmatprep.subr.bf16.mxu0 %v4406_v54  ;;  %v5282_v54 = vld [vmem:[%s4769_s6 + $0x224] ss:$24 sps:$4 sm:$0xff]  }
 0x16f   : > { %3896 = vmatprep.subr.bf16.mxu1 %v4408_v57  ;;  %2479 = vmatmul.mubr.bf16.gmra.mxu0 %v5189_v60 }
 0x170   : > { %2666 = vmatmul.mubr.bf16.gmra.mxu1 %v4974_v42  ;;  %2488 = vmatprep.mubr.bf16.mxu0 %v5192_v62  ;;  %v5215_v42 = vld [vmem:[%s4769_s6 + $0x100] ss:$24 sps:$4 sm:$0xff]  }
 0x171   : > { %2673 = vmatprep.mubr.bf16.mxu1 %v4979_v45  ;;  %3785 = vmatpush3.bf16.msra.mxu0 %v4407_v34  ;;  %v5218_v45 = vld [vmem:[%s4769_s6 + $0x134] ss:$24 sps:$4 sm:$0xff]  }
 0x172   : > { %3897 = vmatpush3.bf16.msra.mxu1 %v4409_v38  ;;  %3786 = vmatprep.subr.bf16.mxu0 %v4416_v1 }
 0x173   : > { %3898 = vmatprep.subr.bf16.mxu1 %v4418_v4 }
 0x175   : > { %3787 = vmatpush3.bf16.msra.mxu0 %v4417_v6 }
 0x176   : > { %3899 = vmatpush3.bf16.msra.mxu1 %v4419_v8 }
 0x177   : > { %2489 = vmatmul.mubr.bf16.gmra.mxu0 %v5205_v12 }
 0x178   : > { %2674 = vmatmul.mubr.bf16.gmra.mxu1 %v4990_v52  ;;  %2498 = vmatprep.mubr.bf16.mxu0 %v5208_v15  ;;  %v5225_v52 = vld [vmem:[%s4769_s6 + $0x130] ss:$24 sps:$4 sm:$0xff]  }
 0x179   : > { %2681 = vmatprep.mubr.bf16.mxu1 %v4995_v55  ;;  %v5235_v55 = vld [vmem:[%s4769_s6 + $0x160] ss:$24 sps:$4 sm:$0xff]  }
 0x17f   : > { %2499 = vmatmul.mubr.bf16.gmra.mxu0 %v5215_v42 }
 0x180   : > { %2682 = vmatmul.mubr.bf16.gmra.mxu1 %v5007_v0  ;;  %2508 = vmatprep.mubr.bf16.mxu0 %v5218_v45  ;;  %v5238_v0 = vld [vmem:[%s4769_s6 + $0x194] ss:$24 sps:$4 sm:$0xff]  }
 0x181   : > { %2689 = vmatprep.mubr.bf16.mxu1 %v5012_v3  ;;  %v5245_v3 = vld [vmem:[%s4769_s6 + $0x190] ss:$24 sps:$4 sm:$0xff]  }
 0x187   : > { %2509 = vmatmul.mubr.bf16.gmra.mxu0 %v5225_v52 }
 0x188   : > { %2690 = vmatmul.mubr.bf16.gmra.mxu1 %v5023_v10  ;;  %2518 = vmatprep.mubr.bf16.mxu0 %v5228_v18  ;;  %v5248_v10 = vld [vmem:[%s4769_s6 + $0x1c4] ss:$24 sps:$4 sm:$0xff]  }
 0x189   : > { %2697 = vmatprep.mubr.bf16.mxu1 %v5028_v14 }
 0x18f   : > { %2519 = vmatmul.mubr.bf16.gmra.mxu0 %v5235_v55 }
 0x190   : > { %2698 = vmatmul.mubr.bf16.gmra.mxu1 %v5038_v21  ;;  %2528 = vmatprep.mubr.bf16.mxu0 %v5238_v0 }
 0x191   : > { %2705 = vmatprep.mubr.bf16.mxu1 %v5044_v26 }
 0x197   : > { %v2064_v19 = vpop.f32.mrf.mxu0  ;;  %2529 = vmatmul.mubr.bf16.gmra.mxu0 %v5245_v3 }
 0x198   : > { %v2257_v14 = vpop.f32.mrf.mxu1  ;;  %2706 = vmatmul.mubr.bf16.gmra.mxu1 %v5053_v32  ;;  %2538 = vmatprep.mubr.bf16.mxu0 %v5248_v10 }
 0x199   : > { %v5252_v58 = vadd.f32 %v2257_v14, %v2064_v19  ;;  %2713 = vmatprep.mubr.bf16.mxu1 %v5059_v37  ;;  %v2066_v21 = vpop.f32.mrf.mxu0 }
 0x19a   : > { %v2259_v20 = vpop.f32.mrf.mxu1 }
 0x19b   : > { %v5256_v26 = vadd.f32 %v2259_v20, %v2066_v21  ;;  %v2068_v22 = vpop.f32.mrf.mxu0  ;;  %v5295_v21 = vld [vmem:[%s4769_s6 + $0x220] ss:$24 sps:$4 sm:$0xff]  }
 0x19c   : > { %v2261_v23 = vpop.f32.mrf.mxu1 }
 0x19d   : > { %v5261_v29 = vadd.f32 %v2261_v23, %v2068_v22  ;;  %v2070_v32 = vpop.f32.mrf.mxu0  ;;  %v5300_v22 = vld [vmem:[%s4769_s6 + $0x254] ss:$24 sps:$4 sm:$0xff]  }
 0x19e   : > { %v2263_v30 = vpop.f32.mrf.mxu1 }
 0x19f   : > { %v5266_v31 = vadd.f32 %v2263_v30, %v2070_v32  ;;  %v2074_v33 = vpop.f32.mrf.mxu0  ;;  %2539 = vmatmul.mubr.bf16.gmra.mxu0 %v5259_v28 }
 0x1a0   : > { %v2267_v37 = vpop.f32.mrf.mxu1  ;;  %2714 = vmatmul.mubr.bf16.gmra.mxu1 %v5065_v40  ;;  %2548 = vmatprep.mubr.bf16.mxu0 %v5264_v17 }
 0x1a1   : > { %v5270_v35 = vadd.f32 %v2267_v37, %v2074_v33  ;;  %2721 = vmatprep.mubr.bf16.mxu1 %v5069_v43  ;;  %v2076_v36 = vpop.f32.mrf.mxu0 }
 0x1a2   : > { %v2269_v25 = vpop.f32.mrf.mxu1 }
 0x1a3   : > { %v5274_v27 = vadd.f32 %v2269_v25, %v2076_v36  ;;  %v2078_v44 = vpop.f32.mrf.mxu0 }
 0x1a4   : > { %v2271_v47 = vpop.f32.mrf.mxu1 }
 0x1a5   : > { %v5279_v51 = vadd.f32 %v2271_v47, %v2078_v44  ;;  %v2080_v40 = vpop.f32.mrf.mxu0 }
 0x1a6   : > { %v2273_v57 = vpop.f32.mrf.mxu1 }
 0x1a7   : > { %v5284_v34 = vadd.f32 %v2273_v57, %v2080_v40  ;;  %v2084_v38 = vpop.f32.mrf.mxu0  ;;  %2549 = vmatmul.mubr.bf16.gmra.mxu0 %v5277_v49  ;;  %v5313_v40 = vld [vmem:[%s4769_s6 + $0x250] ss:$24 sps:$4 sm:$0xff]  }
 0x1a8   : > { %v2277_v43 = vpop.f32.mrf.mxu1  ;;  %2722 = vmatmul.mubr.bf16.gmra.mxu1 %v5075_v46  ;;  %2558 = vmatprep.mubr.bf16.mxu0 %v5282_v54 }
 0x1a9   : > { %v5288_v1 = vadd.f32 %v2277_v43, %v2084_v38  ;;  %2729 = vmatprep.mubr.bf16.mxu1 %v5079_v48  ;;  %v2086_v4 = vpop.f32.mrf.mxu0  ;;  %v5318_v38 = vld [vmem:[%s4769_s6 + $0x284] ss:$24 sps:$4 sm:$0xff]  }
 0x1aa   : > { %v2279_v6 = vpop.f32.mrf.mxu1 }
 0x1ab   : > { %v5292_v8 = vadd.f32 %v2279_v6, %v2086_v4  ;;  %v2088_v19 = vpop.f32.mrf.mxu0 }
 0x1ac   : > { %v2281_v14 = vpop.f32.mrf.mxu1 }
 0x1ad   : > { %v5297_v20 = vadd.f32 %v2281_v14, %v2088_v19  ;;  %v2090_v46 = vpop.f32.mrf.mxu0 }
 0x1ae   : > { %v2283_v23 = vpop.f32.mrf.mxu1 }
 0x1af   : > { %v5302_v32 = vadd.f32 %v2283_v23, %v2090_v46  ;;  %v2094_v30 = vpop.f32.mrf.mxu0  ;;  %2559 = vmatmul.mubr.bf16.gmra.mxu0 %v5295_v21 }
 0x1b0   : > { %v2287_v48 = vpop.f32.mrf.mxu1  ;;  %2730 = vmatmul.mubr.bf16.gmra.mxu1 %v5085_v50  ;;  %2568 = vmatprep.mubr.bf16.mxu0 %v5300_v22 }
 0x1b1   : > { %v5306_v33 = vadd.f32 %v2287_v48, %v2094_v30  ;;  %2737 = vmatprep.mubr.bf16.mxu1 %v5089_v53  ;;  %v2096_v37 = vpop.f32.mrf.mxu0 }
 0x1b2   : > { %v2289_v36 = vpop.f32.mrf.mxu1 }
 0x1b3   : > { %v5310_v25 = vadd.f32 %v2289_v36, %v2096_v37  ;;  %v2098_v44 = vpop.f32.mrf.mxu0  ;;  %v5331_v37 = vld [vmem:[%s4769_s6 + $0x280] ss:$24 sps:$4 sm:$0xff]  }
 0x1b4   : > { %v2291_v47 = vpop.f32.mrf.mxu1 }
 0x1b5   : > { %v5315_v57 = vadd.f32 %v2291_v47, %v2098_v44  ;;  %v2100_v50 = vpop.f32.mrf.mxu0  ;;  %v5336_v44 = vld [vmem:[%s4769_s6 + $0x2b4] ss:$24 sps:$4 sm:$0xff]  }
 0x1b6   : > { %v2293_v43 = vpop.f32.mrf.mxu1  ;;  %5722 = vst [vmem:[#allocation14_spill] sm:$0xff] %v5336_v44 }
 0x1b7   : > { %v5320_v4 = vadd.f32 %v2293_v43, %v2100_v50  ;;  %v2104_v6 = vpop.f32.mrf.mxu0  ;;  %2569 = vmatmul.mubr.bf16.gmra.mxu0 %v5313_v40 }
 0x1b8   : > { %v2297_v53 = vpop.f32.mrf.mxu1  ;;  %2738 = vmatmul.mubr.bf16.gmra.mxu1 %v5095_v56  ;;  %2578 = vmatprep.mubr.bf16.mxu0 %v5318_v38 }
 0x1b9   : > { %v5324_v19 = vadd.f32 %v2297_v53, %v2104_v6  ;;  %2745 = vmatprep.mubr.bf16.mxu1 %v5099_v59  ;;  %v2106_v14 = vpop.f32.mrf.mxu0 }
 0x1ba   : > { %v2299_v46 = vpop.f32.mrf.mxu1 }
 0x1bb   : > { %v5328_v23 = vadd.f32 %v2299_v46, %v2106_v14  ;;  %v2108_v30 = vpop.f32.mrf.mxu0 }
 0x1bc   : > { %v2301_v48 = vpop.f32.mrf.mxu1 }
 0x1bd   : > { %v5333_v36 = vadd.f32 %v2301_v48, %v2108_v30  ;;  %v2110_v56 = vpop.f32.mrf.mxu0 }
 0x1be   : > { %v2303_v47 = vpop.f32.mrf.mxu1 }
 0x1bf   : > { %v5338_v50 = vadd.f32 %v2303_v47, %v2110_v56  ;;  %v2114_v43 = vpop.f32.mrf.mxu0  ;;  %2579 = vmatmul.mubr.bf16.gmra.mxu0 %v5331_v37  ;;  %v5349_v56 = vld [vmem:[%s4769_s6 + $0x2b0] ss:$24 sps:$4 sm:$0xff]  }
 0x1c0   : > { %v2307_v59 = vpop.f32.mrf.mxu1  ;;  %2746 = vmatmul.mubr.bf16.gmra.mxu1 %v5105_v61  ;;  %2588 = vmatprep.mubr.bf16.mxu0 %v5336_v44  ;;  %5725 = vst [vmem:[#allocation17_spill] sm:$0xff] %v5349_v56 }
 0x1c1   : > { %5723 = vst [vmem:[#allocation15_spill] sm:$0xff] %v5338_v50  ;;  %v5342_v6 = vadd.f32 %v2307_v59, %v2114_v43  ;;  %2753 = vmatprep.mubr.bf16.mxu1 %v5109_v63  ;;  %v2116_v53 = vpop.f32.mrf.mxu0  ;;  %v5354_v50 = vld [vmem:[%s4769_s6 + $0x2e4] ss:$24 sps:$4 sm:$0xff]  }
 0x1c2   : > { %v2309_v14 = vpop.f32.mrf.mxu1 }
 0x1c3   : > { %5724 = vst [vmem:[#allocation16_spill] sm:$0xff] %v5342_v6  ;;  %v5346_v46 = vadd.f32 %v2309_v14, %v2116_v53  ;;  %v2118_v30 = vpop.f32.mrf.mxu0 }
 0x1c4   : > { %v2311_v48 = vpop.f32.mrf.mxu1 }
 0x1c5   : > { %v5351_v47 = vadd.f32 %v2311_v48, %v2118_v30  ;;  %v2120_v61 = vpop.f32.mrf.mxu0 }
 0x1c6   : > { %v2313_v43 = vpop.f32.mrf.mxu1 }
 0x1c7   : > { %5726 = vst [vmem:[#allocation18_spill] sm:$0xff] %v5351_v47  ;;  %v5356_v59 = vadd.f32 %v2313_v43, %v2120_v61  ;;  %v2124_v44 = vpop.f32.mrf.mxu0  ;;  %2589 = vmatmul.mubr.bf16.gmra.mxu0 %v5349_v56  ;;  %v5367_v43 = vld [vmem:[%s4769_s6 + $0x2e0] ss:$24 sps:$4 sm:$0xff]  }
 0x1c8   : > { %v2317_v6 = vpop.f32.mrf.mxu1  ;;  %2754 = vmatmul.mubr.bf16.gmra.mxu1 %v5115_v2  ;;  %2598 = vmatprep.mubr.bf16.mxu0 %v5354_v50  ;;  %5729 = vst [vmem:[#allocation21_spill] sm:$0xff] %v5367_v43 }
 0x1c9   : > { %5727 = vst [vmem:[#allocation19_spill] sm:$0xff] %v5356_v59  ;;  %v5360_v63 = vadd.f32 %v2317_v6, %v2124_v44  ;;  %2761 = vmatprep.mubr.bf16.mxu1 %v5119_v5  ;;  %v2126_v53 = vpop.f32.mrf.mxu0 }
 0x1ca   : > { %v2319_v14 = vpop.f32.mrf.mxu1 }
 0x1cb   : > { %v5364_v30 = vadd.f32 %v2319_v14, %v2126_v53  ;;  %v2128_v48 = vpop.f32.mrf.mxu0  ;;  %v4423_v53 = vld [vmem:[%s4769_s6 + $0xc] ss:$24 sps:$4 sm:$0xff]  }
 0x1cc   : > { %v2321_v61 = vpop.f32.mrf.mxu1 }
 0x1cd   : > { %5728 = vst [vmem:[#allocation20_spill] sm:$0xff] %v5364_v30  ;;  %v5369_v59 = vadd.f32 %v2321_v61, %v2128_v48  ;;  %v2130_v56 = vpop.f32.mrf.mxu0 }
 0x1ce   : > { %v2323_v47 = vpop.f32.mrf.mxu1 }
 0x1cf   : > { %5730 = vst [vmem:[#allocation22_spill] sm:$0xff] %v5369_v59  ;;  %v5371_v2 = vadd.f32 %v2323_v47, %v2130_v56  ;;  %v2134_v44 = vpop.f32.mrf.mxu0  ;;  %2599 = vmatmul.mubr.bf16.gmra.mxu0 %v5367_v43 }
 0x1d0   : > { %v2327_v6 = vpop.f32.mrf.mxu1  ;;  %2762 = vmatmul.mubr.bf16.gmra.mxu1 %v5125_v7  ;;  %2802 = vmatprep.mubr.bf16.mxu0 %v4423_v53  ;;  %v4425_v53 = vld [vmem:[%s4769_s6 + $0x3c] ss:$24 sps:$4 sm:$0xff]  }
 0x1d1   : > { %5731 = vst [vmem:[#allocation23_spill] sm:$0xff] %v5371_v2  ;;  %v5375_v5 = vadd.f32 %v2327_v6, %v2134_v44  ;;  %2963 = vmatprep.mubr.bf16.mxu1 %v5129_v9  ;;  %v2136_v14 = vpop.f32.mrf.mxu0  ;;  %v4424_v6 = vld [vmem:[%s4769_s6 + $0x8] ss:$24 sps:$4 sm:$0xff]  }
 0x1d2   : > { %v2329_v48 = vpop.f32.mrf.mxu1 }
 0x1d3   : > { %v5379_v61 = vadd.f32 %v2329_v48, %v2136_v14  ;;  %v2138_v56 = vpop.f32.mrf.mxu0 }
 0x1d4   : > { %v2331_v47 = vpop.f32.mrf.mxu1 }
 0x1d5   : > { %v5381_v2 = vadd.f32 %v2331_v47, %v2138_v56  ;;  %v2140_v59 = vpop.f32.mrf.mxu0 }
 0x1d6   : > { %v2333_v43 = vpop.f32.mrf.mxu1 }
 0x1d7   : > { %5732 = vst [vmem:[#allocation24_spill] sm:$0xff] %v5381_v2  ;;  %v5383_v30 = vadd.f32 %v2333_v43, %v2140_v59  ;;  %v2144_v7 = vpop.f32.mrf.mxu0  ;;  %2803 = vmatmul.mubr.bf16.vlgmr.msra.gmra.mxu0 %v4424_v6 }
 0x1d8   : > { %v2337_v44 = vpop.f32.mrf.mxu1  ;;  %2964 = vmatmul.mubr.bf16.vlgmr.msra.gmra.mxu1 %v5135_v11  ;;  %2810 = vmatprep.mubr.bf16.mxu0 %v4425_v53  ;;  %v4427_v53 = vld [vmem:[%s4769_s6 + $0x6c] ss:$24 sps:$4 sm:$0xff]  }
 0x1d9   : > { %5733 = vst [vmem:[#allocation25_spill] sm:$0xff] %v5383_v30  ;;  %v5387_v9 = vadd.f32 %v2337_v44, %v2144_v7  ;;  %2971 = vmatprep.mubr.bf16.mxu1 %v5140_v16  ;;  %v2146_v14 = vpop.f32.mrf.mxu0  ;;  %v4426_v44 = vld [vmem:[%s4769_s6 + $0x38] ss:$24 sps:$4 sm:$0xff]  }
 0x1da   : > { %v2339_v48 = vpop.f32.mrf.mxu1 }
 0x1db   : > { %v5391_v56 = vadd.f32 %v2339_v48, %v2146_v14  ;;  %v2148_v59 = vpop.f32.mrf.mxu0 }
 0x1dc   : > { %v2341_v43 = vpop.f32.mrf.mxu1 }
 0x1dd   : > { %v5393_v47 = vadd.f32 %v2341_v43, %v2148_v59  ;;  %v2150_v30 = vpop.f32.mrf.mxu0 }
 0x1de   : > { %v2343_v6 = vpop.f32.mrf.mxu1 }
 0x1df   : > { %5734 = vst [vmem:[#allocation26_spill] sm:$0xff] %v5393_v47  ;;  %v5395_v2 = vadd.f32 %v2343_v6, %v2150_v30  ;;  %v2154_v11 = vpop.f32.mrf.mxu0  ;;  %2811 = vmatmul.mubr.bf16.gmra.mxu0 %v4426_v44 }
 0x1e0   : > { %v2347_v7 = vpop.f32.mrf.mxu1  ;;  %2972 = vmatmul.mubr.bf16.gmra.mxu1 %v5153_v24  ;;  %2818 = vmatprep.mubr.bf16.mxu0 %v4427_v53  ;;  %v4429_v53 = vld [vmem:[%s4769_s6 + $0x9c] ss:$24 sps:$4 sm:$0xff]  }
 0x1e1   : > { %5735 = vst [vmem:[#allocation27_spill] sm:$0xff] %v5395_v2  ;;  %v5399_v16 = vadd.f32 %v2347_v7, %v2154_v11  ;;  %2979 = vmatprep.mubr.bf16.mxu1 %v5156_v13  ;;  %v2156_v14 = vpop.f32.mrf.mxu0  ;;  %v4428_v7 = vld [vmem:[%s4769_s6 + $0x68] ss:$24 sps:$4 sm:$0xff]  }
 0x1e2   : > { %v2349_v48 = vpop.f32.mrf.mxu1 }
 0x1e3   : > { %v5403_v59 = vadd.f32 %v2349_v48, %v2156_v14  ;;  %v2158_v30 = vpop.f32.mrf.mxu0 }
 0x1e4   : > { %v2351_v43 = vpop.f32.mrf.mxu1 }
 0x1e5   : > { %v5405_v6 = vadd.f32 %v2351_v43, %v2158_v30  ;;  %v2160_v2 = vpop.f32.mrf.mxu0 }
 0x1e6   : > { %v2353_v44 = vpop.f32.mrf.mxu1 }
 0x1e7   : > { %5736 = vst [vmem:[#allocation28_spill] sm:$0xff] %v5405_v6  ;;  %v5407_v47 = vadd.f32 %v2353_v44, %v2160_v2  ;;  %v2164_v24 = vpop.f32.mrf.mxu0  ;;  %2819 = vmatmul.mubr.bf16.gmra.mxu0 %v4428_v7 }
 0x1e8   : > { %v2357_v11 = vpop.f32.mrf.mxu1  ;;  %2980 = vmatmul.mubr.bf16.gmra.mxu1 %v5171_v39  ;;  %2826 = vmatprep.mubr.bf16.mxu0 %v4429_v53  ;;  %v4431_v53 = vld [vmem:[%s4769_s6 + $0xcc] ss:$24 sps:$4 sm:$0xff]  }
 0x1e9   : > { %5737 = vst [vmem:[#allocation29_spill] sm:$0xff] %v5407_v47  ;;  %v5411_v13 = vadd.f32 %v2357_v11, %v2164_v24  ;;  %2987 = vmatprep.mubr.bf16.mxu1 %v5174_v41  ;;  %v2166_v14 = vpop.f32.mrf.mxu0  ;;  %v4430_v11 = vld [vmem:[%s4769_s6 + $0x98] ss:$24 sps:$4 sm:$0xff]  }
 0x1ea   : > { %v2359_v48 = vpop.f32.mrf.mxu1 }
 0x1eb   : > { %v5415_v30 = vadd.f32 %v2359_v48, %v2166_v14  ;;  %v2168_v2 = vpop.f32.mrf.mxu0 }
 0x1ec   : > { %v2361_v43 = vpop.f32.mrf.mxu1 }
 0x1ed   : > { %v5417_v44 = vadd.f32 %v2361_v43, %v2168_v2  ;;  %v2170_v47 = vpop.f32.mrf.mxu0 }
 0x1ee   : > { %v2363_v7 = vpop.f32.mrf.mxu1 }
 0x1ef   : > { %5738 = vst [vmem:[#allocation30_spill] sm:$0xff] %v5417_v44  ;;  %v5419_v6 = vadd.f32 %v2363_v7, %v2170_v47  ;;  %v2174_v39 = vpop.f32.mrf.mxu0  ;;  %2827 = vmatmul.mubr.bf16.gmra.mxu0 %v4430_v11 }
 0x1f0   : > { %v2367_v24 = vpop.f32.mrf.mxu1  ;;  %2988 = vmatmul.mubr.bf16.gmra.mxu1 %v5189_v60  ;;  %2834 = vmatprep.mubr.bf16.mxu0 %v4431_v53  ;;  %v4433_v53 = vld [vmem:[%s4769_s6 + $0xfc] ss:$24 sps:$4 sm:$0xff]  }
 0x1f1   : > { %5739 = vst [vmem:[#allocation31_spill] sm:$0xff] %v5419_v6  ;;  %v5423_v41 = vadd.f32 %v2367_v24, %v2174_v39  ;;  %2995 = vmatprep.mubr.bf16.mxu1 %v5192_v62  ;;  %v2176_v14 = vpop.f32.mrf.mxu0  ;;  %v4432_v24 = vld [vmem:[%s4769_s6 + $0xc8] ss:$24 sps:$4 sm:$0xff]  }
 0x1f2   : > { %v2369_v48 = vpop.f32.mrf.mxu1 }
 0x1f3   : > { %v5427_v2 = vadd.f32 %v2369_v48, %v2176_v14  ;;  %v2178_v47 = vpop.f32.mrf.mxu0 }
 0x1f4   : > { %v2371_v43 = vpop.f32.mrf.mxu1 }
 0x1f5   : > { %v5429_v7 = vadd.f32 %v2371_v43, %v2178_v47  ;;  %v2180_v6 = vpop.f32.mrf.mxu0 }
 0x1f6   : > { %v2373_v11 = vpop.f32.mrf.mxu1 }
 0x1f7   : > { %5740 = vst [vmem:[#allocation32_spill] sm:$0xff] %v5429_v7  ;;  %v5431_v44 = vadd.f32 %v2373_v11, %v2180_v6  ;;  %v2184_v60 = vpop.f32.mrf.mxu0  ;;  %2835 = vmatmul.mubr.bf16.gmra.mxu0 %v4432_v24 }
 0x1f8   : > { %v2377_v39 = vpop.f32.mrf.mxu1  ;;  %2996 = vmatmul.mubr.bf16.gmra.mxu1 %v5205_v12  ;;  %2842 = vmatprep.mubr.bf16.mxu0 %v4433_v53  ;;  %v4435_v53 = vld [vmem:[%s4769_s6 + $0x12c] ss:$24 sps:$4 sm:$0xff]  }
 0x1f9   : > { %5741 = vst [vmem:[#allocation33_spill] sm:$0xff] %v5431_v44  ;;  %v5435_v62 = vadd.f32 %v2377_v39, %v2184_v60  ;;  %3003 = vmatprep.mubr.bf16.mxu1 %v5208_v15  ;;  %v2186_v14 = vpop.f32.mrf.mxu0  ;;  %v4434_v39 = vld [vmem:[%s4769_s6 + $0xf8] ss:$24 sps:$4 sm:$0xff]  }
 0x1fa   : > { %v2379_v48 = vpop.f32.mrf.mxu1 }
 0x1fb   : > { %v5439_v47 = vadd.f32 %v2379_v48, %v2186_v14  ;;  %v2188_v6 = vpop.f32.mrf.mxu0 }
 0x1fc   : > { %v2381_v43 = vpop.f32.mrf.mxu1 }
 0x1fd   : > { %v5441_v11 = vadd.f32 %v2381_v43, %v2188_v6  ;;  %v2190_v44 = vpop.f32.mrf.mxu0 }
 0x1fe   : > { %v2383_v24 = vpop.f32.mrf.mxu1 }
 0x1ff   : > { %5742 = vst [vmem:[#allocation34_spill] sm:$0xff] %v5441_v11  ;;  %v5443_v7 = vadd.f32 %v2383_v24, %v2190_v44  ;;  %v2194_v12 = vpop.f32.mrf.mxu0  ;;  %2843 = vmatmul.mubr.bf16.gmra.mxu0 %v4434_v39 }
 0x200   : > { %v2387_v60 = vpop.f32.mrf.mxu1  ;;  %3004 = vmatmul.mubr.bf16.gmra.mxu1 %v5215_v42  ;;  %2850 = vmatprep.mubr.bf16.mxu0 %v4435_v53  ;;  %v4437_v53 = vld [vmem:[%s4769_s6 + $0x15c] ss:$24 sps:$4 sm:$0xff]  }
 0x201   : > { %5743 = vst [vmem:[#allocation35_spill] sm:$0xff] %v5443_v7  ;;  %v5447_v15 = vadd.f32 %v2387_v60, %v2194_v12  ;;  %3011 = vmatprep.mubr.bf16.mxu1 %v5218_v45  ;;  %v2196_v14 = vpop.f32.mrf.mxu0  ;;  %v4436_v60 = vld [vmem:[%s4769_s6 + $0x128] ss:$24 sps:$4 sm:$0xff]  }
 0x202   : > { %v2389_v48 = vpop.f32.mrf.mxu1 }
 0x203   : > { %v5451_v6 = vadd.f32 %v2389_v48, %v2196_v14  ;;  %v2198_v44 = vpop.f32.mrf.mxu0 }
 0x204   : > { %v2391_v43 = vpop.f32.mrf.mxu1 }
 0x205   : > { %v5453_v24 = vadd.f32 %v2391_v43, %v2198_v44  ;;  %v2200_v7 = vpop.f32.mrf.mxu0 }
 0x206   : > { %v2393_v39 = vpop.f32.mrf.mxu1 }
 0x207   : > { %5744 = vst [vmem:[#allocation36_spill] sm:$0xff] %v5453_v24  ;;  %v5455_v11 = vadd.f32 %v2393_v39, %v2200_v7  ;;  %v2204_v42 = vpop.f32.mrf.mxu0  ;;  %2851 = vmatmul.mubr.bf16.gmra.mxu0 %v4436_v60 }
 0x208   : > { %v2397_v12 = vpop.f32.mrf.mxu1  ;;  %3012 = vmatmul.mubr.bf16.gmra.mxu1 %v5225_v52  ;;  %2858 = vmatprep.mubr.bf16.mxu0 %v4437_v53  ;;  %v4439_v53 = vld [vmem:[%s4769_s6 + $0x18c] ss:$24 sps:$4 sm:$0xff]  }
 0x209   : > { %5745 = vst [vmem:[#allocation37_spill] sm:$0xff] %v5455_v11  ;;  %v5459_v45 = vadd.f32 %v2397_v12, %v2204_v42  ;;  %3019 = vmatprep.mubr.bf16.mxu1 %v5228_v18  ;;  %v2206_v14 = vpop.f32.mrf.mxu0  ;;  %v4438_v12 = vld [vmem:[%s4769_s6 + $0x158] ss:$24 sps:$4 sm:$0xff]  }
 0x20a   : > { %v2399_v48 = vpop.f32.mrf.mxu1 }
 0x20b   : > { %v5463_v44 = vadd.f32 %v2399_v48, %v2206_v14  ;;  %v2208_v7 = vpop.f32.mrf.mxu0 }
 0x20c   : > { %v2401_v43 = vpop.f32.mrf.mxu1 }
 0x20d   : > { %v5465_v39 = vadd.f32 %v2401_v43, %v2208_v7  ;;  %v2210_v11 = vpop.f32.mrf.mxu0 }
 0x20e   : > { %v2403_v60 = vpop.f32.mrf.mxu1 }
 0x20f   : > { %5746 = vst [vmem:[#allocation38_spill] sm:$0xff] %v5465_v39  ;;  %v5467_v24 = vadd.f32 %v2403_v60, %v2210_v11  ;;  %v2214_v52 = vpop.f32.mrf.mxu0  ;;  %2859 = vmatmul.mubr.bf16.gmra.mxu0 %v4438_v12 }
 0x210   : > { %v2407_v42 = vpop.f32.mrf.mxu1  ;;  %3020 = vmatmul.mubr.bf16.gmra.mxu1 %v5235_v55  ;;  %2866 = vmatprep.mubr.bf16.mxu0 %v4439_v53  ;;  %v398_v55 = vld [vmem:[#allocation8] sm:$0xff]  ;;  %v4441_v53 = vld [vmem:[%s4769_s6 + $0x1bc] ss:$24 sps:$4 sm:$0xff]  }
 0x211   : > { %5747 = vst [vmem:[#allocation39_spill] sm:$0xff] %v5467_v24  ;;  %v5471_v18 = vadd.f32 %v2407_v42, %v2214_v52  ;;  %3027 = vmatprep.mubr.bf16.mxu1 %v5238_v0  ;;  %v2216_v14 = vpop.f32.mrf.mxu0 }
 0x212   : > { %v2409_v48 = vpop.f32.mrf.mxu1 }
 0x213   : > { %5748 = vst [vmem:[#allocation40_spill] sm:$0xff] %v5471_v18  ;;  %v5475_v7 = vadd.f32 %v2409_v48, %v2216_v14  ;;  %v2218_v11 = vpop.f32.mrf.mxu0  ;;  %v4440_v18 = vld [vmem:[%s4769_s6 + $0x188] ss:$24 sps:$4 sm:$0xff]   ;;  %v399_v14 = vld [vmem:[#allocation8 + $0x8] sm:$0xff] }
 0x214   : > { %v2411_v43 = vpop.f32.mrf.mxu1 }
 0x215   : > { %5749 = vst [vmem:[#allocation41_spill] sm:$0xff] %v5475_v7  ;;  %v5477_v60 = vadd.f32 %v2411_v43, %v2218_v11  ;;  %v2220_v24 = vpop.f32.mrf.mxu0 }
 0x216   : > { %v2413_v12 = vpop.f32.mrf.mxu1 }
 0x217   : > { %5750 = vst [vmem:[#allocation42_spill] sm:$0xff] %v5477_v60  ;;  %v5479_v39 = vadd.f32 %v2413_v12, %v2220_v24  ;;  %v2450_v52 = vpop.f32.mrf.mxu0  ;;  %2867 = vmatmul.mubr.bf16.gmra.mxu0 %v4440_v18 }
 0x218   : > { %v3676_v42 = vpop.f32.mrf.mxu1  ;;  %3028 = vmatmul.mubr.bf16.gmra.mxu1 %v5245_v3  ;;  %v2451_v0 = vadd.f32 %v2450_v52, %v5252_v58  ;;  %2874 = vmatprep.mubr.bf16.mxu0 %v4441_v53  ;;  %v402_v52 = vld [vmem:[#allocation8 + $0x20] sm:$0xff] }
 0x219   : > { %5751 = vst [vmem:[#allocation43_spill] sm:$0xff] %v5479_v39  ;;  %3035 = vmatprep.mubr.bf16.mxu1 %v5248_v10  ;;  %v2452_v48 = vpop.f32.mrf.mxu0  ;;  %v401_v39 = vld [vmem:[#allocation8 + $0x18] sm:$0xff] }
 0x21a   : > { %v3677_v11 = vpop.f32.mrf.mxu1  ;;  %v3092_v43 = vadd.f32 %v2451_v0, %v398_v55  ;;  %v2453_v24 = vadd.f32 %v2452_v48, %v5256_v26  ;;  %v404_v26 = vld [vmem:[#allocation8 + $0x30] sm:$0xff] }
 0x21b   : > { %v5487_v12 = vadd.f32 %v3677_v11, %v3676_v42  ;;  %v2454_v60 = vpop.f32.mrf.mxu0  ;;  %v4442_v11 = vld [vmem:[%s4769_s6 + $0x1b8] ss:$24 sps:$4 sm:$0xff]  }
 0x21c   : > { %v3679_v18 = vpop.f32.mrf.mxu1  ;;  %3188 = vst [vmem:[#allocation8] sm:$0xff] %v3092_v43  ;;  %v3093_v3 = vadd.f32 %v2453_v24, %v399_v14  ;;  %v2455_v58 = vadd.f32 %v2454_v60, %v5261_v29  ;;  %v4443_v60 = vld [vmem:[%s4769_s6 + $0x1ec] ss:$24 sps:$4 sm:$0xff]  }
 0x21d   : > { %v2456_v53 = vpop.f32.mrf.mxu0 }
 0x21e   : > { %v3680_v10 = vpop.f32.mrf.mxu1  ;;  %3189 = vst [vmem:[#allocation8 + $0x8] sm:$0xff] %v3093_v3  ;;  %v3095_v7 = vadd.f32 %v2455_v58, %v401_v39  ;;  %v2457_v55 = vadd.f32 %v2456_v53, %v5266_v31  ;;  %v405_v39 = vld [vmem:[#allocation8 + $0x38] sm:$0xff]  ;;  %v407_v58 = vld [vmem:[#allocation8 + $0x48] sm:$0xff]  ;;  %v408_v53 = vld [vmem:[#allocation8 + $0x50] sm:$0xff] }
 0x21f   : > { %v5491_v0 = vadd.f32 %v3680_v10, %v3679_v18  ;;  %v2460_v42 = vpop.f32.mrf.mxu0  ;;  %2875 = vmatmul.mubr.bf16.gmra.mxu0 %v4442_v11 }
 0x220   : > { %v3682_v48 = vpop.f32.mrf.mxu1  ;;  %3036 = vmatmul.mubr.bf16.gmra.mxu1 %v5259_v28  ;;  %3191 = vst [vmem:[#allocation8 + $0x18] sm:$0xff] %v3095_v7  ;;  %v3096_v14 = vadd.f32 %v2457_v55, %v402_v52  ;;  %v2461_v29 = vadd.f32 %v2460_v42, %v5270_v35  ;;  %2882 = vmatprep.mubr.bf16.mxu0 %v4443_v60  ;;  %v4445_v60 = vld [vmem:[%s4769_s6 + $0x21c] ss:$24 sps:$4 sm:$0xff]  }
 0x221   : > { %3043 = vmatprep.mubr.bf16.mxu1 %v5264_v17  ;;  %v2462_v43 = vpop.f32.mrf.mxu0 }
 0x222   : > { %v3683_v31 = vpop.f32.mrf.mxu1  ;;  %3192 = vst [vmem:[#allocation8 + $0x20] sm:$0xff] %v3096_v14  ;;  %v3098_v24 = vadd.f32 %v2461_v29, %v404_v26  ;;  %v2463_v18 = vadd.f32 %v2462_v43, %v5274_v27  ;;  %v410_v27 = vld [vmem:[#allocation8 + $0x60] sm:$0xff] }
 0x223   : > { %v5499_v3 = vadd.f32 %v3683_v31, %v3682_v48  ;;  %v2464_v28 = vpop.f32.mrf.mxu0  ;;  %v4444_v14 = vld [vmem:[%s4769_s6 + $0x1e8] ss:$24 sps:$4 sm:$0xff]  }
 0x224   : > { %v3685_v7 = vpop.f32.mrf.mxu1  ;;  %3194 = vst [vmem:[#allocation8 + $0x30] sm:$0xff] %v3098_v24  ;;  %v3099_v52 = vadd.f32 %v2463_v18, %v405_v39  ;;  %v2465_v35 = vadd.f32 %v2464_v28, %v5279_v51  ;;  %v411_v39 = vld [vmem:[#allocation8 + $0x68] sm:$0xff] }
 0x225   : > { %v2466_v17 = vpop.f32.mrf.mxu0 }
 0x226   : > { %v3686_v10 = vpop.f32.mrf.mxu1  ;;  %3195 = vst [vmem:[#allocation8 + $0x38] sm:$0xff] %v3099_v52  ;;  %v3101_v55 = vadd.f32 %v2465_v35, %v407_v58  ;;  %v2467_v26 = vadd.f32 %v2466_v17, %v5284_v34  ;;  %v413_v58 = vld [vmem:[#allocation8 + $0x78] sm:$0xff]  ;;  %v414_v52 = vld [vmem:[#allocation8 + $0x80] sm:$0xff] }
 0x227   : > { %v5503_v42 = vadd.f32 %v3686_v10, %v3685_v7  ;;  %v2470_v48 = vpop.f32.mrf.mxu0  ;;  %2883 = vmatmul.mubr.bf16.gmra.mxu0 %v4444_v14  ;;  %v417_v14 = vld [vmem:[#allocation8 + $0x98] sm:$0xff] }
 0x228   : > { %v3688_v11 = vpop.f32.mrf.mxu1  ;;  %3044 = vmatmul.mubr.bf16.gmra.mxu1 %v5277_v49  ;;  %3197 = vst [vmem:[#allocation8 + $0x48] sm:$0xff] %v3101_v55  ;;  %v3102_v29 = vadd.f32 %v2467_v26, %v408_v53  ;;  %v2471_v51 = vadd.f32 %v2470_v48, %v5288_v1  ;;  %2890 = vmatprep.mubr.bf16.mxu0 %v4445_v60 }
 0x229   : > { %3051 = vmatprep.mubr.bf16.mxu1 %v5282_v54  ;;  %v2472_v43 = vpop.f32.mrf.mxu0 }
 0x22a   : > { %v3689_v34 = vpop.f32.mrf.mxu1  ;;  %3198 = vst [vmem:[#allocation8 + $0x50] sm:$0xff] %v3102_v29  ;;  %v3104_v31 = vadd.f32 %v2471_v51, %v410_v27  ;;  %v2473_v24 = vadd.f32 %v2472_v43, %v5292_v8  ;;  %v416_v8 = vld [vmem:[#allocation8 + $0x90] sm:$0xff]  ;;  %v419_v43 = vld [vmem:[#allocation8 + $0xa8] sm:$0xff] }
 0x22b   : > { %v5511_v18 = vadd.f32 %v3689_v34, %v3688_v11  ;;  %v2474_v49 = vpop.f32.mrf.mxu0  ;;  %v4446_v27 = vld [vmem:[%s4769_s6 + $0x218] ss:$24 sps:$4 sm:$0xff]   ;;  %v4447_v11 = vld [vmem:[%s4769_s6 + $0x24c] ss:$24 sps:$4 sm:$0xff]  }
 0x22c   : > { %v3691_v28 = vpop.f32.mrf.mxu1  ;;  %3200 = vst [vmem:[#allocation8 + $0x60] sm:$0xff] %v3104_v31  ;;  %v3105_v7 = vadd.f32 %v2473_v24, %v411_v39  ;;  %v2475_v1 = vadd.f32 %v2474_v49, %v5297_v20  ;;  %v420_v24 = vld [vmem:[#allocation8 + $0xb0] sm:$0xff] }
 0x22d   : > { %v2476_v54 = vpop.f32.mrf.mxu0 }
 0x22e   : > { %v3692_v35 = vpop.f32.mrf.mxu1  ;;  %3201 = vst [vmem:[#allocation8 + $0x68] sm:$0xff] %v3105_v7  ;;  %v3107_v53 = vadd.f32 %v2475_v1, %v413_v58  ;;  %v2477_v17 = vadd.f32 %v2476_v54, %v5302_v32  ;;  %v4448_v54 = vld [vmem:[%s4769_s6 + $0x248] ss:$24 sps:$4 sm:$0xff]  }
 0x22f   : > { %v5515_v10 = vadd.f32 %v3692_v35, %v3691_v28  ;;  %v2480_v55 = vpop.f32.mrf.mxu0  ;;  %2891 = vmatmul.mubr.bf16.gmra.mxu0 %v4446_v27 }
 0x230   : > { %v3694_v26 = vpop.f32.mrf.mxu1  ;;  %3052 = vmatmul.mubr.bf16.gmra.mxu1 %v5295_v21  ;;  %3203 = vst [vmem:[#allocation8 + $0x78] sm:$0xff] %v3107_v53  ;;  %v3108_v48 = vadd.f32 %v2477_v17, %v414_v52  ;;  %v2481_v20 = vadd.f32 %v2480_v55, %v5306_v33  ;;  %2898 = vmatprep.mubr.bf16.mxu0 %v4447_v11  ;;  %v4449_v53 = vld [vmem:[%s4769_s6 + $0x27c] ss:$24 sps:$4 sm:$0xff]   ;;  %v423_v17 = vld [vmem:[#allocation8 + $0xc8] sm:$0xff] }
 0x231   : > { %3059 = vmatprep.mubr.bf16.mxu1 %v5300_v22  ;;  %v2482_v29 = vpop.f32.mrf.mxu0 }
 0x232   : > { %v3695_v32 = vpop.f32.mrf.mxu1  ;;  %3204 = vst [vmem:[#allocation8 + $0x80] sm:$0xff] %v3108_v48  ;;  %v3110_v51 = vadd.f32 %v2481_v20, %v416_v8  ;;  %v2483_v60 = vadd.f32 %v2482_v29, %v5310_v25  ;;  %v422_v25 = vld [vmem:[#allocation8 + $0xc0] sm:$0xff]  ;;  %v425_v48 = vld [vmem:[#allocation8 + $0xd8] sm:$0xff] }
 0x233   : > { %v5523_v39 = vadd.f32 %v3695_v32, %v3694_v26  ;;  %v2484_v21 = vpop.f32.mrf.mxu0 }
 0x234   : > { %v3697_v34 = vpop.f32.mrf.mxu1  ;;  %3206 = vst [vmem:[#allocation8 + $0x90] sm:$0xff] %v3110_v51  ;;  %v3111_v31 = vadd.f32 %v2483_v60, %v417_v14  ;;  %v2485_v33 = vadd.f32 %v2484_v21, %v5315_v57  ;;  %v426_v14 = vld [vmem:[#allocation8 + $0xe0] sm:$0xff]  ;;  %v5752_v51 = vld [vmem:[#allocation15_spill] sm:$0xff] }
 0x235   : > { %v2486_v22 = vpop.f32.mrf.mxu0 }
 0x236   : > { %v3698_v58 = vpop.f32.mrf.mxu1  ;;  %3207 = vst [vmem:[#allocation8 + $0x98] sm:$0xff] %v3111_v31  ;;  %v3113_v49 = vadd.f32 %v2485_v33, %v419_v43  ;;  %v2487_v28 = vadd.f32 %v2486_v22, %v5320_v4  ;;  %v4450_v31 = vld [vmem:[%s4769_s6 + $0x278] ss:$24 sps:$4 sm:$0xff]   ;;  %v4451_v22 = vld [vmem:[%s4769_s6 + $0x2ac] ss:$24 sps:$4 sm:$0xff]  }
 0x237   : > { %v5527_v7 = vadd.f32 %v3698_v58, %v3697_v34  ;;  %v2490_v1 = vpop.f32.mrf.mxu0  ;;  %2899 = vmatmul.mubr.bf16.gmra.mxu0 %v4448_v54  ;;  %v5754_v58 = vld [vmem:[#allocation14_spill] sm:$0xff] }
 0x238   : > { %v3700_v52 = vpop.f32.mrf.mxu1  ;;  %3060 = vmatmul.mubr.bf16.gmra.mxu1 %v5313_v40  ;;  %3209 = vst [vmem:[#allocation8 + $0xa8] sm:$0xff] %v3113_v49  ;;  %v3114_v35 = vadd.f32 %v2487_v28, %v420_v24  ;;  %v2491_v57 = vadd.f32 %v2490_v1, %v5324_v19  ;;  %2906 = vmatprep.mubr.bf16.mxu0 %v4449_v53  ;;  %v429_v49 = vld [vmem:[#allocation8 + $0xf8] sm:$0xff] }
 0x239   : > { %3067 = vmatprep.mubr.bf16.mxu1 %v5318_v38  ;;  %v2492_v8 = vpop.f32.mrf.mxu0 }
 0x23a   : > { %v3701_v4 = vpop.f32.mrf.mxu1  ;;  %3210 = vst [vmem:[#allocation8 + $0xb0] sm:$0xff] %v3114_v35  ;;  %v3116_v55 = vadd.f32 %v2491_v57, %v422_v25  ;;  %v2493_v26 = vadd.f32 %v2492_v8, %v5328_v23  ;;  %v428_v23 = vld [vmem:[#allocation8 + $0xf0] sm:$0xff]  ;;  %v431_v35 = vld [vmem:[#allocation8 + $0x108] sm:$0xff] }
 0x23b   : > { %v5535_v27 = vadd.f32 %v3701_v4, %v3700_v52  ;;  %v2494_v40 = vpop.f32.mrf.mxu0  ;;  %v432_v4 = vld [vmem:[#allocation8 + $0x110] sm:$0xff] }
 0x23c   : > { %v3703_v20 = vpop.f32.mrf.mxu1  ;;  %3212 = vst [vmem:[#allocation8 + $0xc0] sm:$0xff] %v3116_v55  ;;  %v3117_v11 = vadd.f32 %v2493_v26, %v423_v17  ;;  %v2495_v19 = vadd.f32 %v2494_v40, %v5333_v36  ;;  %v5753_v36 = vld [vmem:[#allocation16_spill] sm:$0xff]  ;;  %v5755_v17 = vld [vmem:[#allocation18_spill] sm:$0xff]  ;;  %v5756_v40 = vld [vmem:[#allocation19_spill] sm:$0xff] }
 0x23d   : > { %v2496_v38 = vpop.f32.mrf.mxu0 }
 0x23e   : > { %v3704_v29 = vpop.f32.mrf.mxu1  ;;  %3213 = vst [vmem:[#allocation8 + $0xc8] sm:$0xff] %v3117_v11  ;;  %v3119_v32 = vadd.f32 %v2495_v19, %v425_v48  ;;  %v2497_v60 = vadd.f32 %v2496_v38, %v5752_v51  ;;  %v4452_v38 = vld [vmem:[%s4769_s6 + $0x2a8] ss:$24 sps:$4 sm:$0xff]  }
 0x23f   : > { %v5539_v43 = vadd.f32 %v3704_v29, %v3703_v20  ;;  %v2500_v21 = vpop.f32.mrf.mxu0  ;;  %2907 = vmatmul.mubr.bf16.gmra.mxu0 %v4450_v31  ;;  %v5757_v29 = vld [vmem:[#allocation17_spill] sm:$0xff] }
 0x240   : > { %v3706_v34 = vpop.f32.mrf.mxu1  ;;  %3068 = vmatmul.mubr.bf16.gmra.mxu1 %v5331_v37  ;;  %3215 = vst [vmem:[#allocation8 + $0xd8] sm:$0xff] %v3119_v32  ;;  %v3120_v33 = vadd.f32 %v2497_v60, %v426_v14  ;;  %v2501_v24 = vadd.f32 %v2500_v21, %v5753_v36  ;;  %2914 = vmatprep.mubr.bf16.mxu0 %v4451_v22  ;;  %v4453_v60 = vld [vmem:[%s4769_s6 + $0x2dc] ss:$24 sps:$4 sm:$0xff]  }
 0x241   : > { %3075 = vmatprep.mubr.bf16.mxu1 %v5754_v58  ;;  %v2502_v28 = vpop.f32.mrf.mxu0  ;;  %v437_v22 = vld [vmem:[#allocation8 + $0x138] sm:$0xff] }
 0x242   : > { %v3707_v25 = vpop.f32.mrf.mxu1  ;;  %3216 = vst [vmem:[#allocation8 + $0xe0] sm:$0xff] %v3120_v33  ;;  %v3122_v1 = vadd.f32 %v2501_v24, %v428_v23  ;;  %v2503_v52 = vadd.f32 %v2502_v28, %v5346_v46  ;;  %v434_v46 = vld [vmem:[#allocation8 + $0x120] sm:$0xff]  ;;  %v435_v23 = vld [vmem:[#allocation8 + $0x128] sm:$0xff]  ;;  %v5758_v33 = vld [vmem:[#allocation20_spill] sm:$0xff] }
 0x243   : > { %v5547_v54 = vadd.f32 %v3707_v25, %v3706_v34  ;;  %v2504_v37 = vpop.f32.mrf.mxu0 }
 0x244   : > { %v3709_v57 = vpop.f32.mrf.mxu1  ;;  %3218 = vst [vmem:[#allocation8 + $0xf0] sm:$0xff] %v3122_v1  ;;  %v3123_v53 = vadd.f32 %v2503_v52, %v429_v49  ;;  %v2505_v8 = vadd.f32 %v2504_v37, %v5755_v17  ;;  %v438_v1 = vld [vmem:[#allocation8 + $0x140] sm:$0xff]  ;;  %v5760_v37 = vld [vmem:[#allocation23_spill] sm:$0xff]  ;;  %v440_v17 = vld [vmem:[#allocation8 + $0x150] sm:$0xff] }
 0x245   : > { %v2506_v55 = vpop.f32.mrf.mxu0 }
 0x246   : > { %v3710_v26 = vpop.f32.mrf.mxu1  ;;  %3219 = vst [vmem:[#allocation8 + $0xf8] sm:$0xff] %v3123_v53  ;;  %v3125_v48 = vadd.f32 %v2505_v8, %v431_v35  ;;  %v2507_v20 = vadd.f32 %v2506_v55, %v5756_v40  ;;  %v4454_v55 = vld [vmem:[%s4769_s6 + $0x2d8] ss:$24 sps:$4 sm:$0xff]  }
 0x247   : > { %v5551_v11 = vadd.f32 %v3710_v26, %v3709_v57  ;;  %v2510_v19 = vpop.f32.mrf.mxu0  ;;  %2915 = vmatmul.mubr.bf16.gmra.mxu0 %v4452_v38  ;;  %v5761_v26 = vld [vmem:[#allocation21_spill] sm:$0xff] }
 0x248   : > { %v3712_v14 = vpop.f32.mrf.mxu1  ;;  %3076 = vmatmul.mubr.bf16.gmra.mxu1 %v5757_v29  ;;  %3221 = vst [vmem:[#allocation8 + $0x108] sm:$0xff] %v3125_v48  ;;  %v3126_v32 = vadd.f32 %v2507_v20, %v432_v4  ;;  %v2511_v51 = vadd.f32 %v2510_v19, %v5360_v63  ;;  %2922 = vmatprep.mubr.bf16.mxu0 %v4453_v60  ;;  %v5759_v63 = vld [vmem:[#allocation22_spill] sm:$0xff]  ;;  %v441_v20 = vld [vmem:[#allocation8 + $0x158] sm:$0xff] }
 0x249   : > { %3083 = vmatprep.mubr.bf16.mxu1 %v5354_v50  ;;  %v2512_v21 = vpop.f32.mrf.mxu0 }
 0x24a   : > { %v3713_v34 = vpop.f32.mrf.mxu1  ;;  %3222 = vst [vmem:[#allocation8 + $0x110] sm:$0xff] %v3126_v32  ;;  %v3128_v31 = vadd.f32 %v2511_v51, %v434_v46  ;;  %v2513_v36 = vadd.f32 %v2512_v21, %v5758_v33  ;;  %v443_v32 = vld [vmem:[#allocation8 + $0x168] sm:$0xff]  ;;  %v5762_v21 = vld [vmem:[#allocation24_spill] sm:$0xff] }
 0x24b   : > { %v5559_v24 = vadd.f32 %v3713_v34, %v3712_v14  ;;  %v2514_v58 = vpop.f32.mrf.mxu0 }
 0x24c   : > { %v3715_v49 = vpop.f32.mrf.mxu1  ;;  %3224 = vst [vmem:[#allocation8 + $0x120] sm:$0xff] %v3128_v31  ;;  %v3129_v28 = vadd.f32 %v2513_v36, %v435_v23  ;;  %v2515_v25 = vadd.f32 %v2514_v58, %v5759_v63  ;;  %v444_v31 = vld [vmem:[#allocation8 + $0x170] sm:$0xff] }
 0x24d   : > { %v2516_v52 = vpop.f32.mrf.mxu0 }
 0x24e   : > { %v3716_v50 = vpop.f32.mrf.mxu1  ;;  %3225 = vst [vmem:[#allocation8 + $0x128] sm:$0xff] %v3129_v28  ;;  %v3131_v35 = vadd.f32 %v2515_v25, %v437_v22  ;;  %v2517_v57 = vadd.f32 %v2516_v52, %v5760_v37  ;;  %v5763_v22 = vld [vmem:[#allocation25_spill] sm:$0xff]  ;;  %v446_v28 = vld [vmem:[#allocation8 + $0x180] sm:$0xff]  ;;  %v447_v52 = vld [vmem:[#allocation8 + $0x188] sm:$0xff] }
 0x24f   : > { %v5563_v53 = vadd.f32 %v3716_v50, %v3715_v49  ;;  %v2520_v8 = vpop.f32.mrf.mxu0  ;;  %2923 = vmatmul.mubr.bf16.gmra.mxu0 %v4454_v55 }
 0x250   : > { %v3718_v4 = vpop.f32.mrf.mxu1  ;;  %3084 = vmatmul.mubr.bf16.gmra.mxu1 %v5761_v26  ;;  %3227 = vst [vmem:[#allocation8 + $0x138] sm:$0xff] %v3131_v35  ;;  %v3132_v48 = vadd.f32 %v2517_v57, %v438_v1  ;;  %v2521_v40 = vadd.f32 %v2520_v8, %v5375_v5  ;;  %v449_v8 = vld [vmem:[#allocation8 + $0x198] sm:$0xff] }
 0x251   : > { %v2522_v46 = vpop.f32.mrf.mxu0 }
 0x252   : > { %v3719_v19 = vpop.f32.mrf.mxu1  ;;  %3228 = vst [vmem:[#allocation8 + $0x140] sm:$0xff] %v3132_v48  ;;  %v3134_v14 = vadd.f32 %v2521_v40, %v440_v17  ;;  %v2523_v38 = vadd.f32 %v2522_v46, %v5379_v61  ;;  %v5764_v48 = vld [vmem:[#allocation26_spill] sm:$0xff] }
 0x253   : > { %v5569_v29 = vadd.f32 %v3719_v19, %v3718_v4  ;;  %v2524_v51 = vpop.f32.mrf.mxu0 }
 0x254   : > { %v3721_v60 = vpop.f32.mrf.mxu1  ;;  %3230 = vst [vmem:[#allocation8 + $0x150] sm:$0xff] %v3134_v14  ;;  %v3135_v23 = vadd.f32 %v2523_v38, %v441_v20  ;;  %v2525_v34 = vadd.f32 %v2524_v51, %v5762_v21  ;;  %v450_v20 = vld [vmem:[#allocation8 + $0x1a0] sm:$0xff]  ;;  %v5765_v14 = vld [vmem:[#allocation27_spill] sm:$0xff]  ;;  %v452_v51 = vld [vmem:[#allocation8 + $0x1b0] sm:$0xff] }
 0x255   : > { %v2526_v33 = vpop.f32.mrf.mxu0 }
 0x256   : > { %v3722_v36 = vpop.f32.mrf.mxu1  ;;  %3231 = vst [vmem:[#allocation8 + $0x158] sm:$0xff] %v3135_v23  ;;  %v3137_v5 = vadd.f32 %v2525_v34, %v443_v32  ;;  %v2527_v58 = vadd.f32 %v2526_v33, %v5763_v22  ;;  %v453_v34 = vld [vmem:[#allocation8 + $0x1b8] sm:$0xff] }
 0x257   : > { %v5573_v49 = vadd.f32 %v3722_v36, %v3721_v60  ;;  %v2530_v61 = vpop.f32.mrf.mxu0 }
 0x258   : > { %v3724_v63 = vpop.f32.mrf.mxu1  ;;  %3233 = vst [vmem:[#allocation8 + $0x168] sm:$0xff] %v3137_v5  ;;  %v3138_v25 = vadd.f32 %v2527_v58, %v444_v31  ;;  %v2531_v1 = vadd.f32 %v2530_v61, %v5387_v9  ;;  %v455_v58 = vld [vmem:[#allocation8 + $0x1c8] sm:$0xff] }
 0x259   : > { %v2532_v50 = vpop.f32.mrf.mxu0 }
 0x25a   : > { %v3725_v35 = vpop.f32.mrf.mxu1  ;;  %3234 = vst [vmem:[#allocation8 + $0x170] sm:$0xff] %v3138_v25  ;;  %v3140_v37 = vadd.f32 %v2531_v1, %v446_v28  ;;  %v2533_v57 = vadd.f32 %v2532_v50, %v5391_v56  ;;  %v5766_v25 = vld [vmem:[#allocation28_spill] sm:$0xff] }
 0x25b   : > { %v5577_v17 = vadd.f32 %v3725_v35, %v3724_v63  ;;  %v2534_v4 = vpop.f32.mrf.mxu0 }
 0x25c   : > { %v3727_v55 = vpop.f32.mrf.mxu1  ;;  %3236 = vst [vmem:[#allocation8 + $0x180] sm:$0xff] %v3140_v37  ;;  %v3141_v26 = vadd.f32 %v2533_v57, %v447_v52  ;;  %v2535_v40 = vadd.f32 %v2534_v4, %v5764_v48  ;;  %v456_v52 = vld [vmem:[#allocation8 + $0x1d0] sm:$0xff]  ;;  %v5767_v37 = vld [vmem:[#allocation29_spill] sm:$0xff]  ;;  %v458_v4 = vld [vmem:[#allocation8 + $0x1e0] sm:$0xff] }
 0x25d   : > { %v2536_v46 = vpop.f32.mrf.mxu0 }
 0x25e   : > { %v3728_v19 = vpop.f32.mrf.mxu1  ;;  %3237 = vst [vmem:[#allocation8 + $0x188] sm:$0xff] %v3141_v26  ;;  %v3143_v9 = vadd.f32 %v2535_v40, %v449_v8  ;;  %v2537_v38 = vadd.f32 %v2536_v46, %v5765_v14  ;;  %v459_v40 = vld [vmem:[#allocation8 + $0x1e8] sm:$0xff] }
 0x25f   : > { %v5581_v32 = vadd.f32 %v3728_v19, %v3727_v55  ;;  %v2540_v56 = vpop.f32.mrf.mxu0 }
 0x260   : > { %v3730_v60 = vpop.f32.mrf.mxu1  ;;  %3239 = vst [vmem:[#allocation8 + $0x198] sm:$0xff] %v3143_v9  ;;  %v3144_v23 = vadd.f32 %v2537_v38, %v450_v20  ;;  %v2541_v21 = vadd.f32 %v2540_v56, %v5399_v16  ;;  %v461_v38 = vld [vmem:[#allocation8 + $0x1f8] sm:$0xff] }
 0x261   : > { %v2542_v31 = vpop.f32.mrf.mxu0 }
 0x262   : > { %v3731_v33 = vpop.f32.mrf.mxu1  ;;  %3240 = vst [vmem:[#allocation8 + $0x1a0] sm:$0xff] %v3144_v23  ;;  %v3146_v36 = vadd.f32 %v2541_v21, %v452_v51  ;;  %v2543_v5 = vadd.f32 %v2542_v31, %v5403_v59  ;;  %v5768_v23 = vld [vmem:[#allocation30_spill] sm:$0xff] }
 0x263   : > { %v5585_v22 = vadd.f32 %v3731_v33, %v3730_v60  ;;  %v2544_v28 = vpop.f32.mrf.mxu0 }
 0x264   : > { %v3733_v61 = vpop.f32.mrf.mxu1  ;;  %3242 = vst [vmem:[#allocation8 + $0x1b0] sm:$0xff] %v3146_v36  ;;  %v3147_v63 = vadd.f32 %v2543_v5, %v453_v34  ;;  %v2545_v1 = vadd.f32 %v2544_v28, %v5766_v25  ;;  %v462_v34 = vld [vmem:[#allocation8 + $0x200] sm:$0xff]  ;;  %v5769_v36 = vld [vmem:[#allocation31_spill] sm:$0xff]  ;;  %v464_v28 = vld [vmem:[#allocation8 + $0x210] sm:$0xff] }
 0x265   : > { %v2546_v50 = vpop.f32.mrf.mxu0 }
 0x266   : > { %v3734_v35 = vpop.f32.mrf.mxu1  ;;  %3243 = vst [vmem:[#allocation8 + $0x1b8] sm:$0xff] %v3147_v63  ;;  %v3149_v16 = vadd.f32 %v2545_v1, %v455_v58  ;;  %v2547_v57 = vadd.f32 %v2546_v50, %v5767_v37  ;;  %v465_v1 = vld [vmem:[#allocation8 + $0x218] sm:$0xff] }
 0x267   : > { %v5589_v8 = vadd.f32 %v3734_v35, %v3733_v61  ;;  %v2550_v59 = vpop.f32.mrf.mxu0 }
 0x268   : > { %v3736_v55 = vpop.f32.mrf.mxu1  ;;  %3245 = vst [vmem:[#allocation8 + $0x1c8] sm:$0xff] %v3149_v16  ;;  %v3150_v26 = vadd.f32 %v2547_v57, %v456_v52  ;;  %v2551_v48 = vadd.f32 %v2550_v59, %v5411_v13  ;;  %v467_v57 = vld [vmem:[#allocation8 + $0x228] sm:$0xff] }
 0x269   : > { %v2552_v20 = vpop.f32.mrf.mxu0 }
 0x26a   : > { %v3737_v46 = vpop.f32.mrf.mxu1  ;;  %3246 = vst [vmem:[#allocation8 + $0x1d0] sm:$0xff] %v3150_v26  ;;  %v3152_v19 = vadd.f32 %v2551_v48, %v458_v4  ;;  %v2553_v9 = vadd.f32 %v2552_v20, %v5415_v30  ;;  %v5770_v26 = vld [vmem:[#allocation32_spill] sm:$0xff] }
 0x26b   : > { %v5593_v14 = vadd.f32 %v3737_v46, %v3736_v55  ;;  %v2554_v51 = vpop.f32.mrf.mxu0 }
 0x26c   : > { %v3739_v56 = vpop.f32.mrf.mxu1  ;;  %3248 = vst [vmem:[#allocation8 + $0x1e0] sm:$0xff] %v3152_v19  ;;  %v3153_v60 = vadd.f32 %v2553_v9, %v459_v40  ;;  %v2555_v21 = vadd.f32 %v2554_v51, %v5768_v23  ;;  %v468_v40 = vld [vmem:[#allocation8 + $0x230] sm:$0xff]  ;;  %v5771_v19 = vld [vmem:[#allocation33_spill] sm:$0xff]  ;;  %v470_v51 = vld [vmem:[#allocation8 + $0x240] sm:$0xff] }
 0x26d   : > { %v2556_v31 = vpop.f32.mrf.mxu0 }
 0x26e   : > { %v3740_v33 = vpop.f32.mrf.mxu1  ;;  %3249 = vst [vmem:[#allocation8 + $0x1e8] sm:$0xff] %v3153_v60  ;;  %v3155_v13 = vadd.f32 %v2555_v21, %v461_v38  ;;  %v2557_v5 = vadd.f32 %v2556_v31, %v5769_v36  ;;  %v471_v21 = vld [vmem:[#allocation8 + $0x248] sm:$0xff] }
 0x26f   : > { %v5597_v58 = vadd.f32 %v3740_v33, %v3739_v56  ;;  %v2560_v30 = vpop.f32.mrf.mxu0 }
 0x270   : > { %v3742_v61 = vpop.f32.mrf.mxu1  ;;  %3251 = vst [vmem:[#allocation8 + $0x1f8] sm:$0xff] %v3155_v13  ;;  %v3156_v63 = vadd.f32 %v2557_v5, %v462_v34  ;;  %v2561_v25 = vadd.f32 %v2560_v30, %v5423_v41  ;;  %v473_v5 = vld [vmem:[#allocation8 + $0x258] sm:$0xff] }
 0x271   : > { %v2562_v52 = vpop.f32.mrf.mxu0 }
 0x272   : > { %v3743_v50 = vpop.f32.mrf.mxu1  ;;  %3252 = vst [vmem:[#allocation8 + $0x200] sm:$0xff] %v3156_v63  ;;  %v3158_v35 = vadd.f32 %v2561_v25, %v464_v28  ;;  %v2563_v16 = vadd.f32 %v2562_v52, %v5427_v2  ;;  %v5772_v63 = vld [vmem:[#allocation34_spill] sm:$0xff] }
 0x273   : > { %v5601_v37 = vadd.f32 %v3743_v50, %v3742_v61  ;;  %v2564_v4 = vpop.f32.mrf.mxu0 }
 0x274   : > { %v3745_v59 = vpop.f32.mrf.mxu1  ;;  %3254 = vst [vmem:[#allocation8 + $0x210] sm:$0xff] %v3158_v35  ;;  %v3159_v55 = vadd.f32 %v2563_v16, %v465_v1  ;;  %v2565_v48 = vadd.f32 %v2564_v4, %v5770_v26  ;;  %v474_v1 = vld [vmem:[#allocation8 + $0x260] sm:$0xff]  ;;  %v5773_v35 = vld [vmem:[#allocation35_spill] sm:$0xff]  ;;  %v476_v4 = vld [vmem:[#allocation8 + $0x270] sm:$0xff] }
 0x275   : > { %v2566_v20 = vpop.f32.mrf.mxu0 }
 0x276   : > { %v3746_v46 = vpop.f32.mrf.mxu1  ;;  %3255 = vst [vmem:[#allocation8 + $0x218] sm:$0xff] %v3159_v55  ;;  %v3161_v41 = vadd.f32 %v2565_v48, %v467_v57  ;;  %v2567_v9 = vadd.f32 %v2566_v20, %v5771_v19  ;;  %v477_v48 = vld [vmem:[#allocation8 + $0x278] sm:$0xff] }
 0x277   : > { %v5605_v38 = vadd.f32 %v3746_v46, %v3745_v59  ;;  %v2570_v2 = vpop.f32.mrf.mxu0 }
 0x278   : > { %v3748_v56 = vpop.f32.mrf.mxu1  ;;  %3257 = vst [vmem:[#allocation8 + $0x228] sm:$0xff] %v3161_v41  ;;  %v3162_v60 = vadd.f32 %v2567_v9, %v468_v40  ;;  %v2571_v23 = vadd.f32 %v2570_v2, %v5435_v62  ;;  %v479_v9 = vld [vmem:[#allocation8 + $0x288] sm:$0xff] }
 0x279   : > { %v2572_v34 = vpop.f32.mrf.mxu0 }
 0x27a   : > { %v3749_v31 = vpop.f32.mrf.mxu1  ;;  %3258 = vst [vmem:[#allocation8 + $0x230] sm:$0xff] %v3162_v60  ;;  %v3164_v33 = vadd.f32 %v2571_v23, %v470_v51  ;;  %v2573_v13 = vadd.f32 %v2572_v34, %v5439_v47  ;;  %v5774_v60 = vld [vmem:[#allocation36_spill] sm:$0xff] }
 0x27b   : > { %v5609_v36 = vadd.f32 %v3749_v31, %v3748_v56  ;;  %v2574_v28 = vpop.f32.mrf.mxu0 }
 0x27c   : > { %v3751_v30 = vpop.f32.mrf.mxu1  ;;  %3260 = vst [vmem:[#allocation8 + $0x240] sm:$0xff] %v3164_v33  ;;  %v3165_v61 = vadd.f32 %v2573_v13, %v471_v21  ;;  %v2575_v25 = vadd.f32 %v2574_v28, %v5772_v63  ;;  %v480_v21 = vld [vmem:[#allocation8 + $0x290] sm:$0xff]  ;;  %v5775_v33 = vld [vmem:[#allocation37_spill] sm:$0xff]  ;;  %v482_v28 = vld [vmem:[#allocation8 + $0x2a0] sm:$0xff] }
 0x27d   : > { %v2576_v52 = vpop.f32.mrf.mxu0 }
 0x27e   : > { %v3752_v50 = vpop.f32.mrf.mxu1  ;;  %3261 = vst [vmem:[#allocation8 + $0x248] sm:$0xff] %v3165_v61  ;;  %v3167_v62 = vadd.f32 %v2575_v25, %v473_v5  ;;  %v2577_v16 = vadd.f32 %v2576_v52, %v5773_v35  ;;  %v483_v25 = vld [vmem:[#allocation8 + $0x2a8] sm:$0xff] }
 0x27f   : > { %v5613_v57 = vadd.f32 %v3752_v50, %v3751_v30  ;;  %v2580_v47 = vpop.f32.mrf.mxu0 }
 0x280   : > { %v3754_v59 = vpop.f32.mrf.mxu1  ;;  %3263 = vst [vmem:[#allocation8 + $0x258] sm:$0xff] %v3167_v62  ;;  %v3168_v55 = vadd.f32 %v2577_v16, %v474_v1  ;;  %v2581_v26 = vadd.f32 %v2580_v47, %v5447_v15  ;;  %v485_v16 = vld [vmem:[#allocation8 + $0x2b8] sm:$0xff] }
 0x281   : > { %v2582_v40 = vpop.f32.mrf.mxu0 }
 0x282   : > { %v3755_v20 = vpop.f32.mrf.mxu1  ;;  %3264 = vst [vmem:[#allocation8 + $0x260] sm:$0xff] %v3168_v55  ;;  %v3170_v46 = vadd.f32 %v2581_v26, %v476_v4  ;;  %v2583_v41 = vadd.f32 %v2582_v40, %v5451_v6  ;;  %v5776_v55 = vld [vmem:[#allocation38_spill] sm:$0xff] }
 0x283   : > { %v5617_v19 = vadd.f32 %v3755_v20, %v3754_v59  ;;  %v2584_v51 = vpop.f32.mrf.mxu0 }
 0x284   : > { %v3757_v2 = vpop.f32.mrf.mxu1  ;;  %3266 = vst [vmem:[#allocation8 + $0x270] sm:$0xff] %v3170_v46  ;;  %v3171_v56 = vadd.f32 %v2583_v41, %v477_v48  ;;  %v2585_v23 = vadd.f32 %v2584_v51, %v5774_v60  ;;  %v486_v48 = vld [vmem:[#allocation8 + $0x2c0] sm:$0xff]  ;;  %v5777_v46 = vld [vmem:[#allocation39_spill] sm:$0xff]  ;;  %v488_v51 = vld [vmem:[#allocation8 + $0x2d0] sm:$0xff] }
 0x285   : > { %v2586_v34 = vpop.f32.mrf.mxu0  ;;  %v5778_v60 = vld [vmem:[#allocation40_spill] sm:$0xff] }
 0x286   : > { %v3758_v31 = vpop.f32.mrf.mxu1  ;;  %3267 = vst [vmem:[#allocation8 + $0x278] sm:$0xff] %v3171_v56  ;;  %v3173_v15 = vadd.f32 %v2585_v23, %v479_v9  ;;  %v2587_v13 = vadd.f32 %v2586_v34, %v5775_v33  ;;  %v5779_v33 = vld [vmem:[#allocation41_spill] sm:$0xff] }
 0x287   : > { %v5621_v5 = vadd.f32 %v3758_v31, %v3757_v2  ;;  %v2590_v6 = vpop.f32.mrf.mxu0 }
 0x288   : > { %v3760_v30 = vpop.f32.mrf.mxu1  ;;  %3269 = vst [vmem:[#allocation8 + $0x288] sm:$0xff] %v3173_v15  ;;  %v3174_v61 = vadd.f32 %v2587_v13, %v480_v21  ;;  %v2591_v63 = vadd.f32 %v2590_v6, %v5459_v45  ;;  %v489_v21 = vld [vmem:[#allocation8 + $0x2d8] sm:$0xff]  ;;  %v491_v6 = vld [vmem:[#allocation8 + $0x2e8] sm:$0xff] }
 0x289   : > { %v2592_v1 = vpop.f32.mrf.mxu0 }
 0x28a   : > { %v3761_v52 = vpop.f32.mrf.mxu1  ;;  %3270 = vst [vmem:[#allocation8 + $0x290] sm:$0xff] %v3174_v61  ;;  %v3176_v50 = vadd.f32 %v2591_v63, %v482_v28  ;;  %v2593_v62 = vadd.f32 %v2592_v1, %v5463_v44 }
 0x28b   : > { %v5625_v35 = vadd.f32 %v3761_v52, %v3760_v30  ;;  %v2594_v4 = vpop.f32.mrf.mxu0  ;;  %v492_v52 = vld [vmem:[#allocation8 + $0x2f0] sm:$0xff] }
 0x28c   : > { %v3763_v47 = vpop.f32.mrf.mxu1  ;;  %3272 = vst [vmem:[#allocation8 + $0x2a0] sm:$0xff] %v3176_v50  ;;  %v3177_v59 = vadd.f32 %v2593_v62, %v483_v25  ;;  %v2595_v26 = vadd.f32 %v2594_v4, %v5776_v55  ;;  %v5780_v25 = vld [vmem:[#allocation42_spill] sm:$0xff]  ;;  %v5781_v4 = vld [vmem:[#allocation43_spill] sm:$0xff] }
 0x28d   : > { %v2596_v40 = vpop.f32.mrf.mxu0 }
 0x28e   : > { %v3764_v20 = vpop.f32.mrf.mxu1  ;;  %3273 = vst [vmem:[#allocation8 + $0x2a8] sm:$0xff] %v3177_v59  ;;  %v3179_v45 = vadd.f32 %v2595_v26, %v485_v16  ;;  %v2597_v41 = vadd.f32 %v2596_v40, %v5777_v46 }
 0x28f   : > { %v5629_v9 = vadd.f32 %v3764_v20, %v3763_v47  ;;  %v2600_v44 = vpop.f32.mrf.mxu0 }
 0x290   : > { %v3766_v2 = vpop.f32.mrf.mxu1  ;;  %3275 = vst [vmem:[#allocation8 + $0x2b8] sm:$0xff] %v3179_v45  ;;  %v3180_v56 = vadd.f32 %v2597_v41, %v486_v48  ;;  %v2601_v23 = vadd.f32 %v2600_v44, %v5778_v60 }
 0x291   : > { %v2602_v34 = vpop.f32.mrf.mxu0 }
 0x292   : > { %v3767_v31 = vpop.f32.mrf.mxu1  ;;  %3276 = vst [vmem:[#allocation8 + $0x2c0] sm:$0xff] %v3180_v56  ;;  %v3182_v15 = vadd.f32 %v2601_v23, %v488_v51  ;;  %v2603_v13 = vadd.f32 %v2602_v34, %v5779_v33 }
 0x293   : > { %v5633_v28 = vadd.f32 %v3767_v31, %v3766_v2  ;;  %v2604_v30 = vpop.f32.mrf.mxu0  ;;  %v400_v2 = vld [vmem:[#allocation8 + $0x10] sm:$0xff] }
 0x294   : > { %v3769_v61 = vpop.f32.mrf.mxu1  ;;  %3278 = vst [vmem:[#allocation8 + $0x2d0] sm:$0xff] %v3182_v15  ;;  %v3183_v63 = vadd.f32 %v2603_v13, %v489_v21  ;;  %v2605_v1 = vadd.f32 %v2604_v30, %v5780_v25 }
 0x295   : > { %v2606_v50 = vpop.f32.mrf.mxu0 }
 0x296   : > { %v3770_v62 = vpop.f32.mrf.mxu1  ;;  %3279 = vst [vmem:[#allocation8 + $0x2d8] sm:$0xff] %v3183_v63  ;;  %v3185_v16 = vadd.f32 %v2605_v1, %v491_v6  ;;  %v2607_v47 = vadd.f32 %v2606_v50, %v5781_v4  ;;  %v403_v6 = vld [vmem:[#allocation8 + $0x28] sm:$0xff] }
 0x297   : > { %v5637_v59 = vadd.f32 %v3770_v62, %v3769_v61  ;;  %v3788_v55 = vpop.f32.mrf.mxu0 }
 0x298   : > { %v3900_v26 = vpop.f32.mrf.mxu1  ;;  %3281 = vst [vmem:[#allocation8 + $0x2e8] sm:$0xff] %v3185_v16  ;;  %v3186_v48 = vadd.f32 %v2607_v47, %v492_v52  ;;  %v406_v16 = vld [vmem:[#allocation8 + $0x40] sm:$0xff] }
 0x299   : > { %v3789_v40 = vpop.f32.mrf.mxu0 }
 0x29a   : > { %v3901_v20 = vpop.f32.mrf.mxu1  ;;  %3282 = vst [vmem:[#allocation8 + $0x2f0] sm:$0xff] %v3186_v48  ;;  %v3790_v45 = vadd.f32 %v3789_v40, %v3788_v55 }
 0x29b   : > { %v3791_v46 = vpop.f32.mrf.mxu0  ;;  %v3902_v44 = vadd.f32 %v3901_v20, %v3900_v26 }
 0x29c   : > { %v3903_v41 = vpop.f32.mrf.mxu1  ;;  %v2805_v51 = vadd.f32 %v3790_v45, %v5487_v12 }
 0x29d   : > { %v3792_v56 = vpop.f32.mrf.mxu0 }
 0x29e   : > { %v3904_v60 = vpop.f32.mrf.mxu1  ;;  %v2966_v23 = vadd.f32 %v3902_v44, %v2805_v51  ;;  %v3793_v21 = vadd.f32 %v3792_v56, %v3791_v46  ;;  %v409_v46 = vld [vmem:[#allocation8 + $0x58] sm:$0xff] }
 0x29f   : > { %v3794_v34 = vpop.f32.mrf.mxu0  ;;  %v3905_v13 = vadd.f32 %v3904_v60, %v3903_v41 }
 0x2a0   : > { %v3906_v31 = vpop.f32.mrf.mxu1  ;;  %v3094_v15 = vadd.f32 %v2966_v23, %v400_v2  ;;  %v2808_v33 = vadd.f32 %v3793_v21, %v5491_v0 }
 0x2a1   : > { %v3795_v30 = vpop.f32.mrf.mxu0 }
 0x2a2   : > { %v3907_v61 = vpop.f32.mrf.mxu1  ;;  %3190 = vst [vmem:[#allocation8 + $0x10] sm:$0xff] %v3094_v15  ;;  %v2969_v63 = vadd.f32 %v3905_v13, %v2808_v33  ;;  %v3796_v25 = vadd.f32 %v3795_v30, %v3794_v34  ;;  %v412_v34 = vld [vmem:[#allocation8 + $0x70] sm:$0xff] }
 0x2a3   : > { %v3797_v1 = vpop.f32.mrf.mxu0  ;;  %v3908_v62 = vadd.f32 %v3907_v61, %v3906_v31 }
 0x2a4   : > { %v3909_v12 = vpop.f32.mrf.mxu1  ;;  %v3097_v52 = vadd.f32 %v2969_v63, %v403_v6  ;;  %v2813_v50 = vadd.f32 %v3796_v25, %v5499_v3  ;;  %v415_v25 = vld [vmem:[#allocation8 + $0x88] sm:$0xff] }
 0x2a5   : > { %v3798_v4 = vpop.f32.mrf.mxu0 }
 0x2a6   : > { %v3910_v47 = vpop.f32.mrf.mxu1  ;;  %3193 = vst [vmem:[#allocation8 + $0x28] sm:$0xff] %v3097_v52  ;;  %v2974_v55 = vadd.f32 %v3908_v62, %v2813_v50  ;;  %v3799_v26 = vadd.f32 %v3798_v4, %v3797_v1 }
 0x2a7   : > { %v3800_v0 = vpop.f32.mrf.mxu0  ;;  %v3911_v45 = vadd.f32 %v3910_v47, %v3909_v12 }
 0x2a8   : > { %v3912_v48 = vpop.f32.mrf.mxu1  ;;  %v3100_v40 = vadd.f32 %v2974_v55, %v406_v16  ;;  %v2816_v20 = vadd.f32 %v3799_v26, %v5503_v42  ;;  %v418_v55 = vld [vmem:[#allocation8 + $0xa0] sm:$0xff] }
 0x2a9   : > { %v3801_v41 = vpop.f32.mrf.mxu0 }
 0x2aa   : > { %v3913_v51 = vpop.f32.mrf.mxu1  ;;  %3196 = vst [vmem:[#allocation8 + $0x40] sm:$0xff] %v3100_v40  ;;  %v2977_v44 = vadd.f32 %v3911_v45, %v2816_v20  ;;  %v3802_v2 = vadd.f32 %v3801_v41, %v3800_v0 }
 0x2ab   : > { %v3803_v3 = vpop.f32.mrf.mxu0  ;;  %v3914_v21 = vadd.f32 %v3913_v51, %v3912_v48  ;;  %v421_v51 = vld [vmem:[#allocation8 + $0xb8] sm:$0xff] }
 0x2ac   : > { %v3915_v56 = vpop.f32.mrf.mxu1  ;;  %v3103_v60 = vadd.f32 %v2977_v44, %v409_v46  ;;  %v2821_v23 = vadd.f32 %v3802_v2, %v5511_v18 }
 0x2ad   : > { %v3804_v31 = vpop.f32.mrf.mxu0 }
 0x2ae   : > { %v3916_v15 = vpop.f32.mrf.mxu1  ;;  %3199 = vst [vmem:[#allocation8 + $0x58] sm:$0xff] %v3103_v60  ;;  %v2982_v33 = vadd.f32 %v3914_v21, %v2821_v23  ;;  %v3805_v13 = vadd.f32 %v3804_v31, %v3803_v3  ;;  %v424_v31 = vld [vmem:[#allocation8 + $0xd0] sm:$0xff] }
 0x2af   : > { %v3806_v42 = vpop.f32.mrf.mxu0  ;;  %v3917_v63 = vadd.f32 %v3916_v15, %v3915_v56 }
 0x2b0   : > { %v3918_v6 = vpop.f32.mrf.mxu1  ;;  %v3106_v30 = vadd.f32 %v2982_v33, %v412_v34  ;;  %v2824_v61 = vadd.f32 %v3805_v13, %v5515_v10 }
 0x2b1   : > { %v3807_v1 = vpop.f32.mrf.mxu0 }
 0x2b2   : > { %v3919_v12 = vpop.f32.mrf.mxu1  ;;  %3202 = vst [vmem:[#allocation8 + $0x70] sm:$0xff] %v3106_v30  ;;  %v2985_v52 = vadd.f32 %v3917_v63, %v2824_v61  ;;  %v3808_v50 = vadd.f32 %v3807_v1, %v3806_v42 }
 0x2b3   : > { %v3809_v18 = vpop.f32.mrf.mxu0  ;;  %v3920_v47 = vadd.f32 %v3919_v12, %v3918_v6 }
 0x2b4   : > { %v3921_v62 = vpop.f32.mrf.mxu1  ;;  %v3109_v16 = vadd.f32 %v2985_v52, %v415_v25  ;;  %v2829_v4 = vadd.f32 %v3808_v50, %v5523_v39  ;;  %v427_v25 = vld [vmem:[#allocation8 + $0xe8] sm:$0xff] }
 0x2b5   : > { %v3810_v26 = vpop.f32.mrf.mxu0 }
 0x2b6   : > { %v3922_v0 = vpop.f32.mrf.mxu1  ;;  %3205 = vst [vmem:[#allocation8 + $0x88] sm:$0xff] %v3109_v16  ;;  %v2990_v48 = vadd.f32 %v3920_v47, %v2829_v4  ;;  %v3811_v40 = vadd.f32 %v3810_v26, %v3809_v18  ;;  %v430_v47 = vld [vmem:[#allocation8 + $0x100] sm:$0xff] }
 0x2b7   : > { %v3812_v10 = vpop.f32.mrf.mxu0  ;;  %v3923_v41 = vadd.f32 %v3922_v0, %v3921_v62 }
 0x2b8   : > { %v3924_v20 = vpop.f32.mrf.mxu1  ;;  %v3112_v45 = vadd.f32 %v2990_v48, %v418_v55  ;;  %v2832_v46 = vadd.f32 %v3811_v40, %v5527_v7 }
 0x2b9   : > { %v3813_v44 = vpop.f32.mrf.mxu0 }
 0x2ba   : > { %v3925_v2 = vpop.f32.mrf.mxu1  ;;  %3208 = vst [vmem:[#allocation8 + $0xa0] sm:$0xff] %v3112_v45  ;;  %v2993_v3 = vadd.f32 %v3923_v41, %v2832_v46  ;;  %v3814_v56 = vadd.f32 %v3813_v44, %v3812_v10  ;;  %v433_v46 = vld [vmem:[#allocation8 + $0x118] sm:$0xff] }
 0x2bb   : > { %v3815_v39 = vpop.f32.mrf.mxu0  ;;  %v3926_v34 = vadd.f32 %v3925_v2, %v3924_v20 }
 0x2bc   : > { %v3927_v60 = vpop.f32.mrf.mxu1  ;;  %v3115_v23 = vadd.f32 %v2993_v3, %v421_v51  ;;  %v2837_v21 = vadd.f32 %v3814_v56, %v5535_v27 }
 0x2bd   : > { %v3816_v15 = vpop.f32.mrf.mxu0 }
 0x2be   : > { %v3928_v33 = vpop.f32.mrf.mxu1  ;;  %3211 = vst [vmem:[#allocation8 + $0xb8] sm:$0xff] %v3115_v23  ;;  %v2998_v13 = vadd.f32 %v3926_v34, %v2837_v21  ;;  %v3817_v42 = vadd.f32 %v3816_v15, %v3815_v39  ;;  %v436_v23 = vld [vmem:[#allocation8 + $0x130] sm:$0xff] }
 0x2bf   : > { %v3818_v7 = vpop.f32.mrf.mxu0  ;;  %v3929_v63 = vadd.f32 %v3928_v33, %v3927_v60 }
 0x2c0   : > { %v3930_v6 = vpop.f32.mrf.mxu1  ;;  %v3118_v30 = vadd.f32 %v2998_v13, %v424_v31  ;;  %v2840_v61 = vadd.f32 %v3817_v42, %v5539_v43 }
 0x2c1   : > { %v3819_v1 = vpop.f32.mrf.mxu0 }
 0x2c2   : > { %v3931_v12 = vpop.f32.mrf.mxu1  ;;  %3214 = vst [vmem:[#allocation8 + $0xd0] sm:$0xff] %v3118_v30  ;;  %v3001_v52 = vadd.f32 %v3929_v63, %v2840_v61  ;;  %v3820_v50 = vadd.f32 %v3819_v1, %v3818_v7 }
 0x2c3   : > { %v3821_v27 = vpop.f32.mrf.mxu0  ;;  %v3932_v4 = vadd.f32 %v3931_v12, %v3930_v6  ;;  %v439_v6 = vld [vmem:[#allocation8 + $0x148] sm:$0xff] }
 0x2c4   : > { %v3933_v18 = vpop.f32.mrf.mxu1  ;;  %v3121_v62 = vadd.f32 %v3001_v52, %v427_v25  ;;  %v2845_v16 = vadd.f32 %v3820_v50, %v5547_v54 }
 0x2c5   : > { %v3822_v55 = vpop.f32.mrf.mxu0 }
 0x2c6   : > { %v3934_v26 = vpop.f32.mrf.mxu1  ;;  %3217 = vst [vmem:[#allocation8 + $0xe8] sm:$0xff] %v3121_v62  ;;  %v3006_v0 = vadd.f32 %v3932_v4, %v2845_v16  ;;  %v3823_v48 = vadd.f32 %v3822_v55, %v3821_v27  ;;  %v442_v27 = vld [vmem:[#allocation8 + $0x160] sm:$0xff] }
 0x2c7   : > { %v3824_v43 = vpop.f32.mrf.mxu0  ;;  %v3935_v45 = vadd.f32 %v3934_v26, %v3933_v18 }
 0x2c8   : > { %v3936_v40 = vpop.f32.mrf.mxu1  ;;  %v3124_v10 = vadd.f32 %v3006_v0, %v430_v47  ;;  %v2848_v20 = vadd.f32 %v3823_v48, %v5551_v11  ;;  %v445_v48 = vld [vmem:[#allocation8 + $0x178] sm:$0xff] }
 0x2c9   : > { %v3825_v41 = vpop.f32.mrf.mxu0 }
 0x2ca   : > { %v3937_v51 = vpop.f32.mrf.mxu1  ;;  %3220 = vst [vmem:[#allocation8 + $0x100] sm:$0xff] %v3124_v10  ;;  %v3009_v44 = vadd.f32 %v3935_v45, %v2848_v20  ;;  %v3826_v2 = vadd.f32 %v3825_v41, %v3824_v43 }
 0x2cb   : > { %v3827_v54 = vpop.f32.mrf.mxu0  ;;  %v3938_v60 = vadd.f32 %v3937_v51, %v3936_v40 }
 0x2cc   : > { %v3939_v3 = vpop.f32.mrf.mxu1  ;;  %v3127_v56 = vadd.f32 %v3009_v44, %v433_v46  ;;  %v2853_v39 = vadd.f32 %v3826_v2, %v5559_v24  ;;  %v448_v44 = vld [vmem:[#allocation8 + $0x190] sm:$0xff] }
 0x2cd   : > { %v3828_v21 = vpop.f32.mrf.mxu0 }
 0x2ce   : > { %v3940_v34 = vpop.f32.mrf.mxu1  ;;  %3223 = vst [vmem:[#allocation8 + $0x118] sm:$0xff] %v3127_v56  ;;  %v3014_v31 = vadd.f32 %v3938_v60, %v2853_v39  ;;  %v3829_v15 = vadd.f32 %v3828_v21, %v3827_v54 }
 0x2cf   : > { %v3830_v11 = vpop.f32.mrf.mxu0  ;;  %v3941_v7 = vadd.f32 %v3940_v34, %v3939_v3  ;;  %v451_v34 = vld [vmem:[#allocation8 + $0x1a8] sm:$0xff] }
 0x2d0   : > { %v3942_v33 = vpop.f32.mrf.mxu1  ;;  %v3130_v13 = vadd.f32 %v3014_v31, %v436_v23  ;;  %v2856_v42 = vadd.f32 %v3829_v15, %v5563_v53 }
 0x2d1   : > { %v3831_v30 = vpop.f32.mrf.mxu0 }
 0x2d2   : > { %v3943_v61 = vpop.f32.mrf.mxu1  ;;  %3226 = vst [vmem:[#allocation8 + $0x130] sm:$0xff] %v3130_v13  ;;  %v3017_v63 = vadd.f32 %v3941_v7, %v2856_v42  ;;  %v3832_v25 = vadd.f32 %v3831_v30, %v3830_v11  ;;  %v454_v30 = vld [vmem:[#allocation8 + $0x1c0] sm:$0xff] }
 0x2d3   : > { %v3833_v24 = vpop.f32.mrf.mxu0  ;;  %v3944_v50 = vadd.f32 %v3943_v61, %v3942_v33 }
 0x2d4   : > { %v3945_v1 = vpop.f32.mrf.mxu1  ;;  %v3133_v12 = vadd.f32 %v3017_v63, %v439_v6  ;;  %v2861_v52 = vadd.f32 %v3832_v25, %v5569_v29 }
 0x2d5   : > { %v3834_v18 = vpop.f32.mrf.mxu0 }
 0x2d6   : > { %v3946_v62 = vpop.f32.mrf.mxu1  ;;  %3229 = vst [vmem:[#allocation8 + $0x148] sm:$0xff] %v3133_v12  ;;  %v3022_v16 = vadd.f32 %v3944_v50, %v2861_v52  ;;  %v3835_v4 = vadd.f32 %v3834_v18, %v3833_v24 }
 0x2d7   : > { %v3836_v53 = vpop.f32.mrf.mxu0  ;;  %v3947_v0 = vadd.f32 %v3946_v62, %v3945_v1 }
 0x2d8   : > { %v3948_v47 = vpop.f32.mrf.mxu1  ;;  %v3136_v55 = vadd.f32 %v3022_v16, %v442_v27  ;;  %v2864_v26 = vadd.f32 %v3835_v4, %v5573_v49  ;;  %v457_v27 = vld [vmem:[#allocation8 + $0x1d8] sm:$0xff] }
 0x2d9   : > { %v3837_v43 = vpop.f32.mrf.mxu0 }
 0x2da   : > { %v3949_v40 = vpop.f32.mrf.mxu1  ;;  %3232 = vst [vmem:[#allocation8 + $0x160] sm:$0xff] %v3136_v55  ;;  %v3025_v10 = vadd.f32 %v3947_v0, %v2864_v26  ;;  %v3838_v20 = vadd.f32 %v3837_v43, %v3836_v53  ;;  %v460_v0 = vld [vmem:[#allocation8 + $0x1f0] sm:$0xff] }
 0x2db   : > { %v3839_v29 = vpop.f32.mrf.mxu0  ;;  %v3950_v51 = vadd.f32 %v3949_v40, %v3948_v47 }
 0x2dc   : > { %v3951_v45 = vpop.f32.mrf.mxu1  ;;  %v3139_v46 = vadd.f32 %v3025_v10, %v445_v48  ;;  %v2869_v41 = vadd.f32 %v3838_v20, %v5577_v17 }
 0x2dd   : > { %v3840_v2 = vpop.f32.mrf.mxu0 }
 0x2de   : > { %v3952_v54 = vpop.f32.mrf.mxu1  ;;  %3235 = vst [vmem:[#allocation8 + $0x178] sm:$0xff] %v3139_v46  ;;  %v3030_v3 = vadd.f32 %v3950_v51, %v2869_v41  ;;  %v3841_v56 = vadd.f32 %v3840_v2, %v3839_v29  ;;  %v463_v41 = vld [vmem:[#allocation8 + $0x208] sm:$0xff] }
 0x2df   : > { %v3842_v49 = vpop.f32.mrf.mxu0  ;;  %v3953_v21 = vadd.f32 %v3952_v54, %v3951_v45 }
 0x2e0   : > { %v3954_v39 = vpop.f32.mrf.mxu1  ;;  %v3142_v60 = vadd.f32 %v3030_v3, %v448_v44  ;;  %v2872_v23 = vadd.f32 %v3841_v56, %v5581_v32 }
 0x2e1   : > { %v3843_v31 = vpop.f32.mrf.mxu0 }
 0x2e2   : > { %v3955_v15 = vpop.f32.mrf.mxu1  ;;  %3238 = vst [vmem:[#allocation8 + $0x190] sm:$0xff] %v3142_v60  ;;  %v3033_v11 = vadd.f32 %v3953_v21, %v2872_v23  ;;  %v3844_v33 = vadd.f32 %v3843_v31, %v3842_v49  ;;  %v466_v60 = vld [vmem:[#allocation8 + $0x220] sm:$0xff] }
 0x2e3   : > { %v3845_v17 = vpop.f32.mrf.mxu0  ;;  %v3956_v6 = vadd.f32 %v3955_v15, %v3954_v39 }
 0x2e4   : > { %v3957_v13 = vpop.f32.mrf.mxu1  ;;  %v3145_v42 = vadd.f32 %v3033_v11, %v451_v34  ;;  %v2877_v7 = vadd.f32 %v3844_v33, %v5585_v22 }
 0x2e5   : > { %v3846_v61 = vpop.f32.mrf.mxu0 }
 0x2e6   : > { %v3958_v63 = vpop.f32.mrf.mxu1  ;;  %3241 = vst [vmem:[#allocation8 + $0x1a8] sm:$0xff] %v3145_v42  ;;  %v3038_v25 = vadd.f32 %v3956_v6, %v2877_v7  ;;  %v3847_v24 = vadd.f32 %v3846_v61, %v3845_v17 }
 0x2e7   : > { %v3848_v32 = vpop.f32.mrf.mxu0  ;;  %v3959_v50 = vadd.f32 %v3958_v63, %v3957_v13  ;;  %v469_v13 = vld [vmem:[#allocation8 + $0x238] sm:$0xff] }
 0x2e8   : > { %v3960_v1 = vpop.f32.mrf.mxu1  ;;  %v3148_v12 = vadd.f32 %v3038_v25, %v454_v30  ;;  %v2880_v52 = vadd.f32 %v3847_v24, %v5589_v8 }
 0x2e9   : > { %v3849_v18 = vpop.f32.mrf.mxu0 }
 0x2ea   : > { %v3961_v62 = vpop.f32.mrf.mxu1  ;;  %3244 = vst [vmem:[#allocation8 + $0x1c0] sm:$0xff] %v3148_v12  ;;  %v3041_v16 = vadd.f32 %v3959_v50, %v2880_v52  ;;  %v3850_v4 = vadd.f32 %v3849_v18, %v3848_v32  ;;  %v472_v32 = vld [vmem:[#allocation8 + $0x250] sm:$0xff] }
 0x2eb   : > { %v3851_v22 = vpop.f32.mrf.mxu0  ;;  %v3962_v26 = vadd.f32 %v3961_v62, %v3960_v1 }
 0x2ec   : > { %v3963_v53 = vpop.f32.mrf.mxu1  ;;  %v3151_v47 = vadd.f32 %v3041_v16, %v457_v27  ;;  %v2885_v55 = vadd.f32 %v3850_v4, %v5593_v14  ;;  %v475_v4 = vld [vmem:[#allocation8 + $0x268] sm:$0xff] }
 0x2ed   : > { %v3852_v48 = vpop.f32.mrf.mxu0 }
 0x2ee   : > { %v3964_v43 = vpop.f32.mrf.mxu1  ;;  %3247 = vst [vmem:[#allocation8 + $0x1d8] sm:$0xff] %v3151_v47  ;;  %v3046_v40 = vadd.f32 %v3962_v26, %v2885_v55  ;;  %v3853_v10 = vadd.f32 %v3852_v48, %v3851_v22 }
 0x2ef   : > { %v3854_v8 = vpop.f32.mrf.mxu0  ;;  %v3965_v46 = vadd.f32 %v3964_v43, %v3963_v53 }
 0x2f0   : > { %v3966_v20 = vpop.f32.mrf.mxu1  ;;  %v3154_v29 = vadd.f32 %v3046_v40, %v460_v0  ;;  %v2888_v45 = vadd.f32 %v3853_v10, %v5597_v58  ;;  %v478_v40 = vld [vmem:[#allocation8 + $0x280] sm:$0xff] }
 0x2f1   : > { %v3855_v51 = vpop.f32.mrf.mxu0 }
 0x2f2   : > { %v3967_v44 = vpop.f32.mrf.mxu1  ;;  %3250 = vst [vmem:[#allocation8 + $0x1f0] sm:$0xff] %v3154_v29  ;;  %v3049_v2 = vadd.f32 %v3965_v46, %v2888_v45  ;;  %v3856_v54 = vadd.f32 %v3855_v51, %v3854_v8 }
 0x2f3   : > { %v3857_v14 = vpop.f32.mrf.mxu0  ;;  %v3968_v39 = vadd.f32 %v3967_v44, %v3966_v20  ;;  %v481_v44 = vld [vmem:[#allocation8 + $0x298] sm:$0xff] }
 0x2f4   : > { %v3969_v3 = vpop.f32.mrf.mxu1  ;;  %v3157_v56 = vadd.f32 %v3049_v2, %v463_v41  ;;  %v2893_v49 = vadd.f32 %v3856_v54, %v5601_v37 }
 0x2f5   : > { %v3858_v23 = vpop.f32.mrf.mxu0 }
 0x2f6   : > { %v3970_v21 = vpop.f32.mrf.mxu1  ;;  %3253 = vst [vmem:[#allocation8 + $0x208] sm:$0xff] %v3157_v56  ;;  %v3054_v34 = vadd.f32 %v3968_v39, %v2893_v49  ;;  %v3859_v31 = vadd.f32 %v3858_v23, %v3857_v14  ;;  %v484_v23 = vld [vmem:[#allocation8 + $0x2b0] sm:$0xff] }
 0x2f7   : > { %v3860_v58 = vpop.f32.mrf.mxu0  ;;  %v3971_v17 = vadd.f32 %v3970_v21, %v3969_v3 }
 0x2f8   : > { %v3972_v15 = vpop.f32.mrf.mxu1  ;;  %v3160_v11 = vadd.f32 %v3054_v34, %v466_v60  ;;  %v2896_v33 = vadd.f32 %v3859_v31, %v5605_v38 }
 0x2f9   : > { %v3861_v42 = vpop.f32.mrf.mxu0 }
 0x2fa   : > { %v3973_v7 = vpop.f32.mrf.mxu1  ;;  %3256 = vst [vmem:[#allocation8 + $0x220] sm:$0xff] %v3160_v11  ;;  %v3057_v6 = vadd.f32 %v3971_v17, %v2896_v33  ;;  %v3862_v30 = vadd.f32 %v3861_v42, %v3860_v58 }
 0x2fb   : > { %v3863_v37 = vpop.f32.mrf.mxu0  ;;  %v3974_v24 = vadd.f32 %v3973_v7, %v3972_v15 }
 0x2fc   : > { %v3975_v61 = vpop.f32.mrf.mxu1  ;;  %v3163_v63 = vadd.f32 %v3057_v6, %v469_v13  ;;  %v2901_v25 = vadd.f32 %v3862_v30, %v5609_v36  ;;  %v487_v13 = vld [vmem:[#allocation8 + $0x2c8] sm:$0xff] }
 0x2fd   : > { %v3864_v1 = vpop.f32.mrf.mxu0 }
 0x2fe   : > { %v3976_v12 = vpop.f32.mrf.mxu1  ;;  %3259 = vst [vmem:[#allocation8 + $0x238] sm:$0xff] %v3163_v63  ;;  %v3062_v52 = vadd.f32 %v3974_v24, %v2901_v25  ;;  %v3865_v50 = vadd.f32 %v3864_v1, %v3863_v37  ;;  %v490_v24 = vld [vmem:[#allocation8 + $0x2e0] sm:$0xff] }
 0x2ff   : > { %v3866_v38 = vpop.f32.mrf.mxu0  ;;  %v3977_v16 = vadd.f32 %v3976_v12, %v3975_v61 }
 0x300   : > { %v3978_v27 = vpop.f32.mrf.mxu1  ;;  %v3166_v18 = vadd.f32 %v3062_v52, %v472_v32  ;;  %v2904_v62 = vadd.f32 %v3865_v50, %v5613_v57 }
 0x301   : > { %v3867_v22 = vpop.f32.mrf.mxu0 }
 0x302   : > { %v3979_v53 = vpop.f32.mrf.mxu1  ;;  %3262 = vst [vmem:[#allocation8 + $0x250] sm:$0xff] %v3166_v18  ;;  %v3065_v47 = vadd.f32 %v3977_v16, %v2904_v62  ;;  %v3868_v55 = vadd.f32 %v3867_v22, %v3866_v38 }
 0x303   : > { %v3869_v36 = vpop.f32.mrf.mxu0  ;;  %v3980_v43 = vadd.f32 %v3979_v53, %v3978_v27  ;;  %v493_v27 = vld [vmem:[#allocation8 + $0x2f8] sm:$0xff] }
 0x304   : > { %v3981_v26 = vpop.f32.mrf.mxu1  ;;  %v3169_v0 = vadd.f32 %v3065_v47, %v475_v4  ;;  %v2909_v48 = vadd.f32 %v3868_v55, %v5617_v19 }
 0x305   : > { %v3870_v10 = vpop.f32.mrf.mxu0 }
 0x306   : > { %v3982_v8 = vpop.f32.mrf.mxu1  ;;  %3265 = vst [vmem:[#allocation8 + $0x268] sm:$0xff] %v3169_v0  ;;  %v3070_v20 = vadd.f32 %v3980_v43, %v2909_v48  ;;  %v3871_v29 = vadd.f32 %v3870_v10, %v3869_v36 }
 0x307   : > { %v3872_v57 = vpop.f32.mrf.mxu0  ;;  %v3983_v51 = vadd.f32 %v3982_v8, %v3981_v26 }
 0x308   : > { %v3984_v45 = vpop.f32.mrf.mxu1  ;;  %v3172_v46 = vadd.f32 %v3070_v20, %v478_v40  ;;  %v2912_v41 = vadd.f32 %v3871_v29, %v5621_v5 }
 0x309   : > { %v3873_v2 = vpop.f32.mrf.mxu0 }
 0x30a   : > { %v3985_v54 = vpop.f32.mrf.mxu1  ;;  %3268 = vst [vmem:[#allocation8 + $0x280] sm:$0xff] %v3172_v46  ;;  %v3073_v14 = vadd.f32 %v3983_v51, %v2912_v41  ;;  %v3874_v3 = vadd.f32 %v3873_v2, %v3872_v57 }
 0x30b   : > { %v3875_v19 = vpop.f32.mrf.mxu0  ;;  %v3986_v60 = vadd.f32 %v3985_v54, %v3984_v45 }
 0x30c   : > { %v3987_v56 = vpop.f32.mrf.mxu1  ;;  %v3175_v49 = vadd.f32 %v3073_v14, %v481_v44  ;;  %v2917_v39 = vadd.f32 %v3874_v3, %v5625_v35 }
 0x30d   : > { %v3876_v21 = vpop.f32.mrf.mxu0 }
 0x30e   : > { %v3988_v34 = vpop.f32.mrf.mxu1  ;;  %3271 = vst [vmem:[#allocation8 + $0x298] sm:$0xff] %v3175_v49  ;;  %v3078_v31 = vadd.f32 %v3986_v60, %v2917_v39  ;;  %v3877_v58 = vadd.f32 %v3876_v21, %v3875_v19 }
 0x30f   : > { %v3878_v5 = vpop.f32.mrf.mxu0  ;;  %v3989_v17 = vadd.f32 %v3988_v34, %v3987_v56 }
 0x310   : > { %v3990_v15 = vpop.f32.mrf.mxu1  ;;  %v3178_v11 = vadd.f32 %v3078_v31, %v484_v23  ;;  %v2920_v33 = vadd.f32 %v3877_v58, %v5629_v9 }
 0x311   : > { %v3879_v42 = vpop.f32.mrf.mxu0 }
 0x312   : > { %v3991_v7 = vpop.f32.mrf.mxu1  ;;  %3274 = vst [vmem:[#allocation8 + $0x2b0] sm:$0xff] %v3178_v11  ;;  %v3081_v6 = vadd.f32 %v3989_v17, %v2920_v33  ;;  %v3880_v30 = vadd.f32 %v3879_v42, %v3878_v5 }
 0x313   : > { %v3881_v35 = vpop.f32.mrf.mxu0  ;;  %v3992_v25 = vadd.f32 %v3991_v7, %v3990_v15 }
 0x314   : > { %v3993_v37 = vpop.f32.mrf.mxu1  ;;  %v3181_v61 = vadd.f32 %v3081_v6, %v487_v13  ;;  %v2925_v63 = vadd.f32 %v3880_v30, %v5633_v28 }
 0x315   : > { %v3882_v32 = vpop.f32.mrf.mxu0 }
 0x316   : > { %v3994_v1 = vpop.f32.mrf.mxu1  ;;  %3277 = vst [vmem:[#allocation8 + $0x2c8] sm:$0xff] %v3181_v61  ;;  %v3086_v12 = vadd.f32 %v3992_v25, %v2925_v63  ;;  %v3883_v9 = vadd.f32 %v3882_v32, %v3881_v35 }
 0x317   : > { %v3995_v38 = vadd.f32 %v3994_v1, %v3993_v37 }
 0x318   : > { %v3184_v52 = vadd.f32 %v3086_v12, %v490_v24  ;;  %v2928_v50 = vadd.f32 %v3883_v9, %v5637_v59 }
 0x31a   : > { %3280 = vst [vmem:[#allocation8 + $0x2e0] sm:$0xff] %v3184_v52  ;;  %v3089_v18 = vadd.f32 %v3995_v38, %v2928_v50 }
 0x31c   : > { %v3187_v28 = vadd.f32 %v3089_v18, %v493_v27 }
 0x31e   : > { %3283 = vst [vmem:[#allocation8 + $0x2f8] sm:$0xff] %v3187_v28 }
 0x31f   : > { %4550 = shalt.err (!%p4547_p5)
}
 0x320   : > { %s4634_s8 = smov 384   ;;  %s4635_s9 = smov 24  }
 0x321   : > { %4010 = dma.vmem_to_hbm [thread:$0]  (%p4028_p8), %s3297_s23, 12288, %s5704_s3, [#allocation4], %s4634_s8, %s4634_s8, %s4635_s9  }
 0x322   : > { %4598 = dma.done.wait (%p4028_p8), [#allocation4], 12288  }
 0x323   : > { %4600 = vsyncadd (%p4028_p8), [#allocation4], 4294955008 }
 0x324 PF: > { %s20_s17 = sadd.s32 1, %s4623_s17   ;;  %s5782_s20 = sld [smem:[#allocation13_spill]] }
 0x325   : > { %p17_p12 = scmp.ge.s32.totalorder %s20_s17, 4   ;;  %s5783_s12 = smov %s4607_s13 }
 0x326   : > { %s5784_s13 = smov %s4611_s14  ;;  %s5785_s14 = smov %s4711_s24 }
 0x327   : > { %s5786_s15 = smov %s4619_s16  ;;  %19 = sbr.rel (!%p17_p12) target bundleno = 10 (0xa), region = 92 }
 0x32a   : > { %s5787_s16 = smov %s5782_s20 }
 0x32c   :  { %3312 = vsyncpa [#allocation3], 1 }
 0x32d   :  { %3314 = vsyncpa [#allocation3 + $0x1], 1 }
 0x32e   :  { %3315 = vsyncpa [#allocation6], 1 }
 0x32f   :  { %3317 = vsyncpa [#allocation6 + $0x1], 1 }
 0x330   :  { %3318 = vsyncpa [#allocation4], 1 }
 0x331   :  { %3320 = vsyncpa [#allocation4 + $0x1], 1 }

</bundles_post_ra>
